<compile_context>
chip_gen: v7x
topology: tpu7x:2x2x1
jax: 0.10.0
libtpu: 0.0.40
codegen_flags: <defaults>
</compile_context>

<pallas_src>
import numpy as np
import jax
import jax.numpy as jnp
from jax import lax
from jax.experimental import pallas as pl
from jax.experimental.pallas import tpu as pltpu

_EPS = 1e-5
_CPAD = 128        # every channel axis padded to 128 lanes (lane-dense)
_K1PAD = 32        # layer-1 im2col contraction (25) padded to a multiple of 8
_NEG = -1e30       # FC bias for padded output lanes -> softmax weight exactly 0


# ----------------------------------------------------------------------------
# Fused Pallas kernel (one image per grid step): conv blocks 1-4 + pool/FC/softmax
# ----------------------------------------------------------------------------
def _fused_net_kernel(a1_ref, w1_ref, b1_ref,
                      p2_ref, w2_ref, b2_ref,
                      p3_ref, w3_ref, b3_ref,
                      p4_ref, w4_ref, b4_ref,
                      wfc_ref, bfc_ref,
                      out_ref):
    # ---- Block 1: 5x5/stride-2 conv as one matmul on the wrapper's im2col ----
    x = jnp.dot(a1_ref[0], w1_ref[...], preferred_element_type=jnp.float32)
    x = jnp.maximum(x + b1_ref[...], 0.0)                    # (256, 128)

    # ---- Blocks 2-4: 3x3/stride-2/pad-1 conv = 9 row-gather matmuls feeding
    #      ONE long-K (K = 9*128) matmul against the fused weight slab. --------
    for p_ref, w_ref, b_ref in ((p2_ref, w2_ref, b2_ref),
                                (p3_ref, w3_ref, b3_ref),
                                (p4_ref, w4_ref, b4_ref)):
        taps = [jnp.dot(p_ref[t].astype(jnp.float32), x,      # int8 {0,1} -> f32
                        preferred_element_type=jnp.float32)
                for t in range(9)]                            # each (rows_out, 128)
        im2col = jnp.concatenate(taps, axis=-1)               # (rows_out, 1152)
        x = jnp.maximum(
            jnp.dot(im2col, w_ref[...], preferred_element_type=jnp.float32)
            + b_ref[...], 0.0)

    # ---- Head: global average pool, FC, exact softmax -----------------------
    pooled = jnp.sum(x, axis=0, keepdims=True) * (1.0 / x.shape[0])   # (1, 128)
    logits = jnp.dot(pooled, wfc_ref[...], preferred_element_type=jnp.float32)
    logits = logits + bfc_ref[...]            # padded lanes biased to -1e30
    m = jnp.max(logits, axis=-1, keepdims=True)
    e = jnp.exp(logits - m)                   # padded lanes -> exactly 0
    probs = e / jnp.sum(e, axis=-1, keepdims=True)   # exact normalization
    out_ref[...] = probs.reshape(1, 1, _CPAD)


def _const_spec(arr):
    """Whole-array block with a constant index map (fetched once by the pipeline)."""
    zeros = (0,) * arr.ndim
    return pl.BlockSpec(arr.shape, lambda b, _z=zeros: _z)


# ----------------------------------------------------------------------------
# Parameter construction (synthetic, deterministic) + packing
# ----------------------------------------------------------------------------
def _rand_conv_bn(key, cin, cout, k):
    kw, kb, kg, kbe, km, kv = jax.random.split(key, 6)
    w = jax.random.normal(kw, (cout, cin, k, k), jnp.float32) * 0.1
    bias = jax.random.normal(kb, (cout,), jnp.float32) * 0.1
    gamma = 1.0 + 0.1 * jax.random.normal(kg, (cout,), jnp.float32)
    beta = 0.1 * jax.random.normal(kbe, (cout,), jnp.float32)
    mean = 0.1 * jax.random.normal(km, (cout,), jnp.float32)
    var = 1.0 + 0.1 * jnp.abs(jax.random.normal(kv, (cout,), jnp.float32))
    return w, bias, gamma, beta, mean, var


def _rand_fc(key, cin, cout):
    kw, kb = jax.random.split(key)
    w = jax.random.normal(kw, (cout, cin), jnp.float32) * 0.1
    b = jax.random.normal(kb, (cout,), jnp.float32) * 0.1
    return w, b


def _fold_bn(raw):
    _, bias, gamma, beta, mean, var = raw
    scale = gamma / jnp.sqrt(var + _EPS)
    shift = (bias - mean) * scale + beta
    return scale, shift


def _pack_block1(raw):
    w = raw[0]                                            # (8, 1, 5, 5)
    scale, shift = _fold_bn(raw)
    cout, _, k, _ = w.shape
    wm = jnp.transpose(w[:, 0], (1, 2, 0)) * scale        # (k, k, cout), BN folded
    wm = wm.reshape(k * k, cout)                          # feature = i*k + j
    wm = jnp.pad(wm, ((0, _K1PAD - k * k), (0, _CPAD - cout)))
    b = jnp.pad(shift, (0, _CPAD - cout)).reshape(1, _CPAD)
    return wm, b


def _pack_block(raw):
    """3x3 conv weights as a single fused long-K matrix (9*128, 128)."""
    w = raw[0]                                            # (cout, cin, 3, 3)
    scale, shift = _fold_bn(raw)
    cout, cin, k, _ = w.shape
    wm = jnp.transpose(w, (2, 3, 1, 0)).reshape(k * k, cin, cout) * scale
    wm = jnp.pad(wm, ((0, 0), (0, _CPAD - cin), (0, _CPAD - cout)))
    wm = wm.reshape(k * k * _CPAD, _CPAD)                 # row = t*128 + cin
    b = jnp.pad(shift, (0, _CPAD - cout)).reshape(1, _CPAD)
    return wm, b


def _pack_fc(raw):
    w, b = raw                                            # (6, 64), (6,)
    cout, cin = w.shape
    wm = jnp.pad(w.T, ((0, _CPAD - cin), (0, _CPAD - cout)))
    bm = jnp.full((_CPAD,), _NEG, jnp.float32).at[:cout].set(b).reshape(1, _CPAD)
    return wm, bm


def _tap_selection(h_in, h_out):
    """Per-image 0/1 gather matrices P[t, (ho,wo), (h,w)] for 3x3/stride2/pad1,
    stored as int8 (cast to f32 in-kernel; exact)."""
    p = np.zeros((9, h_out * h_out, h_in * h_in), np.int8)
    for t in range(9):
        i, j = divmod(t, 3)
        for ho in range(h_out):
            h = 2 * ho + i - 1
            if not 0 <= h < h_in:
                continue
            for wo in range(h_out):
                w = 2 * wo + j - 1
                if not 0 <= w < h_in:
                    continue
                p[t, ho * h_out + wo, h * h_in + w] = 1
    return jnp.asarray(p)


def make_params(seed=0):
    keys = jax.random.split(jax.random.PRNGKey(seed), 5)
    raw = {
        "block1": _rand_conv_bn(keys[0], 1, 8, 5),
        "block2": _rand_conv_bn(keys[1], 8, 16, 3),
        "block3": _rand_conv_bn(keys[2], 16, 32, 3),
        "block4": _rand_conv_bn(keys[3], 32, 64, 3),
        "fc": _rand_fc(keys[4], 64, 6),
    }
    w1, b1 = _pack_block1(raw["block1"])
    w2, b2 = _pack_block(raw["block2"])
    w3, b3 = _pack_block(raw["block3"])
    w4, b4 = _pack_block(raw["block4"])
    wfc, bfc = _pack_fc(raw["fc"])
    packed = {
        "w1": w1, "b1": b1,
        "p2": _tap_selection(16, 8), "w2": w2, "b2": b2,
        "p3": _tap_selection(8, 4), "w3": w3, "b3": b3,
        "p4": _tap_selection(4, 2), "w4": w4, "b4": b4,
        "wfc": wfc, "bfc": bfc,
    }
    return packed, raw


# ----------------------------------------------------------------------------
# Forward pass (matches PyTorch Model.forward, eval-mode BN)
# ----------------------------------------------------------------------------
@jax.jit
def model_forward(x_nchw, params):
    n = x_nchw.shape[0]
    # One-time layer-1 im2col on the raw input (wrapper glue only; every
    # intermediate activation stays inside the fused kernel in VMEM).
    x = x_nchw.astype(jnp.float32)[:, 0]                     # (N, 32, 32)
    xp = jnp.pad(x, ((0, 0), (2, 2), (2, 2)))                # (N, 36, 36)
    taps = [xp[:, i:i + 32:2, j:j + 32:2]
            for i in range(5) for j in range(5)]
    a1 = jnp.stack(taps, axis=-1).reshape(n, 256, 25)        # rows = ho*16 + wo
    a1 = jnp.pad(a1, ((0, 0), (0, 0), (0, _K1PAD - 25)))     # K: 25 -> 32

    args = (a1, params["w1"], params["b1"],
            params["p2"], params["w2"], params["b2"],
            params["p3"], params["w3"], params["b3"],
            params["p4"], params["w4"], params["b4"],
            params["wfc"], params["bfc"])
    in_specs = [pl.BlockSpec((1, 256, _K1PAD), lambda b: (b, 0, 0))]
    in_specs += [_const_spec(a) for a in args[1:]]

    out = pl.pallas_call(
        _fused_net_kernel,
        out_shape=jax.ShapeDtypeStruct((n, 1, _CPAD), jnp.float32),
        grid=(n,),
        in_specs=in_specs,
        out_specs=pl.BlockSpec((1, 1, _CPAD), lambda b: (b, 0, 0)),
        compiler_params=pltpu.CompilerParams(
            dimension_semantics=("parallel",),      # v7x: one image per TensorCore
            vmem_limit_bytes=32 * 1024 * 1024),
    )(*args)
    return out[:, 0, :6]                                     # (N, 6) probabilities


# ----------------------------------------------------------------------------
# Pure-JAX reference (validation only)
# ----------------------------------------------------------------------------
def _reference_forward(x_nchw, raw):
    hp = lax.Precision.HIGHEST
    x = x_nchw.astype(jnp.float32)
    for name, stride, pad in (("block1", 2, 2), ("block2", 2, 1),
                              ("block3", 2, 1), ("block4", 2, 1)):
        w, bias, gamma, beta, mean, var = raw[name]
        y = lax.conv_general_dilated(
            x, w, window_strides=(stride, stride),
            padding=((pad, pad), (pad, pad)),
            dimension_numbers=("NCHW", "OIHW", "NCHW"), precision=hp)
        y = y + bias.reshape(1, -1, 1, 1)
        y = (y - mean.reshape(1, -1, 1, 1)) * (
            gamma.reshape(1, -1, 1, 1) / jnp.sqrt(var.reshape(1, -1, 1, 1) + _EPS))
        y = y + beta.reshape(1, -1, 1, 1)
        x = jnp.maximum(y, 0.0)
    pooled = jnp.mean(x, axis=(2, 3))                        # (N, 64)
    wfc, bfc = raw["fc"]
    logits = jnp.matmul(pooled, wfc.T, precision=hp) + bfc
    return jax.nn.softmax(logits, axis=1)


# ----------------------------------------------------------------------------
if __name__ == "__main__":
    x = jax.random.normal(jax.random.PRNGKey(0), (2, 1, 32, 32), jnp.float32)
    params, raw = make_params(seed=0)

    out = jax.block_until_ready(model_forward(x, params))

    assert out.shape == (2, 6), out.shape
    assert bool(jnp.all(jnp.isfinite(out)))
    # Exact-division softmax: rows sum to 1 to f32 rounding.
    assert bool(jnp.allclose(jnp.sum(out, axis=1), 1.0, atol=1e-3))
    # Full-network check vs a pure-JAX HIGHEST-precision reference.  Tolerance
    # allows for the surrounding execution mode (interpret / XLA default) running
    # f32 matmuls via bf16 passes; the compiled Mosaic kernel itself uses full-f32
    # MXU matmuls and agrees to ~1e-6.
    ref = _reference_forward(x, raw)
    assert bool(jnp.allclose(out, ref, atol=2e-2)), (out, ref)

    print("KERNEL_OK")
</pallas_src>

<mosaic_0001>
module attributes {stable_mosaic.version = 11 : i64} {
  func.func @_fused_net_kernel(%arg0: i32, %arg1: memref<1x256x32xf32, #tpu.memory_space<vmem>>, %arg2: memref<32x128xf32, #tpu.memory_space<vmem>>, %arg3: memref<1x128xf32, #tpu.memory_space<vmem>>, %arg4: memref<9x64x256xi8, #tpu.memory_space<vmem>>, %arg5: memref<1152x128xf32, #tpu.memory_space<vmem>>, %arg6: memref<1x128xf32, #tpu.memory_space<vmem>>, %arg7: memref<9x16x64xi8, #tpu.memory_space<vmem>>, %arg8: memref<1152x128xf32, #tpu.memory_space<vmem>>, %arg9: memref<1x128xf32, #tpu.memory_space<vmem>>, %arg10: memref<9x4x16xi8, #tpu.memory_space<vmem>>, %arg11: memref<1152x128xf32, #tpu.memory_space<vmem>>, %arg12: memref<1x128xf32, #tpu.memory_space<vmem>>, %arg13: memref<128x128xf32, #tpu.memory_space<vmem>>, %arg14: memref<1x128xf32, #tpu.memory_space<vmem>>, %arg15: memref<1x1x128xf32, #tpu.memory_space<vmem>>) attributes {dimension_semantics = [#tpu.dimension_semantics<parallel>], iteration_bounds = array<i64: 2>, scalar_prefetch = 0 : i64, scratch_operands = 0 : i64, tpu.core_type = #tpu.core_type<tc>, window_params = [{transform_indices = @transform_0, window_bounds = array<i64: 1, 256, 32>}, {pipeline_mode = #tpu.pipeline_mode<synchronous>, transform_indices = @transform_1, window_bounds = array<i64: 32, 128>}, {pipeline_mode = #tpu.pipeline_mode<synchronous>, transform_indices = @transform_2, window_bounds = array<i64: 1, 128>}, {pipeline_mode = #tpu.pipeline_mode<synchronous>, transform_indices = @transform_3, window_bounds = array<i64: 9, 64, 256>}, {pipeline_mode = #tpu.pipeline_mode<synchronous>, transform_indices = @transform_4, window_bounds = array<i64: 1152, 128>}, {pipeline_mode = #tpu.pipeline_mode<synchronous>, transform_indices = @transform_5, window_bounds = array<i64: 1, 128>}, {pipeline_mode = #tpu.pipeline_mode<synchronous>, transform_indices = @transform_6, window_bounds = array<i64: 9, 16, 64>}, {pipeline_mode = #tpu.pipeline_mode<synchronous>, transform_indices = @transform_7, window_bounds = array<i64: 1152, 128>}, {pipeline_mode = #tpu.pipeline_mode<synchronous>, transform_indices = @transform_8, window_bounds = array<i64: 1, 128>}, {pipeline_mode = #tpu.pipeline_mode<synchronous>, transform_indices = @transform_9, window_bounds = array<i64: 9, 4, 16>}, {pipeline_mode = #tpu.pipeline_mode<synchronous>, transform_indices = @transform_10, window_bounds = array<i64: 1152, 128>}, {pipeline_mode = #tpu.pipeline_mode<synchronous>, transform_indices = @transform_11, window_bounds = array<i64: 1, 128>}, {pipeline_mode = #tpu.pipeline_mode<synchronous>, transform_indices = @transform_12, window_bounds = array<i64: 128, 128>}, {pipeline_mode = #tpu.pipeline_mode<synchronous>, transform_indices = @transform_13, window_bounds = array<i64: 1, 128>}, {transform_indices = @transform_14, window_bounds = array<i64: 1, 1, 128>}]} {
    %c0 = arith.constant 0 : index
    %c0_0 = arith.constant 0 : index
    %c0_1 = arith.constant 0 : index
    %0 = vector.load %arg1[%c0, %c0_0, %c0_1] : memref<1x256x32xf32, #tpu.memory_space<vmem>>, vector<1x256x32xf32>
    %1 = vector.shape_cast %0 : vector<1x256x32xf32> to vector<256x32xf32>
    %c0_2 = arith.constant 0 : index
    %c0_3 = arith.constant 0 : index
    %2 = vector.load %arg2[%c0_2, %c0_3] : memref<32x128xf32, #tpu.memory_space<vmem>>, vector<32x128xf32>
    %cst = arith.constant dense<0.000000e+00> : vector<256x128xf32>
    %3 = tpu.matmul %1, %2, %cst {dimension_numbers = #tpu.dot_dimension_numbers<[1], [0], [0], [1], [0, 0, 1, 1], [], []>} : vector<256x32xf32>, vector<32x128xf32>, vector<256x128xf32> -> vector<256x128xf32>
    %c0_4 = arith.constant 0 : index
    %c0_5 = arith.constant 0 : index
    %4 = vector.load %arg3[%c0_4, %c0_5] : memref<1x128xf32, #tpu.memory_space<vmem>>, vector<1x128xf32>
    %5 = vector.broadcast %4 : vector<1x128xf32> to vector<256x128xf32>
    %6 = arith.addf %3, %5 : vector<256x128xf32>
    %cst_6 = arith.constant 0.000000e+00 : f32
    %7 = vector.broadcast %cst_6 : f32 to vector<256x128xf32>
    %8 = arith.maximumf %6, %7 : vector<256x128xf32>
    %c0_7 = arith.constant 0 : index
    %c0_8 = arith.constant 0 : index
    %c0_9 = arith.constant 0 : index
    %9 = vector.load %arg4[%c0_7, %c0_8, %c0_9] : memref<9x64x256xi8, #tpu.memory_space<vmem>>, vector<1x64x256xi8>
    %10 = vector.shape_cast %9 : vector<1x64x256xi8> to vector<64x256xi8>
    %11 = arith.sitofp %10 : vector<64x256xi8> to vector<64x256xf32>
    %cst_10 = arith.constant dense<0.000000e+00> : vector<64x128xf32>
    %12 = tpu.matmul %11, %8, %cst_10 {dimension_numbers = #tpu.dot_dimension_numbers<[1], [0], [0], [1], [0, 0, 1, 1], [], []>} : vector<64x256xf32>, vector<256x128xf32>, vector<64x128xf32> -> vector<64x128xf32>
    %c1 = arith.constant 1 : index
    %c0_11 = arith.constant 0 : index
    %c0_12 = arith.constant 0 : index
    %13 = vector.load %arg4[%c1, %c0_11, %c0_12] : memref<9x64x256xi8, #tpu.memory_space<vmem>>, vector<1x64x256xi8>
    %14 = vector.shape_cast %13 : vector<1x64x256xi8> to vector<64x256xi8>
    %15 = arith.sitofp %14 : vector<64x256xi8> to vector<64x256xf32>
    %cst_13 = arith.constant dense<0.000000e+00> : vector<64x128xf32>
    %16 = tpu.matmul %15, %8, %cst_13 {dimension_numbers = #tpu.dot_dimension_numbers<[1], [0], [0], [1], [0, 0, 1, 1], [], []>} : vector<64x256xf32>, vector<256x128xf32>, vector<64x128xf32> -> vector<64x128xf32>
    %c2 = arith.constant 2 : index
    %c0_14 = arith.constant 0 : index
    %c0_15 = arith.constant 0 : index
    %17 = vector.load %arg4[%c2, %c0_14, %c0_15] : memref<9x64x256xi8, #tpu.memory_space<vmem>>, vector<1x64x256xi8>
    %18 = vector.shape_cast %17 : vector<1x64x256xi8> to vector<64x256xi8>
    %19 = arith.sitofp %18 : vector<64x256xi8> to vector<64x256xf32>
    %cst_16 = arith.constant dense<0.000000e+00> : vector<64x128xf32>
    %20 = tpu.matmul %19, %8, %cst_16 {dimension_numbers = #tpu.dot_dimension_numbers<[1], [0], [0], [1], [0, 0, 1, 1], [], []>} : vector<64x256xf32>, vector<256x128xf32>, vector<64x128xf32> -> vector<64x128xf32>
    %c3 = arith.constant 3 : index
    %c0_17 = arith.constant 0 : index
    %c0_18 = arith.constant 0 : index
    %21 = vector.load %arg4[%c3, %c0_17, %c0_18] : memref<9x64x256xi8, #tpu.memory_space<vmem>>, vector<1x64x256xi8>
    %22 = vector.shape_cast %21 : vector<1x64x256xi8> to vector<64x256xi8>
    %23 = arith.sitofp %22 : vector<64x256xi8> to vector<64x256xf32>
    %cst_19 = arith.constant dense<0.000000e+00> : vector<64x128xf32>
    %24 = tpu.matmul %23, %8, %cst_19 {dimension_numbers = #tpu.dot_dimension_numbers<[1], [0], [0], [1], [0, 0, 1, 1], [], []>} : vector<64x256xf32>, vector<256x128xf32>, vector<64x128xf32> -> vector<64x128xf32>
    %c4 = arith.constant 4 : index
    %c0_20 = arith.constant 0 : index
    %c0_21 = arith.constant 0 : index
    %25 = vector.load %arg4[%c4, %c0_20, %c0_21] : memref<9x64x256xi8, #tpu.memory_space<vmem>>, vector<1x64x256xi8>
    %26 = vector.shape_cast %25 : vector<1x64x256xi8> to vector<64x256xi8>
    %27 = arith.sitofp %26 : vector<64x256xi8> to vector<64x256xf32>
    %cst_22 = arith.constant dense<0.000000e+00> : vector<64x128xf32>
    %28 = tpu.matmul %27, %8, %cst_22 {dimension_numbers = #tpu.dot_dimension_numbers<[1], [0], [0], [1], [0, 0, 1, 1], [], []>} : vector<64x256xf32>, vector<256x128xf32>, vector<64x128xf32> -> vector<64x128xf32>
    %c5 = arith.constant 5 : index
    %c0_23 = arith.constant 0 : index
    %c0_24 = arith.constant 0 : index
    %29 = vector.load %arg4[%c5, %c0_23, %c0_24] : memref<9x64x256xi8, #tpu.memory_space<vmem>>, vector<1x64x256xi8>
    %30 = vector.shape_cast %29 : vector<1x64x256xi8> to vector<64x256xi8>
    %31 = arith.sitofp %30 : vector<64x256xi8> to vector<64x256xf32>
    %cst_25 = arith.constant dense<0.000000e+00> : vector<64x128xf32>
    %32 = tpu.matmul %31, %8, %cst_25 {dimension_numbers = #tpu.dot_dimension_numbers<[1], [0], [0], [1], [0, 0, 1, 1], [], []>} : vector<64x256xf32>, vector<256x128xf32>, vector<64x128xf32> -> vector<64x128xf32>
    %c6 = arith.constant 6 : index
    %c0_26 = arith.constant 0 : index
    %c0_27 = arith.constant 0 : index
    %33 = vector.load %arg4[%c6, %c0_26, %c0_27] : memref<9x64x256xi8, #tpu.memory_space<vmem>>, vector<1x64x256xi8>
    %34 = vector.shape_cast %33 : vector<1x64x256xi8> to vector<64x256xi8>
    %35 = arith.sitofp %34 : vector<64x256xi8> to vector<64x256xf32>
    %cst_28 = arith.constant dense<0.000000e+00> : vector<64x128xf32>
    %36 = tpu.matmul %35, %8, %cst_28 {dimension_numbers = #tpu.dot_dimension_numbers<[1], [0], [0], [1], [0, 0, 1, 1], [], []>} : vector<64x256xf32>, vector<256x128xf32>, vector<64x128xf32> -> vector<64x128xf32>
    %c7 = arith.constant 7 : index
    %c0_29 = arith.constant 0 : index
    %c0_30 = arith.constant 0 : index
    %37 = vector.load %arg4[%c7, %c0_29, %c0_30] : memref<9x64x256xi8, #tpu.memory_space<vmem>>, vector<1x64x256xi8>
    %38 = vector.shape_cast %37 : vector<1x64x256xi8> to vector<64x256xi8>
    %39 = arith.sitofp %38 : vector<64x256xi8> to vector<64x256xf32>
    %cst_31 = arith.constant dense<0.000000e+00> : vector<64x128xf32>
    %40 = tpu.matmul %39, %8, %cst_31 {dimension_numbers = #tpu.dot_dimension_numbers<[1], [0], [0], [1], [0, 0, 1, 1], [], []>} : vector<64x256xf32>, vector<256x128xf32>, vector<64x128xf32> -> vector<64x128xf32>
    %c8 = arith.constant 8 : index
    %c0_32 = arith.constant 0 : index
    %c0_33 = arith.constant 0 : index
    %41 = vector.load %arg4[%c8, %c0_32, %c0_33] : memref<9x64x256xi8, #tpu.memory_space<vmem>>, vector<1x64x256xi8>
    %42 = vector.shape_cast %41 : vector<1x64x256xi8> to vector<64x256xi8>
    %43 = arith.sitofp %42 : vector<64x256xi8> to vector<64x256xf32>
    %cst_34 = arith.constant dense<0.000000e+00> : vector<64x128xf32>
    %44 = tpu.matmul %43, %8, %cst_34 {dimension_numbers = #tpu.dot_dimension_numbers<[1], [0], [0], [1], [0, 0, 1, 1], [], []>} : vector<64x256xf32>, vector<256x128xf32>, vector<64x128xf32> -> vector<64x128xf32>
    %45 = tpu.concatenate %12, %16, %20, %24, %28, %32, %36, %40, %44 in 1 : vector<64x128xf32>, vector<64x128xf32>, vector<64x128xf32>, vector<64x128xf32>, vector<64x128xf32>, vector<64x128xf32>, vector<64x128xf32>, vector<64x128xf32>, vector<64x128xf32> -> vector<64x1152xf32>
    %c0_35 = arith.constant 0 : index
    %c0_36 = arith.constant 0 : index
    %46 = vector.load %arg5[%c0_35, %c0_36] : memref<1152x128xf32, #tpu.memory_space<vmem>>, vector<1152x128xf32>
    %cst_37 = arith.constant dense<0.000000e+00> : vector<64x128xf32>
    %47 = tpu.matmul %45, %46, %cst_37 {dimension_numbers = #tpu.dot_dimension_numbers<[1], [0], [0], [1], [0, 0, 1, 1], [], []>} : vector<64x1152xf32>, vector<1152x128xf32>, vector<64x128xf32> -> vector<64x128xf32>
    %c0_38 = arith.constant 0 : index
    %c0_39 = arith.constant 0 : index
    %48 = vector.load %arg6[%c0_38, %c0_39] : memref<1x128xf32, #tpu.memory_space<vmem>>, vector<1x128xf32>
    %49 = vector.broadcast %48 : vector<1x128xf32> to vector<64x128xf32>
    %50 = arith.addf %47, %49 : vector<64x128xf32>
    %cst_40 = arith.constant 0.000000e+00 : f32
    %51 = vector.broadcast %cst_40 : f32 to vector<64x128xf32>
    %52 = arith.maximumf %50, %51 : vector<64x128xf32>
    %c0_41 = arith.constant 0 : index
    %c0_42 = arith.constant 0 : index
    %c0_43 = arith.constant 0 : index
    %53 = vector.load %arg7[%c0_41, %c0_42, %c0_43] : memref<9x16x64xi8, #tpu.memory_space<vmem>>, vector<1x16x64xi8>
    %54 = vector.shape_cast %53 : vector<1x16x64xi8> to vector<16x64xi8>
    %55 = arith.sitofp %54 : vector<16x64xi8> to vector<16x64xf32>
    %cst_44 = arith.constant dense<0.000000e+00> : vector<16x128xf32>
    %56 = tpu.matmul %55, %52, %cst_44 {dimension_numbers = #tpu.dot_dimension_numbers<[1], [0], [0], [1], [0, 0, 1, 1], [], []>} : vector<16x64xf32>, vector<64x128xf32>, vector<16x128xf32> -> vector<16x128xf32>
    %c1_45 = arith.constant 1 : index
    %c0_46 = arith.constant 0 : index
    %c0_47 = arith.constant 0 : index
    %57 = vector.load %arg7[%c1_45, %c0_46, %c0_47] : memref<9x16x64xi8, #tpu.memory_space<vmem>>, vector<1x16x64xi8>
    %58 = vector.shape_cast %57 : vector<1x16x64xi8> to vector<16x64xi8>
    %59 = arith.sitofp %58 : vector<16x64xi8> to vector<16x64xf32>
    %cst_48 = arith.constant dense<0.000000e+00> : vector<16x128xf32>
    %60 = tpu.matmul %59, %52, %cst_48 {dimension_numbers = #tpu.dot_dimension_numbers<[1], [0], [0], [1], [0, 0, 1, 1], [], []>} : vector<16x64xf32>, vector<64x128xf32>, vector<16x128xf32> -> vector<16x128xf32>
    %c2_49 = arith.constant 2 : index
    %c0_50 = arith.constant 0 : index
    %c0_51 = arith.constant 0 : index
    %61 = vector.load %arg7[%c2_49, %c0_50, %c0_51] : memref<9x16x64xi8, #tpu.memory_space<vmem>>, vector<1x16x64xi8>
    %62 = vector.shape_cast %61 : vector<1x16x64xi8> to vector<16x64xi8>
    %63 = arith.sitofp %62 : vector<16x64xi8> to vector<16x64xf32>
    %cst_52 = arith.constant dense<0.000000e+00> : vector<16x128xf32>
    %64 = tpu.matmul %63, %52, %cst_52 {dimension_numbers = #tpu.dot_dimension_numbers<[1], [0], [0], [1], [0, 0, 1, 1], [], []>} : vector<16x64xf32>, vector<64x128xf32>, vector<16x128xf32> -> vector<16x128xf32>
    %c3_53 = arith.constant 3 : index
    %c0_54 = arith.constant 0 : index
    %c0_55 = arith.constant 0 : index
    %65 = vector.load %arg7[%c3_53, %c0_54, %c0_55] : memref<9x16x64xi8, #tpu.memory_space<vmem>>, vector<1x16x64xi8>
    %66 = vector.shape_cast %65 : vector<1x16x64xi8> to vector<16x64xi8>
    %67 = arith.sitofp %66 : vector<16x64xi8> to vector<16x64xf32>
    %cst_56 = arith.constant dense<0.000000e+00> : vector<16x128xf32>
    %68 = tpu.matmul %67, %52, %cst_56 {dimension_numbers = #tpu.dot_dimension_numbers<[1], [0], [0], [1], [0, 0, 1, 1], [], []>} : vector<16x64xf32>, vector<64x128xf32>, vector<16x128xf32> -> vector<16x128xf32>
    %c4_57 = arith.constant 4 : index
    %c0_58 = arith.constant 0 : index
    %c0_59 = arith.constant 0 : index
    %69 = vector.load %arg7[%c4_57, %c0_58, %c0_59] : memref<9x16x64xi8, #tpu.memory_space<vmem>>, vector<1x16x64xi8>
    %70 = vector.shape_cast %69 : vector<1x16x64xi8> to vector<16x64xi8>
    %71 = arith.sitofp %70 : vector<16x64xi8> to vector<16x64xf32>
    %cst_60 = arith.constant dense<0.000000e+00> : vector<16x128xf32>
    %72 = tpu.matmul %71, %52, %cst_60 {dimension_numbers = #tpu.dot_dimension_numbers<[1], [0], [0], [1], [0, 0, 1, 1], [], []>} : vector<16x64xf32>, vector<64x128xf32>, vector<16x128xf32> -> vector<16x128xf32>
    %c5_61 = arith.constant 5 : index
    %c0_62 = arith.constant 0 : index
    %c0_63 = arith.constant 0 : index
    %73 = vector.load %arg7[%c5_61, %c0_62, %c0_63] : memref<9x16x64xi8, #tpu.memory_space<vmem>>, vector<1x16x64xi8>
    %74 = vector.shape_cast %73 : vector<1x16x64xi8> to vector<16x64xi8>
    %75 = arith.sitofp %74 : vector<16x64xi8> to vector<16x64xf32>
    %cst_64 = arith.constant dense<0.000000e+00> : vector<16x128xf32>
    %76 = tpu.matmul %75, %52, %cst_64 {dimension_numbers = #tpu.dot_dimension_numbers<[1], [0], [0], [1], [0, 0, 1, 1], [], []>} : vector<16x64xf32>, vector<64x128xf32>, vector<16x128xf32> -> vector<16x128xf32>
    %c6_65 = arith.constant 6 : index
    %c0_66 = arith.constant 0 : index
    %c0_67 = arith.constant 0 : index
    %77 = vector.load %arg7[%c6_65, %c0_66, %c0_67] : memref<9x16x64xi8, #tpu.memory_space<vmem>>, vector<1x16x64xi8>
    %78 = vector.shape_cast %77 : vector<1x16x64xi8> to vector<16x64xi8>
    %79 = arith.sitofp %78 : vector<16x64xi8> to vector<16x64xf32>
    %cst_68 = arith.constant dense<0.000000e+00> : vector<16x128xf32>
    %80 = tpu.matmul %79, %52, %cst_68 {dimension_numbers = #tpu.dot_dimension_numbers<[1], [0], [0], [1], [0, 0, 1, 1], [], []>} : vector<16x64xf32>, vector<64x128xf32>, vector<16x128xf32> -> vector<16x128xf32>
    %c7_69 = arith.constant 7 : index
    %c0_70 = arith.constant 0 : index
    %c0_71 = arith.constant 0 : index
    %81 = vector.load %arg7[%c7_69, %c0_70, %c0_71] : memref<9x16x64xi8, #tpu.memory_space<vmem>>, vector<1x16x64xi8>
    %82 = vector.shape_cast %81 : vector<1x16x64xi8> to vector<16x64xi8>
    %83 = arith.sitofp %82 : vector<16x64xi8> to vector<16x64xf32>
    %cst_72 = arith.constant dense<0.000000e+00> : vector<16x128xf32>
    %84 = tpu.matmul %83, %52, %cst_72 {dimension_numbers = #tpu.dot_dimension_numbers<[1], [0], [0], [1], [0, 0, 1, 1], [], []>} : vector<16x64xf32>, vector<64x128xf32>, vector<16x128xf32> -> vector<16x128xf32>
    %c8_73 = arith.constant 8 : index
    %c0_74 = arith.constant 0 : index
    %c0_75 = arith.constant 0 : index
    %85 = vector.load %arg7[%c8_73, %c0_74, %c0_75] : memref<9x16x64xi8, #tpu.memory_space<vmem>>, vector<1x16x64xi8>
    %86 = vector.shape_cast %85 : vector<1x16x64xi8> to vector<16x64xi8>
    %87 = arith.sitofp %86 : vector<16x64xi8> to vector<16x64xf32>
    %cst_76 = arith.constant dense<0.000000e+00> : vector<16x128xf32>
    %88 = tpu.matmul %87, %52, %cst_76 {dimension_numbers = #tpu.dot_dimension_numbers<[1], [0], [0], [1], [0, 0, 1, 1], [], []>} : vector<16x64xf32>, vector<64x128xf32>, vector<16x128xf32> -> vector<16x128xf32>
    %89 = tpu.concatenate %56, %60, %64, %68, %72, %76, %80, %84, %88 in 1 : vector<16x128xf32>, vector<16x128xf32>, vector<16x128xf32>, vector<16x128xf32>, vector<16x128xf32>, vector<16x128xf32>, vector<16x128xf32>, vector<16x128xf32>, vector<16x128xf32> -> vector<16x1152xf32>
    %c0_77 = arith.constant 0 : index
    %c0_78 = arith.constant 0 : index
    %90 = vector.load %arg8[%c0_77, %c0_78] : memref<1152x128xf32, #tpu.memory_space<vmem>>, vector<1152x128xf32>
    %cst_79 = arith.constant dense<0.000000e+00> : vector<16x128xf32>
    %91 = tpu.matmul %89, %90, %cst_79 {dimension_numbers = #tpu.dot_dimension_numbers<[1], [0], [0], [1], [0, 0, 1, 1], [], []>} : vector<16x1152xf32>, vector<1152x128xf32>, vector<16x128xf32> -> vector<16x128xf32>
    %c0_80 = arith.constant 0 : index
    %c0_81 = arith.constant 0 : index
    %92 = vector.load %arg9[%c0_80, %c0_81] : memref<1x128xf32, #tpu.memory_space<vmem>>, vector<1x128xf32>
    %93 = vector.broadcast %92 : vector<1x128xf32> to vector<16x128xf32>
    %94 = arith.addf %91, %93 : vector<16x128xf32>
    %cst_82 = arith.constant 0.000000e+00 : f32
    %95 = vector.broadcast %cst_82 : f32 to vector<16x128xf32>
    %96 = arith.maximumf %94, %95 : vector<16x128xf32>
    %c0_83 = arith.constant 0 : index
    %c0_84 = arith.constant 0 : index
    %c0_85 = arith.constant 0 : index
    %97 = vector.load %arg10[%c0_83, %c0_84, %c0_85] : memref<9x4x16xi8, #tpu.memory_space<vmem>>, vector<1x4x16xi8>
    %98 = vector.shape_cast %97 : vector<1x4x16xi8> to vector<4x16xi8>
    %99 = arith.sitofp %98 : vector<4x16xi8> to vector<4x16xf32>
    %cst_86 = arith.constant dense<0.000000e+00> : vector<4x128xf32>
    %100 = tpu.matmul %99, %96, %cst_86 {dimension_numbers = #tpu.dot_dimension_numbers<[1], [0], [0], [1], [0, 0, 1, 1], [], []>} : vector<4x16xf32>, vector<16x128xf32>, vector<4x128xf32> -> vector<4x128xf32>
    %c1_87 = arith.constant 1 : index
    %c0_88 = arith.constant 0 : index
    %c0_89 = arith.constant 0 : index
    %101 = vector.load %arg10[%c1_87, %c0_88, %c0_89] : memref<9x4x16xi8, #tpu.memory_space<vmem>>, vector<1x4x16xi8>
    %102 = vector.shape_cast %101 : vector<1x4x16xi8> to vector<4x16xi8>
    %103 = arith.sitofp %102 : vector<4x16xi8> to vector<4x16xf32>
    %cst_90 = arith.constant dense<0.000000e+00> : vector<4x128xf32>
    %104 = tpu.matmul %103, %96, %cst_90 {dimension_numbers = #tpu.dot_dimension_numbers<[1], [0], [0], [1], [0, 0, 1, 1], [], []>} : vector<4x16xf32>, vector<16x128xf32>, vector<4x128xf32> -> vector<4x128xf32>
    %c2_91 = arith.constant 2 : index
    %c0_92 = arith.constant 0 : index
    %c0_93 = arith.constant 0 : index
    %105 = vector.load %arg10[%c2_91, %c0_92, %c0_93] : memref<9x4x16xi8, #tpu.memory_space<vmem>>, vector<1x4x16xi8>
    %106 = vector.shape_cast %105 : vector<1x4x16xi8> to vector<4x16xi8>
    %107 = arith.sitofp %106 : vector<4x16xi8> to vector<4x16xf32>
    %cst_94 = arith.constant dense<0.000000e+00> : vector<4x128xf32>
    %108 = tpu.matmul %107, %96, %cst_94 {dimension_numbers = #tpu.dot_dimension_numbers<[1], [0], [0], [1], [0, 0, 1, 1], [], []>} : vector<4x16xf32>, vector<16x128xf32>, vector<4x128xf32> -> vector<4x128xf32>
    %c3_95 = arith.constant 3 : index
    %c0_96 = arith.constant 0 : index
    %c0_97 = arith.constant 0 : index
    %109 = vector.load %arg10[%c3_95, %c0_96, %c0_97] : memref<9x4x16xi8, #tpu.memory_space<vmem>>, vector<1x4x16xi8>
    %110 = vector.shape_cast %109 : vector<1x4x16xi8> to vector<4x16xi8>
    %111 = arith.sitofp %110 : vector<4x16xi8> to vector<4x16xf32>
    %cst_98 = arith.constant dense<0.000000e+00> : vector<4x128xf32>
    %112 = tpu.matmul %111, %96, %cst_98 {dimension_numbers = #tpu.dot_dimension_numbers<[1], [0], [0], [1], [0, 0, 1, 1], [], []>} : vector<4x16xf32>, vector<16x128xf32>, vector<4x128xf32> -> vector<4x128xf32>
    %c4_99 = arith.constant 4 : index
    %c0_100 = arith.constant 0 : index
    %c0_101 = arith.constant 0 : index
    %113 = vector.load %arg10[%c4_99, %c0_100, %c0_101] : memref<9x4x16xi8, #tpu.memory_space<vmem>>, vector<1x4x16xi8>
    %114 = vector.shape_cast %113 : vector<1x4x16xi8> to vector<4x16xi8>
    %115 = arith.sitofp %114 : vector<4x16xi8> to vector<4x16xf32>
    %cst_102 = arith.constant dense<0.000000e+00> : vector<4x128xf32>
    %116 = tpu.matmul %115, %96, %cst_102 {dimension_numbers = #tpu.dot_dimension_numbers<[1], [0], [0], [1], [0, 0, 1, 1], [], []>} : vector<4x16xf32>, vector<16x128xf32>, vector<4x128xf32> -> vector<4x128xf32>
    %c5_103 = arith.constant 5 : index
    %c0_104 = arith.constant 0 : index
    %c0_105 = arith.constant 0 : index
    %117 = vector.load %arg10[%c5_103, %c0_104, %c0_105] : memref<9x4x16xi8, #tpu.memory_space<vmem>>, vector<1x4x16xi8>
    %118 = vector.shape_cast %117 : vector<1x4x16xi8> to vector<4x16xi8>
    %119 = arith.sitofp %118 : vector<4x16xi8> to vector<4x16xf32>
    %cst_106 = arith.constant dense<0.000000e+00> : vector<4x128xf32>
    %120 = tpu.matmul %119, %96, %cst_106 {dimension_numbers = #tpu.dot_dimension_numbers<[1], [0], [0], [1], [0, 0, 1, 1], [], []>} : vector<4x16xf32>, vector<16x128xf32>, vector<4x128xf32> -> vector<4x128xf32>
    %c6_107 = arith.constant 6 : index
    %c0_108 = arith.constant 0 : index
    %c0_109 = arith.constant 0 : index
    %121 = vector.load %arg10[%c6_107, %c0_108, %c0_109] : memref<9x4x16xi8, #tpu.memory_space<vmem>>, vector<1x4x16xi8>
    %122 = vector.shape_cast %121 : vector<1x4x16xi8> to vector<4x16xi8>
    %123 = arith.sitofp %122 : vector<4x16xi8> to vector<4x16xf32>
    %cst_110 = arith.constant dense<0.000000e+00> : vector<4x128xf32>
    %124 = tpu.matmul %123, %96, %cst_110 {dimension_numbers = #tpu.dot_dimension_numbers<[1], [0], [0], [1], [0, 0, 1, 1], [], []>} : vector<4x16xf32>, vector<16x128xf32>, vector<4x128xf32> -> vector<4x128xf32>
    %c7_111 = arith.constant 7 : index
    %c0_112 = arith.constant 0 : index
    %c0_113 = arith.constant 0 : index
    %125 = vector.load %arg10[%c7_111, %c0_112, %c0_113] : memref<9x4x16xi8, #tpu.memory_space<vmem>>, vector<1x4x16xi8>
    %126 = vector.shape_cast %125 : vector<1x4x16xi8> to vector<4x16xi8>
    %127 = arith.sitofp %126 : vector<4x16xi8> to vector<4x16xf32>
    %cst_114 = arith.constant dense<0.000000e+00> : vector<4x128xf32>
    %128 = tpu.matmul %127, %96, %cst_114 {dimension_numbers = #tpu.dot_dimension_numbers<[1], [0], [0], [1], [0, 0, 1, 1], [], []>} : vector<4x16xf32>, vector<16x128xf32>, vector<4x128xf32> -> vector<4x128xf32>
    %c8_115 = arith.constant 8 : index
    %c0_116 = arith.constant 0 : index
    %c0_117 = arith.constant 0 : index
    %129 = vector.load %arg10[%c8_115, %c0_116, %c0_117] : memref<9x4x16xi8, #tpu.memory_space<vmem>>, vector<1x4x16xi8>
    %130 = vector.shape_cast %129 : vector<1x4x16xi8> to vector<4x16xi8>
    %131 = arith.sitofp %130 : vector<4x16xi8> to vector<4x16xf32>
    %cst_118 = arith.constant dense<0.000000e+00> : vector<4x128xf32>
    %132 = tpu.matmul %131, %96, %cst_118 {dimension_numbers = #tpu.dot_dimension_numbers<[1], [0], [0], [1], [0, 0, 1, 1], [], []>} : vector<4x16xf32>, vector<16x128xf32>, vector<4x128xf32> -> vector<4x128xf32>
    %133 = tpu.concatenate %100, %104, %108, %112, %116, %120, %124, %128, %132 in 1 : vector<4x128xf32>, vector<4x128xf32>, vector<4x128xf32>, vector<4x128xf32>, vector<4x128xf32>, vector<4x128xf32>, vector<4x128xf32>, vector<4x128xf32>, vector<4x128xf32> -> vector<4x1152xf32>
    %c0_119 = arith.constant 0 : index
    %c0_120 = arith.constant 0 : index
    %134 = vector.load %arg11[%c0_119, %c0_120] : memref<1152x128xf32, #tpu.memory_space<vmem>>, vector<1152x128xf32>
    %cst_121 = arith.constant dense<0.000000e+00> : vector<4x128xf32>
    %135 = tpu.matmul %133, %134, %cst_121 {dimension_numbers = #tpu.dot_dimension_numbers<[1], [0], [0], [1], [0, 0, 1, 1], [], []>} : vector<4x1152xf32>, vector<1152x128xf32>, vector<4x128xf32> -> vector<4x128xf32>
    %c0_122 = arith.constant 0 : index
    %c0_123 = arith.constant 0 : index
    %136 = vector.load %arg12[%c0_122, %c0_123] : memref<1x128xf32, #tpu.memory_space<vmem>>, vector<1x128xf32>
    %137 = vector.broadcast %136 : vector<1x128xf32> to vector<4x128xf32>
    %138 = arith.addf %135, %137 : vector<4x128xf32>
    %cst_124 = arith.constant 0.000000e+00 : f32
    %139 = vector.broadcast %cst_124 : f32 to vector<4x128xf32>
    %140 = arith.maximumf %138, %139 : vector<4x128xf32>
    %cst_125 = arith.constant dense<0.000000e+00> : vector<128xf32>
    %141 = vector.multi_reduction <add>, %140, %cst_125 [0] : vector<4x128xf32> to vector<128xf32>
    %142 = vector.shape_cast %141 : vector<128xf32> to vector<1x128xf32>
    %cst_126 = arith.constant 2.500000e-01 : f32
    %143 = vector.broadcast %cst_126 : f32 to vector<1x128xf32>
    %144 = arith.mulf %142, %143 : vector<1x128xf32>
    %c0_127 = arith.constant 0 : index
    %c0_128 = arith.constant 0 : index
    %145 = vector.load %arg13[%c0_127, %c0_128] : memref<128x128xf32, #tpu.memory_space<vmem>>, vector<128x128xf32>
    %cst_129 = arith.constant dense<0.000000e+00> : vector<1x128xf32>
    %146 = tpu.matmul %144, %145, %cst_129 {dimension_numbers = #tpu.dot_dimension_numbers<[1], [0], [0], [1], [0, 0, 1, 1], [], []>} : vector<1x128xf32>, vector<128x128xf32>, vector<1x128xf32> -> vector<1x128xf32>
    %c0_130 = arith.constant 0 : index
    %c0_131 = arith.constant 0 : index
    %147 = vector.load %arg14[%c0_130, %c0_131] : memref<1x128xf32, #tpu.memory_space<vmem>>, vector<1x128xf32>
    %148 = arith.addf %146, %147 : vector<1x128xf32>
    %cst_132 = arith.constant dense<0xFF800000> : vector<1xf32>
    %149 = vector.multi_reduction <maximumf>, %148, %cst_132 [1] : vector<1x128xf32> to vector<1xf32>
    %150 = vector.shape_cast %149 : vector<1xf32> to vector<1x1xf32>
    %151 = vector.broadcast %150 : vector<1x1xf32> to vector<1x128xf32>
    %152 = arith.subf %148, %151 : vector<1x128xf32>
    %153 = math.exp %152 : vector<1x128xf32>
    %cst_133 = arith.constant dense<0.000000e+00> : vector<1xf32>
    %154 = vector.multi_reduction <add>, %153, %cst_133 [1] : vector<1x128xf32> to vector<1xf32>
    %155 = vector.shape_cast %154 : vector<1xf32> to vector<1x1xf32>
    %156 = vector.broadcast %155 : vector<1x1xf32> to vector<1x128xf32>
    %157 = arith.divf %153, %156 : vector<1x128xf32>
    %158 = vector.shape_cast %157 : vector<1x128xf32> to vector<1x1x128xf32>
    %c0_134 = arith.constant 0 : index
    %c0_135 = arith.constant 0 : index
    %c0_136 = arith.constant 0 : index
    %159 = vector.load %arg15[%c0_134, %c0_135, %c0_136] : memref<1x1x128xf32, #tpu.memory_space<vmem>>, vector<1x1x128xf32>
    tpu.vector_store %arg15[%c0_134, %c0_135, %c0_136], %158 {strides = array<i32>} : memref<1x1x128xf32, #tpu.memory_space<vmem>>, vector<1x1x128xf32>,
    return
  }
  func.func @transform_0(%arg0: i32) -> (i32, i32, i32) {
    %c0_i32 = arith.constant 0 : i32
    %c0_i32_0 = arith.constant 0 : i32
    %c0_i32_1 = arith.constant 0 : i32
    return %arg0, %c0_i32, %c0_i32_0 : i32, i32, i32
  }
  func.func @transform_1(%arg0: i32) -> (i32, i32) {
    %c0_i32 = arith.constant 0 : i32
    %c0_i32_0 = arith.constant 0 : i32
    %c0_i32_1 = arith.constant 0 : i32
    return %c0_i32, %c0_i32_0 : i32, i32
  }
  func.func @transform_2(%arg0: i32) -> (i32, i32) {
    %c0_i32 = arith.constant 0 : i32
    %c0_i32_0 = arith.constant 0 : i32
    %c0_i32_1 = arith.constant 0 : i32
    return %c0_i32, %c0_i32_0 : i32, i32
  }
  func.func @transform_3(%arg0: i32) -> (i32, i32, i32) {
    %c0_i32 = arith.constant 0 : i32
    %c0_i32_0 = arith.constant 0 : i32
    %c0_i32_1 = arith.constant 0 : i32
    %c0_i32_2 = arith.constant 0 : i32
    return %c0_i32, %c0_i32_0, %c0_i32_1 : i32, i32, i32
  }
  func.func @transform_4(%arg0: i32) -> (i32, i32) {
    %c0_i32 = arith.constant 0 : i32
    %c0_i32_0 = arith.constant 0 : i32
    %c0_i32_1 = arith.constant 0 : i32
    return %c0_i32, %c0_i32_0 : i32, i32
  }
  func.func @transform_5(%arg0: i32) -> (i32, i32) {
    %c0_i32 = arith.constant 0 : i32
    %c0_i32_0 = arith.constant 0 : i32
    %c0_i32_1 = arith.constant 0 : i32
    return %c0_i32, %c0_i32_0 : i32, i32
  }
  func.func @transform_6(%arg0: i32) -> (i32, i32, i32) {
    %c0_i32 = arith.constant 0 : i32
    %c0_i32_0 = arith.constant 0 : i32
    %c0_i32_1 = arith.constant 0 : i32
    %c0_i32_2 = arith.constant 0 : i32
    return %c0_i32, %c0_i32_0, %c0_i32_1 : i32, i32, i32
  }
  func.func @transform_7(%arg0: i32) -> (i32, i32) {
    %c0_i32 = arith.constant 0 : i32
    %c0_i32_0 = arith.constant 0 : i32
    %c0_i32_1 = arith.constant 0 : i32
    return %c0_i32, %c0_i32_0 : i32, i32
  }
  func.func @transform_8(%arg0: i32) -> (i32, i32) {
    %c0_i32 = arith.constant 0 : i32
    %c0_i32_0 = arith.constant 0 : i32
    %c0_i32_1 = arith.constant 0 : i32
    return %c0_i32, %c0_i32_0 : i32, i32
  }
  func.func @transform_9(%arg0: i32) -> (i32, i32, i32) {
    %c0_i32 = arith.constant 0 : i32
    %c0_i32_0 = arith.constant 0 : i32
    %c0_i32_1 = arith.constant 0 : i32
    %c0_i32_2 = arith.constant 0 : i32
    return %c0_i32, %c0_i32_0, %c0_i32_1 : i32, i32, i32
  }
  func.func @transform_10(%arg0: i32) -> (i32, i32) {
    %c0_i32 = arith.constant 0 : i32
    %c0_i32_0 = arith.constant 0 : i32
    %c0_i32_1 = arith.constant 0 : i32
    return %c0_i32, %c0_i32_0 : i32, i32
  }
  func.func @transform_11(%arg0: i32) -> (i32, i32) {
    %c0_i32 = arith.constant 0 : i32
    %c0_i32_0 = arith.constant 0 : i32
    %c0_i32_1 = arith.constant 0 : i32
    return %c0_i32, %c0_i32_0 : i32, i32
  }
  func.func @transform_12(%arg0: i32) -> (i32, i32) {
    %c0_i32 = arith.constant 0 : i32
    %c0_i32_0 = arith.constant 0 : i32
    %c0_i32_1 = arith.constant 0 : i32
    return %c0_i32, %c0_i32_0 : i32, i32
  }
  func.func @transform_13(%arg0: i32) -> (i32, i32) {
    %c0_i32 = arith.constant 0 : i32
    %c0_i32_0 = arith.constant 0 : i32
    %c0_i32_1 = arith.constant 0 : i32
    return %c0_i32, %c0_i32_0 : i32, i32
  }
  func.func @transform_14(%arg0: i32) -> (i32, i32, i32) {
    %c0_i32 = arith.constant 0 : i32
    %c0_i32_0 = arith.constant 0 : i32
    %c0_i32_1 = arith.constant 0 : i32
    return %arg0, %c0_i32, %c0_i32_0 : i32, i32, i32
  }
}

</mosaic_0001>

<bundles_post_ra>
// kernel: model_forward.1
= control target key start
LH: loop header
LB: loop body
LE: loop exit
PB: predicated region body
PF: predicated region fallthrough
CT: control target
= control target key end

     0   :  { %s10943_s0 = inlined_call_operand.vmem [shape: f32[2,256,32], index: 0, kind: input, shape index: {}]   ;;  %s10944_s1 = inlined_call_operand.vmem [shape: f32[32,128], index: 1, kind: input, shape index: {}]   ;;  %s10945_s2 = inlined_call_operand.vmem [shape: f32[1,128], index: 2, kind: input, shape index: {}]   ;;  %s10946_s3 = inlined_call_operand.vmem [shape: s8[9,64,256], index: 3, kind: input, shape index: {}]   ;;  %s10947_s4 = inlined_call_operand.vmem [shape: f32[1152,128], index: 4, kind: input, shape index: {}]   ;;  %s10948_s5 = inlined_call_operand.vmem [shape: f32[1,128], index: 5, kind: input, shape index: {}]   ;;  %s10949_s6 = inlined_call_operand.vmem [shape: s8[9,16,64], index: 6, kind: input, shape index: {}]   ;;  %s10950_s7 = inlined_call_operand.vmem [shape: f32[1152,128], index: 7, kind: input, shape index: {}]   ;;  %s10951_s8 = inlined_call_operand.vmem [shape: f32[1,128], index: 8, kind: input, shape index: {}]   ;;  %s10952_s9 = inlined_call_operand.vmem [shape: s8[9,4,16], index: 9, kind: input, shape index: {}]   ;;  %s10953_s10 = inlined_call_operand.vmem [shape: f32[1152,128], index: 10, kind: input, shape index: {}]   ;;  %s10954_s11 = inlined_call_operand.vmem [shape: f32[1,128], index: 11, kind: input, shape index: {}]   ;;  %s10955_s12 = inlined_call_operand.vmem [shape: f32[128,128], index: 12, kind: input, shape index: {}]   ;;  %s10956_s13 = inlined_call_operand.vmem [shape: f32[1,128], index: 13, kind: input, shape index: {}]   ;;  %s10957_s14 = inlined_call_operand.hbm [shape: f32[2,1,128], index: 14, kind: output, shape index: {}]  }
   0x1   :  { %10959 = sst [smem:[#allocation7_spill]] %s10943_s0 }
   0x2   :  { %10960 = sst [smem:[#allocation8_spill]] %s10944_s1 }
   0x3   :  { %10961 = sst [smem:[#allocation9_spill]] %s10945_s2 }
   0x4   :  { %19 = vsyncpa [#allocation3], 0 }
   0x5   :  { %21 = vsyncpa [#allocation3 + $0x1], 0  ;;  %s8528_s29 = smov 0   ;;  %s8530_s30 = smov 0  }
   0x6   :  { %s8532_s15 = smov 0   ;;  %s8534_s16 = smov 0  }
   0x7 LB: > { %10962 = sst [smem:[#allocation5_spill]] %s8443_s15  ;;  %s8549_s17 = sadd.s32 4294967295, %s8447_s16   ;;  %s8447_s16 = sphi %s8534_s16, %s10973_s16   ;;  %s8443_s15 = sphi %s8532_s15, %s10970_s15   ;;  %s8439_s30 = sphi %s8530_s30, %s10972_s30   ;;  %s8435_s29 = sphi %s8528_s29, %s10971_s29  }
   0x8   : > { %s5515_s18 = sadd.s32 4294967294, %s8447_s16   ;;  %s8553_s19 = sadd.s32 1, %s8447_s16  }
   0x9   : > { %s333_s20 = sadd.s32 1, %s8443_s15  ;;  %s330_s21 = ssub.s32 %s8447_s16, %s8553_s19 }
   0xa   : > { %p343_p0 = scmp.ne.s32.totalorder %s8443_s15, %s8439_s30  ;;  %p331_p1 = scmp.eq.s32.totalorder %s330_s21, 0 }
   0xb   : > { %p344_p2 = scmp.eq.s32.totalorder %s8549_s17, 1  ;;  %p349_p3 = scmp.ne.s32.totalorder %s8439_s30, %s8435_s29 }
   0xc   : > { %p350_p4 = scmp.eq.s32.totalorder %s5515_s18, 1  ;;  %p5518_p7 = scmp.ge.s32.totalorder %s8447_s16, 1 }
   0xd   : > { %s8564_s22 = scalar_select %p331_p1, %s8443_s15, %s333_s20  }
   0xe   : > { %p8566_p5 = por %p344_p2, %p343_p0  ;;  %p8570_p6 = por %p350_p4, %p349_p3 }
   0xf   : > { %10963 = sst [smem:[#allocation6_spill]] %s8564_s22  ;;  %p415_p8 = scmp.lt.s32.totalorder %s8447_s16, 3 }
  0x11   : > { %p416_p9 = pnand %p5518_p7, %p415_p8 }
  0x12   : > { %s10966_s1 = sld [smem:[#allocation8_spill]] (!%p416_p9)  ;;  %p460_p10 = scmp.lt.s32.totalorder (!%p416_p9), %s8549_s17, 1  ;;  %vm508_vm0 = vcmask (!%p416_p9), 261120   ;;  %v8662_v38 = vld [vmem:[%s10946_s3 + $0x8] sm:$0xff] (!%p416_p9)  ;;  %vm2829_vm1 = vcmask (!%p416_p9), 523264   ;;  %vm8450_vm2 = vmmov (!%p416_p9), 0  }
  0x13   : > { %419 = sbr.rel (%p416_p9) target bundleno = 2471 (0x9a7), region = 76  ;;  %s10967_s0 = sld [smem:[#allocation7_spill]] (!%p416_p9)  ;;  %v867_v39 = vunpack.c.0.s8 (!%p416_p9), %v8662_v38  ;;  %v8668_v40 = vld [vmem:[%s10946_s3 + $0x48] sm:$0xff] (!%p416_p9)  ;;  %vm4146_vm3 = vcmask (!%p416_p9), 130048   ;;  %vm5338_vm4 = vcmask (!%p416_p9), 1043456   ;;  %vm5434_vm5 = vcmask (!%p416_p9), 1040384  }
  0x14   : > { %v1151_v41 = vunpack.c.0.s8 (!%p416_p9), %v8668_v40  ;;  %s10968_s2 = sld [smem:[#allocation9_spill]] (!%p416_p9)  ;;  %s5640_s27 = sshll.u32 (!%p416_p9), %s8549_s17, 4 }
  0x15   : > { %v883_v42 = vcvt.s32.f32 (!%p416_p9), %v867_v39  ;;  %s10901_s20 = scalar_lea.hbm (!%p416_p9), %s10957_s14, %s5640_s27 }
  0x16   : > { %v1167_v43 = vcvt.s32.f32 (!%p416_p9), %v1151_v41 }
  0x17   : > { %962 = vmatprep.mubr.f32.mxu1 (!%p416_p9), %v883_v42 }
  0x18   : > { %v497_v0 = vld [vmem:[%s10966_s1] sm:$0xff] (!%p416_p9)  ;;  %v498_v1 = vld [vmem:[%s10966_s1 + $0x8] sm:$0xff] (!%p416_p9)  ;;  %v499_v2 = vld [vmem:[%s10966_s1 + $0x10] sm:$0xff] (!%p416_p9) }
  0x19   : > { %v7368_v3 = vpack.c.bf16 (!%p416_p9), %v498_v1, %v497_v0  ;;  %v500_v4 = vld [vmem:[%s10966_s1 + $0x18] sm:$0xff] (!%p416_p9) }
  0x1a   : > { %v7372_v5 = vpack.c.bf16 %v500_v4, %v499_v2  ;;  %s461_s15 = scalar_select %p460_p10, %s8549_s17, 1  ;;  %v8674_v44 = vld [vmem:[%s10968_s2] ss:$0 sm:$0xff] }
  0x1b   : > { %7369 = vmatprep.subr.bf16.mxu0 %v7368_v3  ;;  %s8452_s17 = smov [#allocation2]  }
  0x1c   : > { %7371 = vmatpush3.bf16.msra.mxu0 %v7368_v3  ;;  %s5643_s25 = sshll.u32 %s461_s15, 8  ;;  %s8389_s1 = sshll.u32 %s8452_s17, 4  ;;  %s8390_s1 = int_to_ptr.vmem [resolvable:$false] %s8389_s1 }
  0x1d   : > { %7373 = vmatprep.subr.bf16.mxu0 %v7372_v5  ;;  %s8593_s28 = scalar_lea.vmem %s10967_s0, %s5643_s25  ;;  %s458_s0 = sand.u32 1, %s8439_s30  }
  0x1e   : > { %v465_v6 = vld [vmem:[%s8593_s28] sm:$0xff]  ;;  %v466_v7 = vld [vmem:[%s8593_s28 + $0x8] sm:$0xff]  ;;  %v467_v8 = vld [vmem:[%s8593_s28 + $0x10] sm:$0xff]  ;;  %s5448_s21 = scalar_lea.sflag [#allocation3], %s458_s0  ;;  %s8391_s2 = scalar_lea.vmem %s8390_s1, 32 }
  0x1f   : > { %6937 = vmatprep.mubr.msk.f32.mxu0 %vm508_vm0, %v465_v6  ;;  %v468_v9 = vld [vmem:[%s8593_s28 + $0x18] sm:$0xff]  ;;  %v469_v10 = vld [vmem:[%s8593_s28 + $0x20] sm:$0xff]  ;;  %v470_v11 = vld [vmem:[%s8593_s28 + $0x28] sm:$0xff] }
  0x20   : > { %7375 = vmatpush3.bf16.msra.mxu0 %v7372_v5  ;;  %v471_v12 = vld [vmem:[%s8593_s28 + $0x30] sm:$0xff]  ;;  %v472_v13 = vld [vmem:[%s8593_s28 + $0x38] sm:$0xff]  ;;  %v473_v14 = vld [vmem:[%s8593_s28 + $0x40] sm:$0xff] }
  0x21   : > { %v474_v15 = vld [vmem:[%s8593_s28 + $0x48] sm:$0xff]  ;;  %v475_v16 = vld [vmem:[%s8593_s28 + $0x50] sm:$0xff]  ;;  %v476_v17 = vld [vmem:[%s8593_s28 + $0x58] sm:$0xff] }
  0x22   : > { %v477_v18 = vld [vmem:[%s8593_s28 + $0x60] sm:$0xff]  ;;  %v478_v19 = vld [vmem:[%s8593_s28 + $0x68] sm:$0xff]  ;;  %v479_v20 = vld [vmem:[%s8593_s28 + $0x70] sm:$0xff] }
  0x23   : > { %6938 = vmatmul.mubr.msk.f32.vlgmr.msra.gmra.mrb[0].mxu0 %vm508_vm0, %v466_v7  ;;  %v480_v21 = vld [vmem:[%s8593_s28 + $0x78] sm:$0xff]  ;;  %v481_v22 = vld [vmem:[%s8593_s28 + $0x80] sm:$0xff]  ;;  %v482_v23 = vld [vmem:[%s8593_s28 + $0x88] sm:$0xff] }
  0x24   : > { %6940 = vmatprep.mubr.msk.f32.mxu0 %vm508_vm0, %v467_v8  ;;  %v483_v24 = vld [vmem:[%s8593_s28 + $0x90] sm:$0xff]  ;;  %v484_v25 = vld [vmem:[%s8593_s28 + $0x98] sm:$0xff]  ;;  %v485_v26 = vld [vmem:[%s8593_s28 + $0xa0] sm:$0xff] }
  0x25   : > { %v486_v27 = vld [vmem:[%s8593_s28 + $0xa8] sm:$0xff]  ;;  %v487_v28 = vld [vmem:[%s8593_s28 + $0xb0] sm:$0xff]  ;;  %v488_v29 = vld [vmem:[%s8593_s28 + $0xb8] sm:$0xff] }
  0x26   : > { %v489_v30 = vld [vmem:[%s8593_s28 + $0xc0] sm:$0xff]  ;;  %v490_v31 = vld [vmem:[%s8593_s28 + $0xc8] sm:$0xff]  ;;  %v491_v32 = vld [vmem:[%s8593_s28 + $0xd0] sm:$0xff] }
  0x27   : > { %6941 = vmatmul.mubr.msk.f32.gmra.mrb[2].mxu0 %vm508_vm0, %v468_v9  ;;  %v492_v33 = vld [vmem:[%s8593_s28 + $0xd8] sm:$0xff]  ;;  %v493_v34 = vld [vmem:[%s8593_s28 + $0xe0] sm:$0xff]  ;;  %v494_v35 = vld [vmem:[%s8593_s28 + $0xe8] sm:$0xff] }
  0x28   : > { %6943 = vmatprep.mubr.msk.f32.mxu0 %vm508_vm0, %v469_v10  ;;  %v495_v36 = vld [vmem:[%s8593_s28 + $0xf0] sm:$0xff]  ;;  %v496_v37 = vld [vmem:[%s8593_s28 + $0xf8] sm:$0xff]  ;;  %s459_s28 = scalar_lea.vmem [#allocation2], %s458_s0 }
  0x29   : > { %s5460_s15 = sshll.u32 %s459_s28, 4  ;;  %s10903_s15 = int_to_ptr.vmem [resolvable:$true] %s5460_s15 }
  0x2a   : > { %s8385_s25 = scalar_lea.vmem %s10903_s15, 16  ;;  %p8392_p0 = scmp.lt.s32.totalorder %s10903_s15, %s8390_s1 }
  0x2b   : > { %6944 = vmatmul.mubr.msk.f32.gmra.mrb[4].mxu0 %vm508_vm0, %v470_v11  ;;  %p8386_p11 = scmp.ne.s32.totalorder %s10903_s15, %s8385_s25  ;;  %p8393_p1 = scmp.lt.s32.totalorder %s8391_s2, %s8385_s25 }
  0x2c   : > { %6946 = vmatprep.mubr.msk.f32.mxu0 %vm508_vm0, %v471_v12 }
  0x2d   : > { %p8387_p12 = pnand %p8386_p11, %p8566_p5  ;;  %p8394_p2 = por %p8393_p1, %p8392_p0 }
  0x2f   : > { %6947 = vmatmul.mubr.msk.f32.gmra.mrb[6].mxu0 %vm508_vm0, %v472_v13  ;;  %p8388_p13 = pneg %p8387_p12 }
  0x30   : > { %6949 = vmatprep.mubr.msk.f32.mxu0 %vm508_vm0, %v473_v14 }
  0x31   : > { %p8395_p3 = pnand %p8394_p2, %p8388_p13 }
  0x33   : > { %6950 = vmatmul.mubr.msk.f32.gmra.mrb[8].mxu0 %vm508_vm0, %v474_v15 }
  0x34   : > { %6952 = vmatprep.mubr.msk.f32.mxu0 %vm508_vm0, %v475_v16 }
  0x37   : > { %6953 = vmatmul.mubr.msk.f32.gmra.mrb[10].mxu0 %vm508_vm0, %v476_v17 }
  0x38   : > { %6955 = vmatprep.mubr.msk.f32.mxu0 %vm508_vm0, %v477_v18 }
  0x3b   : > { %6956 = vmatmul.mubr.msk.f32.gmra.mrb[12].mxu0 %vm508_vm0, %v478_v19 }
  0x3c   : > { %6958 = vmatprep.mubr.msk.f32.mxu0 %vm508_vm0, %v479_v20 }
  0x3f   : > { %6959 = vmatmul.mubr.msk.f32.gmra.mrb[14].mxu0 %vm508_vm0, %v480_v21 }
  0x40   : > { %6961 = vmatprep.mubr.msk.f32.mxu0 %vm508_vm0, %v481_v22 }
  0x43   : > { %6962 = vmatmul.mubr.msk.f32.gmra.mrb[16].mxu0 %vm508_vm0, %v482_v23 }
  0x44   : > { %6964 = vmatprep.mubr.msk.f32.mxu0 %vm508_vm0, %v483_v24 }
  0x47   : > { %6965 = vmatmul.mubr.msk.f32.gmra.mrb[18].mxu0 %vm508_vm0, %v484_v25 }
  0x48   : > { %6967 = vmatprep.mubr.msk.f32.mxu0 %vm508_vm0, %v485_v26 }
  0x4b   : > { %6968 = vmatmul.mubr.msk.f32.gmra.mrb[20].mxu0 %vm508_vm0, %v486_v27 }
  0x4c   : > { %6970 = vmatprep.mubr.msk.f32.mxu0 %vm508_vm0, %v487_v28 }
  0x4f   : > { %6971 = vmatmul.mubr.msk.f32.gmra.mrb[22].mxu0 %vm508_vm0, %v488_v29 }
  0x50   : > { %6973 = vmatprep.mubr.msk.f32.mxu0 %vm508_vm0, %v489_v30 }
  0x53   : > { %6974 = vmatmul.mubr.msk.f32.gmra.mrb[24].mxu0 %vm508_vm0, %v490_v31 }
  0x54   : > { %6976 = vmatprep.mubr.msk.f32.mxu0 %vm508_vm0, %v491_v32 }
  0x57   : > { %6977 = vmatmul.mubr.msk.f32.gmra.mrb[26].mxu0 %vm508_vm0, %v492_v33 }
  0x58   : > { %6979 = vmatprep.mubr.msk.f32.mxu0 %vm508_vm0, %v493_v34 }
  0x5b   : > { %6980 = vmatmul.mubr.msk.f32.gmra.mrb[28].mxu0 %vm508_vm0, %v494_v35 }
  0x5c   : > { %6982 = vmatprep.mubr.msk.f32.mxu0 %vm508_vm0, %v495_v36 }
  0x5f   : > { %6983 = vmatmul.mubr.msk.f32.gmra.mrb[30].mxu0 %vm508_vm0, %v496_v37 }
  0x60   : > { %1246 = vmatprep.mubr.f32.mxu0 %v1167_v43 }
  0xf6   : > { %v6939_v45 = vpop.f32.mrb[0].mxu0 }
  0xf7   : > { %v677_v46 = vadd.f32 %v6939_v45, %v8674_v44  ;;  %v671_v47 = vpop.f32.mrb[1].mxu0 }
  0xf8   : > { %v672_v48 = vadd.f32 %v8674_v44, %v671_v47 }
  0xf9   : > { %v831_v49 = vmax.f32 %v677_v46, 0.0 }
  0xfa   : > { %v830_v50 = vmax.f32 %v672_v48, 0.0  ;;  %v6942_v51 = vpop.f32.mrb[2].mxu0 }
  0xfb   : > { %v687_v52 = vadd.f32 %v6942_v51, %v8674_v44  ;;  %v681_v53 = vpop.f32.mrb[3].mxu0 }
  0xfc   : > { %v8679_v54 = vpack.c.bf16 %v831_v49, %v830_v50  ;;  %v682_v55 = vadd.f32 %v8674_v44, %v681_v53 }
  0xfd   : > { %v833_v56 = vmax.f32 %v687_v52, 0.0 }
  0xfe   : > { %v832_v57 = vmax.f32 %v682_v55, 0.0  ;;  %v6945_v58 = vpop.f32.mrb[4].mxu0 }
  0xff   : > { %v697_v59 = vadd.f32 %v6945_v58, %v8674_v44  ;;  %v691_v60 = vpop.f32.mrb[5].mxu0 }
 0x100   : > { %v8683_v61 = vpack.c.bf16 %v833_v56, %v832_v57  ;;  %v692_v62 = vadd.f32 %v8674_v44, %v691_v60 }
 0x101   : > { %v835_v63 = vmax.f32 %v697_v59, 0.0 }
 0x102   : > { %v834_v0 = vmax.f32 %v692_v62, 0.0  ;;  %v6948_v1 = vpop.f32.mrb[6].mxu0 }
 0x103   : > { %v707_v2 = vadd.f32 %v6948_v1, %v8674_v44  ;;  %v701_v3 = vpop.f32.mrb[7].mxu0 }
 0x104   : > { %v8687_v4 = vpack.c.bf16 %v835_v63, %v834_v0  ;;  %v702_v5 = vadd.f32 %v8674_v44, %v701_v3 }
 0x105   : > { %v837_v6 = vmax.f32 %v707_v2, 0.0 }
 0x106   : > { %v836_v7 = vmax.f32 %v702_v5, 0.0  ;;  %v6951_v8 = vpop.f32.mrb[8].mxu0 }
 0x107   : > { %v717_v9 = vadd.f32 %v6951_v8, %v8674_v44  ;;  %v711_v10 = vpop.f32.mrb[9].mxu0 }
 0x108   : > { %v8691_v11 = vpack.c.bf16 %v837_v6, %v836_v7  ;;  %v712_v12 = vadd.f32 %v8674_v44, %v711_v10 }
 0x109   : > { %v839_v13 = vmax.f32 %v717_v9, 0.0 }
 0x10a   : > { %v838_v14 = vmax.f32 %v712_v12, 0.0  ;;  %v6954_v15 = vpop.f32.mrb[10].mxu0 }
 0x10b   : > { %v727_v16 = vadd.f32 %v6954_v15, %v8674_v44  ;;  %v721_v17 = vpop.f32.mrb[11].mxu0 }
 0x10c   : > { %v8695_v18 = vpack.c.bf16 %v839_v13, %v838_v14  ;;  %v722_v19 = vadd.f32 %v8674_v44, %v721_v17 }
 0x10d   : > { %v841_v20 = vmax.f32 %v727_v16, 0.0 }
 0x10e   : > { %v840_v21 = vmax.f32 %v722_v19, 0.0  ;;  %v6957_v22 = vpop.f32.mrb[12].mxu0 }
 0x10f   : > { %v737_v23 = vadd.f32 %v6957_v22, %v8674_v44  ;;  %v731_v24 = vpop.f32.mrb[13].mxu0 }
 0x110   : > { %v8699_v25 = vpack.c.bf16 %v841_v20, %v840_v21  ;;  %v732_v26 = vadd.f32 %v8674_v44, %v731_v24 }
 0x111   : > { %v843_v27 = vmax.f32 %v737_v23, 0.0 }
 0x112   : > { %v842_v28 = vmax.f32 %v732_v26, 0.0  ;;  %v6960_v29 = vpop.f32.mrb[14].mxu0 }
 0x113   : > { %v747_v30 = vadd.f32 %v6960_v29, %v8674_v44  ;;  %v741_v31 = vpop.f32.mrb[15].mxu0 }
 0x114   : > { %v8703_v32 = vpack.c.bf16 %v843_v27, %v842_v28  ;;  %v742_v33 = vadd.f32 %v8674_v44, %v741_v31 }
 0x115   : > { %v845_v34 = vmax.f32 %v747_v30, 0.0 }
 0x116   : > { %v844_v35 = vmax.f32 %v742_v33, 0.0  ;;  %v6963_v36 = vpop.f32.mrb[16].mxu0 }
 0x117   : > { %v757_v37 = vadd.f32 %v6963_v36, %v8674_v44  ;;  %v751_v39 = vpop.f32.mrb[17].mxu0 }
 0x118   : > { %v8707_v41 = vpack.c.bf16 %v845_v34, %v844_v35  ;;  %v752_v42 = vadd.f32 %v8674_v44, %v751_v39  ;;  %v8762_v34 = vld [vmem:[%s10946_s3] sm:$0xff] }
 0x119   : > { %v847_v43 = vmax.f32 %v757_v37, 0.0  ;;  %v8767_v35 = vld [vmem:[%s10946_s3 + $0x40] sm:$0xff] }
 0x11a   : > { %v846_v45 = vmax.f32 %v752_v42, 0.0  ;;  %v6966_v46 = vpop.f32.mrb[18].mxu0 }
 0x11b   : > { %v767_v47 = vadd.f32 %v6966_v46, %v8674_v44  ;;  %v761_v48 = vpop.f32.mrb[19].mxu0 }
 0x11c   : > { %v8711_v49 = vpack.c.bf16 %v847_v43, %v846_v45  ;;  %v762_v50 = vadd.f32 %v8674_v44, %v761_v48  ;;  %v866_v43 = vunpack.c.0.s8 %v8762_v34  ;;  %v1150_v45 = vunpack.c.0.s8 %v8767_v35 }
 0x11d   : > { %v849_v51 = vmax.f32 %v767_v47, 0.0  ;;  %v869_v47 = vunpack.c.1.s8 %v8662_v38 }
 0x11e   : > { %v848_v52 = vmax.f32 %v762_v50, 0.0  ;;  %v6969_v53 = vpop.f32.mrb[20].mxu0  ;;  %7377 = vmatprep.subr.bf16.mxu1 %v8711_v49  ;;  %7441 = vmatprep.subr.bf16.mxu0 %v8711_v49  ;;  %v882_v48 = vcvt.s32.f32 %v866_v43  ;;  %v1166_v50 = vcvt.s32.f32 %v1150_v45 }
 0x11f   : > { %v777_v55 = vadd.f32 %v6969_v53, %v8674_v44  ;;  %v771_v56 = vpop.f32.mrb[21].mxu0  ;;  %7379 = vmatpush3.bf16.msra.mxu1 %v8679_v54  ;;  %7443 = vmatpush3.bf16.msra.mxu0 %v8679_v54  ;;  %v885_v53 = vcvt.s32.f32 %v869_v47 }
 0x120   : > { %v8719_v57 = vpack.c.bf16 %v849_v51, %v848_v52  ;;  %v772_v58 = vadd.f32 %v8674_v44, %v771_v56  ;;  %v868_v51 = vunpack.c.1.s8 %v8762_v34  ;;  %v1152_v52 = vunpack.c.1.s8 %v8767_v35 }
 0x121   : > { %v851_v59 = vmax.f32 %v777_v55, 0.0  ;;  %v871_v56 = vunpack.c.2.s8 %v8662_v38 }
 0x122   : > { %v850_v60 = vmax.f32 %v772_v58, 0.0  ;;  %v6972_v62 = vpop.f32.mrb[22].mxu0  ;;  %7381 = vmatprep.subr.bf16.mxu1 %v8719_v57  ;;  %7445 = vmatprep.subr.bf16.mxu0 %v8719_v57  ;;  %v1155_v58 = vunpack.c.2.s8 %v8668_v40 }
 0x123   : > { %v787_v63 = vadd.f32 %v6972_v62, %v8674_v44  ;;  %v781_v0 = vpop.f32.mrb[23].mxu0  ;;  %7383 = vmatpush3.bf16.msra.mxu1 %v8683_v61  ;;  %7447 = vmatpush3.bf16.msra.mxu0 %v8683_v61  ;;  %v870_v62 = vunpack.c.2.s8 %v8762_v34 }
 0x124   : > { %v8727_v1 = vpack.c.bf16 %v851_v59, %v850_v60  ;;  %v782_v2 = vadd.f32 %v8674_v44, %v781_v0  ;;  %v884_v59 = vcvt.s32.f32 %v868_v51  ;;  %v1168_v60 = vcvt.s32.f32 %v1152_v52 }
 0x125   : > { %v853_v3 = vmax.f32 %v787_v63, 0.0  ;;  %v1154_v63 = vunpack.c.2.s8 %v8767_v35  ;;  %v887_v0 = vcvt.s32.f32 %v871_v56 }
 0x126   : > { %v852_v5 = vmax.f32 %v782_v2, 0.0  ;;  %v6975_v6 = vpop.f32.mrb[24].mxu0  ;;  %7385 = vmatprep.subr.bf16.mxu1 %v8727_v1  ;;  %7449 = vmatprep.subr.bf16.mxu0 %v8727_v1  ;;  %v1171_v2 = vcvt.s32.f32 %v1155_v58 }
 0x127   : > { %v797_v7 = vadd.f32 %v6975_v6, %v8674_v44  ;;  %v791_v8 = vpop.f32.mrb[25].mxu0  ;;  %7387 = vmatpush3.bf16.msra.mxu1 %v8687_v4  ;;  %7451 = vmatpush3.bf16.msra.mxu0 %v8687_v4  ;;  %v886_v6 = vcvt.s32.f32 %v870_v62  ;;  %v8869_v62 = vld [vmem:[%s10946_s3 + $0x20] sm:$0xff] }
 0x128   : > { %v8735_v9 = vpack.c.bf16 %v853_v3, %v852_v5  ;;  %v792_v10 = vadd.f32 %v8674_v44, %v791_v8  ;;  %v873_v3 = vunpack.c.3.s8 %v8662_v38  ;;  %v1157_v5 = vunpack.c.3.s8 %v8668_v40  ;;  %v8817_v38 = vld [vmem:[%s10946_s3 + $0x10] sm:$0xff] }
 0x129   : > { %v855_v12 = vmax.f32 %v797_v7, 0.0  ;;  %v1170_v7 = vcvt.s32.f32 %v1154_v63  ;;  %v872_v8 = vunpack.c.3.s8 %v8762_v34  ;;  %v878_v47 = vunpack.c.2.s8 %v8817_v38  ;;  %v8874_v63 = vld [vmem:[%s10946_s3 + $0x80] sm:$0xff] }
 0x12a   : > { %v854_v13 = vmax.f32 %v792_v10, 0.0  ;;  %v6978_v14 = vpop.f32.mrb[26].mxu0  ;;  %7389 = vmatprep.subr.bf16.mxu1 %v8735_v9  ;;  %7453 = vmatprep.subr.bf16.mxu0 %v8735_v9  ;;  %v1156_v10 = vunpack.c.3.s8 %v8767_v35  ;;  %v880_v56 = vunpack.c.3.s8 %v8817_v38 }
 0x12b   : > { %v807_v15 = vadd.f32 %v6978_v14, %v8674_v44  ;;  %v801_v16 = vpop.f32.mrb[27].mxu0  ;;  %7391 = vmatpush3.bf16.msra.mxu1 %v8691_v11  ;;  %7455 = vmatpush3.bf16.msra.mxu0 %v8691_v11  ;;  %v889_v14 = vcvt.s32.f32 %v873_v3 }
 0x12c   : > { %v8743_v17 = vpack.c.bf16 %v855_v12, %v854_v13  ;;  %v802_v19 = vadd.f32 %v8674_v44, %v801_v16  ;;  %v8805_v12 = vld [vmem:[%s10946_s3 + $0x18] sm:$0xff] }
 0x12d   : > { %v857_v20 = vmax.f32 %v807_v15, 0.0  ;;  %v8810_v13 = vld [vmem:[%s10946_s3 + $0x58] sm:$0xff]  ;;  %v1173_v15 = vcvt.s32.f32 %v1157_v5  ;;  %v875_v16 = vunpack.c.0.s8 %v8805_v12  ;;  %v881_v51 = vunpack.c.3.s8 %v8805_v12 }
 0x12e   : > { %v856_v21 = vmax.f32 %v802_v19, 0.0  ;;  %v6981_v22 = vpop.f32.mrb[28].mxu0  ;;  %7393 = vmatprep.subr.bf16.mxu1 %v8743_v17  ;;  %7457 = vmatprep.subr.bf16.mxu0 %v8743_v17  ;;  %v1159_v19 = vunpack.c.0.s8 %v8810_v13  ;;  %v1165_v52 = vunpack.c.3.s8 %v8810_v13 }
 0x12f   : > { %v817_v23 = vadd.f32 %v6981_v22, %v8674_v44  ;;  %v811_v24 = vpop.f32.mrb[29].mxu0  ;;  %7395 = vmatpush3.bf16.msra.mxu1 %v8695_v18  ;;  %7459 = vmatpush3.bf16.msra.mxu0 %v8695_v18  ;;  %v874_v22 = vunpack.c.0.s8 %v8817_v38 }
 0x130   : > { %v8751_v26 = vpack.c.bf16 %v857_v20, %v856_v21  ;;  %v812_v27 = vadd.f32 %v8674_v44, %v811_v24  ;;  %v888_v20 = vcvt.s32.f32 %v872_v8  ;;  %v1172_v21 = vcvt.s32.f32 %v1156_v10 }
 0x131   : > { %v859_v28 = vmax.f32 %v817_v23, 0.0  ;;  %v891_v24 = vcvt.s32.f32 %v875_v16  ;;  %v1008_v8 = vunpack.c.0.s8 %v8869_v62  ;;  %v1434_v10 = vunpack.c.0.s8 %v8874_v63 }
 0x132   : > { %v858_v29 = vmax.f32 %v812_v27, 0.0  ;;  %v6984_v30 = vpop.f32.mrb[30].mxu0  ;;  %7397 = vmatprep.subr.bf16.mxu1 %v8751_v26  ;;  %7461 = vmatprep.subr.bf16.mxu0 %v8751_v26  ;;  %v1175_v27 = vcvt.s32.f32 %v1159_v19  ;;  %v1010_v16 = vunpack.c.1.s8 %v8869_v62  ;;  %v1436_v19 = vunpack.c.1.s8 %v8874_v63 }
 0x133   : > { %v827_v31 = vadd.f32 %v6984_v30, %v8674_v44  ;;  %v821_v33 = vpop.f32.mrb[31].mxu0  ;;  %7399 = vmatpush3.bf16.msra.mxu1 %v8699_v25  ;;  %7463 = vmatpush3.bf16.msra.mxu0 %v8699_v25  ;;  %v890_v30 = vcvt.s32.f32 %v874_v22 }
 0x134   : > { %v8769_v36 = vpack.c.bf16 %v859_v28, %v858_v29  ;;  %v822_v37 = vadd.f32 %v8674_v44, %v821_v33  ;;  %v1153_v44 = vunpack.c.1.s8 %v8668_v40  ;;  %v8822_v40 = vld [vmem:[%s10946_s3 + $0x50] sm:$0xff]  ;;  %v877_v28 = vunpack.c.1.s8 %v8805_v12 }
 0x135   : > { %v861_v39 = vmax.f32 %v827_v31, 0.0  ;;  %v1158_v23 = vunpack.c.0.s8 %v8822_v40  ;;  %v1161_v29 = vunpack.c.1.s8 %v8810_v13  ;;  %v876_v33 = vunpack.c.1.s8 %v8817_v38 }
 0x136   : > { %v860_v42 = vmax.f32 %v822_v37, 0.0  ;;  %7401 = vmatprep.subr.bf16.mxu1 %v8769_v36  ;;  %7465 = vmatprep.subr.bf16.mxu0 %v8769_v36  ;;  %v1169_v55 = vcvt.s32.f32 %v1153_v44  ;;  %v1160_v34 = vunpack.c.1.s8 %v8822_v40  ;;  %v893_v35 = vcvt.s32.f32 %v877_v28 }
 0x137   : > { %7403 = vmatpush3.bf16.msra.mxu1 %v8703_v32  ;;  %7467 = vmatpush3.bf16.msra.mxu0 %v8703_v32  ;;  %v1174_v31 = vcvt.s32.f32 %v1158_v23  ;;  %v1177_v37 = vcvt.s32.f32 %v1161_v29  ;;  %v892_v43 = vcvt.s32.f32 %v876_v33  ;;  %v1162_v44 = vunpack.c.2.s8 %v8822_v40 }
 0x138   : > { %v8778_v46 = vpack.c.bf16 %v861_v39, %v860_v42  ;;  %v879_v39 = vunpack.c.2.s8 %v8805_v12  ;;  %v1163_v42 = vunpack.c.2.s8 %v8810_v13  ;;  %v1176_v45 = vcvt.s32.f32 %v1160_v34 }
 0x139   : > { %v1164_v58 = vunpack.c.3.s8 %v8822_v40  ;;  %v1012_v28 = vunpack.c.2.s8 %v8869_v62  ;;  %v1438_v29 = vunpack.c.2.s8 %v8874_v63 }
 0x13a   : > { %7405 = vmatprep.subr.bf16.mxu1 %v8778_v46  ;;  %7469 = vmatprep.subr.bf16.mxu0 %v8778_v46 }
 0x13b   : > { %7407 = vmatpush3.bf16.msra.mxu1 %v8707_v41  ;;  %7471 = vmatpush3.bf16.msra.mxu0 %v8707_v41 }
 0x13c   : > { %7409 = vmatprep.subr.bf16.mxu1 %v8711_v49  ;;  %7505 = vmatprep.subr.bf16.mxu0 %v8711_v49 }
 0x13e   : > { %963 = vmatmul.mubr.f32.vlgmr.msra.gmra.mrb[0].mxu1 %v882_v48  ;;  %1247 = vmatmul.mubr.f32.vlgmr.msra.gmra.mrb[32].mxu0 %v1166_v50  ;;  %v895_v48 = vcvt.s32.f32 %v879_v39  ;;  %v1179_v50 = vcvt.s32.f32 %v1163_v42  ;;  %v1014_v39 = vunpack.c.3.s8 %v8869_v62  ;;  %v1440_v42 = vunpack.c.3.s8 %v8874_v63 }
 0x13f   : > { %7411 = vmatpush3.bf16.msra.mxu1 %v8679_v54  ;;  %7507 = vmatpush3.bf16.msra.mxu0 %v8679_v54 }
 0x140   : > { %7413 = vmatprep.subr.bf16.mxu1 %v8719_v57  ;;  %7509 = vmatprep.subr.bf16.mxu0 %v8719_v57 }
 0x141   : > { %967 = vmatprep.mubr.f32.mxu1 %v885_v53  ;;  %1251 = vmatprep.mubr.f32.mxu0 %v1169_v55  ;;  %v894_v53 = vcvt.s32.f32 %v878_v47  ;;  %v1178_v55 = vcvt.s32.f32 %v1162_v44  ;;  %v8921_v47 = vld [vmem:[%s10946_s3 + $0x30] sm:$0xff] }
 0x142   : > { %968 = vmatmul.mubr.f32.gmra.mrb[2].mxu1 %v884_v59  ;;  %1252 = vmatmul.mubr.f32.gmra.mrb[34].mxu0 %v1168_v60  ;;  %v8857_v59 = vld [vmem:[%s10946_s3 + $0x28] sm:$0xff]  ;;  %v8926_v44 = vld [vmem:[%s10946_s3 + $0x90] sm:$0xff] }
 0x143   : > { %7415 = vmatpush3.bf16.msra.mxu1 %v8683_v61  ;;  %7511 = vmatpush3.bf16.msra.mxu0 %v8683_v61  ;;  %v8862_v60 = vld [vmem:[%s10946_s3 + $0x88] sm:$0xff]  ;;  %v1009_v3 = vunpack.c.0.s8 %v8857_v59  ;;  %v1011_v38 = vunpack.c.1.s8 %v8857_v59  ;;  %v1013_v22 = vunpack.c.2.s8 %v8857_v59  ;;  %v1015_v33 = vunpack.c.3.s8 %v8857_v59 }
 0x144   : > { %7417 = vmatprep.subr.bf16.mxu1 %v8727_v1  ;;  %7513 = vmatprep.subr.bf16.mxu0 %v8727_v1  ;;  %v1435_v5 = vunpack.c.0.s8 %v8862_v60  ;;  %v1437_v40 = vunpack.c.1.s8 %v8862_v60  ;;  %v1439_v23 = vunpack.c.2.s8 %v8862_v60  ;;  %v1441_v34 = vunpack.c.3.s8 %v8862_v60 }
 0x145   : > { %972 = vmatprep.mubr.f32.mxu1 %v887_v0  ;;  %1256 = vmatprep.mubr.f32.mxu0 %v1171_v2  ;;  %v897_v0 = vcvt.s32.f32 %v881_v51  ;;  %v1181_v2 = vcvt.s32.f32 %v1165_v52  ;;  %v1025_v12 = vcvt.s32.f32 %v1009_v3  ;;  %v1018_v3 = vunpack.c.1.s8 %v8921_v47 }
 0x146   : > { %973 = vmatmul.mubr.f32.gmra.mrb[4].mxu1 %v886_v6  ;;  %1257 = vmatmul.mubr.f32.gmra.mrb[36].mxu0 %v1170_v7  ;;  %v896_v6 = vcvt.s32.f32 %v880_v56  ;;  %v1180_v7 = vcvt.s32.f32 %v1164_v58  ;;  %v1451_v13 = vcvt.s32.f32 %v1435_v5  ;;  %v1016_v56 = vunpack.c.0.s8 %v8921_v47 }
 0x147   : > { %7419 = vmatpush3.bf16.msra.mxu1 %v8687_v4  ;;  %7515 = vmatpush3.bf16.msra.mxu0 %v8687_v4  ;;  %v1442_v58 = vunpack.c.0.s8 %v8926_v44  ;;  %v1444_v5 = vunpack.c.1.s8 %v8926_v44 }
 0x148   : > { %7421 = vmatprep.subr.bf16.mxu1 %v8735_v9  ;;  %7517 = vmatprep.subr.bf16.mxu0 %v8735_v9 }
 0x149   : > { %977 = vmatprep.mubr.f32.mxu1 %v889_v14  ;;  %1261 = vmatprep.mubr.f32.mxu0 %v1173_v15  ;;  %v1024_v14 = vcvt.s32.f32 %v1008_v8  ;;  %v1450_v15 = vcvt.s32.f32 %v1434_v10 }
 0x14a   : > { %978 = vmatmul.mubr.f32.gmra.mrb[6].mxu1 %v888_v20  ;;  %1262 = vmatmul.mubr.f32.gmra.mrb[38].mxu0 %v1172_v21  ;;  %v1027_v20 = vcvt.s32.f32 %v1011_v38  ;;  %v1453_v21 = vcvt.s32.f32 %v1437_v40  ;;  %v1020_v38 = vunpack.c.2.s8 %v8921_v47  ;;  %v1446_v40 = vunpack.c.2.s8 %v8926_v44 }
 0x14b   : > { %7423 = vmatpush3.bf16.msra.mxu1 %v8691_v11  ;;  %7519 = vmatpush3.bf16.msra.mxu0 %v8691_v11 }
 0x14c   : > { %7425 = vmatprep.subr.bf16.mxu1 %v8743_v17  ;;  %7521 = vmatprep.subr.bf16.mxu0 %v8743_v17 }
 0x14d   : > { %982 = vmatprep.mubr.f32.mxu1 %v891_v24  ;;  %1266 = vmatprep.mubr.f32.mxu0 %v1175_v27  ;;  %v1026_v24 = vcvt.s32.f32 %v1010_v16  ;;  %v1452_v27 = vcvt.s32.f32 %v1436_v19 }
 0x14e   : > { %983 = vmatmul.mubr.f32.gmra.mrb[8].mxu1 %v890_v30  ;;  %1267 = vmatmul.mubr.f32.gmra.mrb[40].mxu0 %v1174_v31  ;;  %v1029_v30 = vcvt.s32.f32 %v1013_v22  ;;  %v1455_v31 = vcvt.s32.f32 %v1439_v23  ;;  %v1022_v22 = vunpack.c.3.s8 %v8921_v47  ;;  %v1448_v23 = vunpack.c.3.s8 %v8926_v44 }
 0x14f   : > { %7427 = vmatpush3.bf16.msra.mxu1 %v8695_v18  ;;  %7523 = vmatpush3.bf16.msra.mxu0 %v8695_v18 }
 0x150   : > { %7429 = vmatprep.subr.bf16.mxu1 %v8751_v26  ;;  %7525 = vmatprep.subr.bf16.mxu0 %v8751_v26 }
 0x151   : > { %987 = vmatprep.mubr.f32.mxu1 %v893_v35  ;;  %1271 = vmatprep.mubr.f32.mxu0 %v1177_v37  ;;  %v1028_v35 = vcvt.s32.f32 %v1012_v28  ;;  %v1454_v37 = vcvt.s32.f32 %v1438_v29  ;;  %v8973_v28 = vld [vmem:[%s10946_s3 + $0x60] sm:$0xff] }
 0x152   : > { %988 = vmatmul.mubr.f32.gmra.mrb[10].mxu1 %v892_v43  ;;  %1272 = vmatmul.mubr.f32.gmra.mrb[42].mxu0 %v1176_v45  ;;  %v8909_v43 = vld [vmem:[%s10946_s3 + $0x38] sm:$0xff]  ;;  %v8978_v29 = vld [vmem:[%s10946_s3 + $0xc0] sm:$0xff] }
 0x153   : > { %7431 = vmatpush3.bf16.msra.mxu1 %v8699_v25  ;;  %7527 = vmatpush3.bf16.msra.mxu0 %v8699_v25  ;;  %v8914_v45 = vld [vmem:[%s10946_s3 + $0x98] sm:$0xff]  ;;  %v1017_v51 = vunpack.c.0.s8 %v8909_v43  ;;  %v1019_v62 = vunpack.c.1.s8 %v8909_v43  ;;  %v1021_v8 = vunpack.c.2.s8 %v8909_v43  ;;  %v1023_v16 = vunpack.c.3.s8 %v8909_v43 }
 0x154   : > { %7433 = vmatprep.subr.bf16.mxu1 %v8769_v36  ;;  %7529 = vmatprep.subr.bf16.mxu0 %v8769_v36  ;;  %v1443_v52 = vunpack.c.0.s8 %v8914_v45  ;;  %v1445_v63 = vunpack.c.1.s8 %v8914_v45  ;;  %v1447_v10 = vunpack.c.2.s8 %v8914_v45  ;;  %v1449_v19 = vunpack.c.3.s8 %v8914_v45 }
 0x155   : > { %992 = vmatprep.mubr.f32.mxu1 %v895_v48  ;;  %1276 = vmatprep.mubr.f32.mxu0 %v1179_v50  ;;  %v1031_v48 = vcvt.s32.f32 %v1015_v33  ;;  %v1457_v50 = vcvt.s32.f32 %v1441_v34  ;;  %v1033_v59 = vcvt.s32.f32 %v1017_v51  ;;  %v1294_v51 = vunpack.c.1.s8 %v8973_v28 }
 0x156   : > { %993 = vmatmul.mubr.f32.gmra.mrb[12].mxu1 %v894_v53  ;;  %1277 = vmatmul.mubr.f32.gmra.mrb[44].mxu0 %v1178_v55  ;;  %v1030_v53 = vcvt.s32.f32 %v1014_v39  ;;  %v1456_v55 = vcvt.s32.f32 %v1440_v42  ;;  %v1459_v60 = vcvt.s32.f32 %v1443_v52  ;;  %v1292_v39 = vunpack.c.0.s8 %v8973_v28 }
 0x157   : > { %7435 = vmatpush3.bf16.msra.mxu1 %v8703_v32  ;;  %7531 = vmatpush3.bf16.msra.mxu0 %v8703_v32  ;;  %v1718_v42 = vunpack.c.0.s8 %v8978_v29  ;;  %v1720_v52 = vunpack.c.1.s8 %v8978_v29 }
 0x158   : > { %7437 = vmatprep.subr.bf16.mxu1 %v8778_v46  ;;  %7533 = vmatprep.subr.bf16.mxu0 %v8778_v46 }
 0x159   : > { %997 = vmatprep.mubr.f32.mxu1 %v897_v0  ;;  %1281 = vmatprep.mubr.f32.mxu0 %v1181_v2  ;;  %v1032_v0 = vcvt.s32.f32 %v1016_v56  ;;  %v1458_v2 = vcvt.s32.f32 %v1442_v58 }
 0x15a   : > { %998 = vmatmul.mubr.f32.gmra.mrb[14].mxu1 %v896_v6  ;;  %1282 = vmatmul.mubr.f32.gmra.mrb[46].mxu0 %v1180_v7  ;;  %v1035_v6 = vcvt.s32.f32 %v1019_v62  ;;  %v1461_v7 = vcvt.s32.f32 %v1445_v63  ;;  %v1736_v62 = vcvt.s32.f32 %v1720_v52  ;;  %v1722_v63 = vunpack.c.2.s8 %v8978_v29 }
 0x15b   : > { %7439 = vmatpush3.bf16.msra.mxu1 %v8707_v41  ;;  %7535 = vmatpush3.bf16.msra.mxu0 %v8707_v41 }
 0x15c   : > { %7473 = vmatprep.subr.bf16.mxu1 %v8711_v49  ;;  %7569 = vmatprep.subr.bf16.mxu0 %v8711_v49 }
 0x15d   : > { %1104 = vmatprep.mubr.f32.mxu1 %v1025_v12  ;;  %1530 = vmatprep.mubr.f32.mxu0 %v1451_v13  ;;  %v1034_v12 = vcvt.s32.f32 %v1018_v3  ;;  %v1460_v13 = vcvt.s32.f32 %v1444_v5 }
 0x15e   : > { %1105 = vmatmul.mubr.f32.vlgmr.msra.gmra.mrb[16].mxu1 %v1024_v14  ;;  %1531 = vmatmul.mubr.f32.vlgmr.msra.gmra.mrb[48].mxu0 %v1450_v15  ;;  %v1037_v14 = vcvt.s32.f32 %v1021_v8  ;;  %v1463_v15 = vcvt.s32.f32 %v1447_v10  ;;  %v9012_v8 = vld [vmem:[%s10946_s3 + $0x78] sm:$0xff]  ;;  %v1738_v10 = vcvt.s32.f32 %v1722_v63  ;;  %v9082_v63 = vld [vmem:[%s10946_s3 + $0x100] sm:$0xff] }
 0x15f   : > { %7475 = vmatpush3.bf16.msra.mxu1 %v8679_v54  ;;  %7571 = vmatpush3.bf16.msra.mxu0 %v8679_v54 }
 0x160   : > { %7477 = vmatprep.subr.bf16.mxu1 %v8719_v57  ;;  %7573 = vmatprep.subr.bf16.mxu0 %v8719_v57 }
 0x161   : > { %1109 = vmatprep.mubr.f32.mxu1 %v1027_v20  ;;  %1535 = vmatprep.mubr.f32.mxu0 %v1453_v21  ;;  %v1036_v20 = vcvt.s32.f32 %v1020_v38  ;;  %v1462_v21 = vcvt.s32.f32 %v1446_v40  ;;  %v9025_v38 = vld [vmem:[%s10946_s3 + $0x70] sm:$0xff] }
 0x162   : > { %1110 = vmatmul.mubr.f32.gmra.mrb[18].mxu1 %v1026_v24  ;;  %1536 = vmatmul.mubr.f32.gmra.mrb[50].mxu0 %v1452_v27  ;;  %v8961_v24 = vld [vmem:[%s10946_s3 + $0x68] sm:$0xff]  ;;  %v9030_v40 = vld [vmem:[%s10946_s3 + $0xd0] sm:$0xff] }
 0x163   : > { %7479 = vmatpush3.bf16.msra.mxu1 %v8683_v61  ;;  %7575 = vmatpush3.bf16.msra.mxu0 %v8683_v61  ;;  %v8966_v27 = vld [vmem:[%s10946_s3 + $0xc8] sm:$0xff]  ;;  %v1293_v33 = vunpack.c.0.s8 %v8961_v24  ;;  %v1295_v47 = vunpack.c.1.s8 %v8961_v24 }
 0x164   : > { %7481 = vmatprep.subr.bf16.mxu1 %v8727_v1  ;;  %7577 = vmatprep.subr.bf16.mxu0 %v8727_v1  ;;  %v1719_v34 = vunpack.c.0.s8 %v8966_v27  ;;  %v1721_v44 = vunpack.c.1.s8 %v8966_v27  ;;  %v1723_v58 = vunpack.c.2.s8 %v8966_v27  ;;  %v1725_v5 = vunpack.c.3.s8 %v8966_v27 }
 0x165   : > { %1114 = vmatprep.mubr.f32.mxu1 %v1029_v30  ;;  %1540 = vmatprep.mubr.f32.mxu0 %v1455_v31  ;;  %v1039_v30 = vcvt.s32.f32 %v1023_v16  ;;  %v1465_v31 = vcvt.s32.f32 %v1449_v19  ;;  %v1309_v43 = vcvt.s32.f32 %v1293_v33  ;;  %v1303_v27 = vunpack.c.1.s8 %v9012_v8 }
 0x166   : > { %1115 = vmatmul.mubr.f32.gmra.mrb[20].mxu1 %v1028_v35  ;;  %1541 = vmatmul.mubr.f32.gmra.mrb[52].mxu0 %v1454_v37  ;;  %v1038_v35 = vcvt.s32.f32 %v1022_v22  ;;  %v1464_v37 = vcvt.s32.f32 %v1448_v23  ;;  %v1735_v45 = vcvt.s32.f32 %v1719_v34  ;;  %v1737_v56 = vcvt.s32.f32 %v1721_v44 }
 0x167   : > { %7483 = vmatpush3.bf16.msra.mxu1 %v8687_v4  ;;  %7579 = vmatpush3.bf16.msra.mxu0 %v8687_v4  ;;  %v1739_v3 = vcvt.s32.f32 %v1723_v58  ;;  %v1741_v16 = vcvt.s32.f32 %v1725_v5  ;;  %v1726_v23 = vunpack.c.0.s8 %v9030_v40  ;;  %v1728_v34 = vunpack.c.1.s8 %v9030_v40 }
 0x168   : > { %7485 = vmatprep.subr.bf16.mxu1 %v8735_v9  ;;  %7581 = vmatprep.subr.bf16.mxu0 %v8735_v9  ;;  %v1730_v44 = vunpack.c.2.s8 %v9030_v40 }
 0x169   : > { %1119 = vmatprep.mubr.f32.mxu1 %v1031_v48  ;;  %1545 = vmatprep.mubr.f32.mxu0 %v1457_v50  ;;  %v1308_v48 = vcvt.s32.f32 %v1292_v39  ;;  %v1734_v50 = vcvt.s32.f32 %v1718_v42  ;;  %v1742_v33 = vcvt.s32.f32 %v1726_v23 }
 0x16a   : > { %1120 = vmatmul.mubr.f32.gmra.mrb[22].mxu1 %v1030_v53  ;;  %1546 = vmatmul.mubr.f32.gmra.mrb[54].mxu0 %v1456_v55  ;;  %v1311_v53 = vcvt.s32.f32 %v1295_v47  ;;  %v1297_v55 = vunpack.c.2.s8 %v8961_v24  ;;  %v1744_v47 = vcvt.s32.f32 %v1728_v34  ;;  %v1746_v58 = vcvt.s32.f32 %v1730_v44 }
 0x16b   : > { %7487 = vmatpush3.bf16.msra.mxu1 %v8691_v11  ;;  %7583 = vmatpush3.bf16.msra.mxu0 %v8691_v11 }
 0x16c   : > { %7489 = vmatprep.subr.bf16.mxu1 %v8743_v17  ;;  %7585 = vmatprep.subr.bf16.mxu0 %v8743_v17 }
 0x16d   : > { %1124 = vmatprep.mubr.f32.mxu1 %v1033_v59  ;;  %1550 = vmatprep.mubr.f32.mxu0 %v1459_v60  ;;  %v1310_v59 = vcvt.s32.f32 %v1294_v51  ;;  %v1296_v60 = vunpack.c.2.s8 %v8973_v28  ;;  %v9062_v51 = vld [vmem:[%s10946_s3 + $0xa8] sm:$0xff] }
 0x16e   : > { %1125 = vmatmul.mubr.f32.gmra.mrb[24].mxu1 %v1032_v0  ;;  %1551 = vmatmul.mubr.f32.gmra.mrb[56].mxu0 %v1458_v2  ;;  %v1313_v0 = vcvt.s32.f32 %v1297_v55  ;;  %v1299_v2 = vunpack.c.3.s8 %v8961_v24 }
 0x16f   : > { %7491 = vmatpush3.bf16.msra.mxu1 %v8695_v18  ;;  %7587 = vmatpush3.bf16.msra.mxu0 %v8695_v18 }
 0x170   : > { %7493 = vmatprep.subr.bf16.mxu1 %v8751_v26  ;;  %7589 = vmatprep.subr.bf16.mxu0 %v8751_v26 }
 0x171   : > { %1129 = vmatprep.mubr.f32.mxu1 %v1035_v6  ;;  %1555 = vmatprep.mubr.f32.mxu0 %v1461_v7  ;;  %v1312_v6 = vcvt.s32.f32 %v1296_v60  ;;  %v1298_v7 = vunpack.c.3.s8 %v8973_v28  ;;  %v9070_v60 = vld [vmem:[%s10946_s3 + $0x108] sm:$0xff] }
 0x172   : > { %1130 = vmatmul.mubr.f32.gmra.mrb[26].mxu1 %v1034_v12  ;;  %1556 = vmatmul.mubr.f32.gmra.mrb[58].mxu0 %v1460_v13  ;;  %v1724_v12 = vunpack.c.3.s8 %v8978_v29  ;;  %v9018_v13 = vld [vmem:[%s10946_s3 + $0xd8] sm:$0xff]  ;;  %v2003_v5 = vunpack.c.0.s8 %v9070_v60  ;;  %v2007_v23 = vunpack.c.2.s8 %v9070_v60  ;;  %v2009_v34 = vunpack.c.3.s8 %v9070_v60 }
 0x173   : > { %7495 = vmatpush3.bf16.msra.mxu1 %v8699_v25  ;;  %7591 = vmatpush3.bf16.msra.mxu0 %v8699_v25  ;;  %v1727_v19 = vunpack.c.0.s8 %v9018_v13  ;;  %v1729_v29 = vunpack.c.1.s8 %v9018_v13  ;;  %v1731_v42 = vunpack.c.2.s8 %v9018_v13 }
 0x174   : > { %7497 = vmatprep.subr.bf16.mxu1 %v8769_v36  ;;  %7593 = vmatprep.subr.bf16.mxu0 %v8769_v36  ;;  %v1740_v22 = vcvt.s32.f32 %v1724_v12  ;;  %v1579_v12 = vunpack.c.1.s8 %v9062_v51  ;;  %v2025_v44 = vcvt.s32.f32 %v2009_v34  ;;  %v2157_v34 = vld [vmem:[%s10947_s4 + $0x90] sm:$0xff] }
 0x175   : > { %1134 = vmatprep.mubr.f32.mxu1 %v1037_v14  ;;  %1560 = vmatprep.mubr.f32.mxu0 %v1463_v15  ;;  %v1315_v14 = vcvt.s32.f32 %v1299_v2  ;;  %v1301_v15 = vunpack.c.0.s8 %v9012_v8  ;;  %v1743_v28 = vcvt.s32.f32 %v1727_v19  ;;  %v1745_v39 = vcvt.s32.f32 %v1729_v29 }
 0x176   : > { %1135 = vmatmul.mubr.f32.gmra.mrb[28].mxu1 %v1036_v20  ;;  %1561 = vmatmul.mubr.f32.gmra.mrb[60].mxu0 %v1462_v21  ;;  %v1314_v20 = vcvt.s32.f32 %v1298_v7  ;;  %v1300_v21 = vunpack.c.0.s8 %v9025_v38  ;;  %v1747_v52 = vcvt.s32.f32 %v1731_v42  ;;  %v2004_v19 = vunpack.c.1.s8 %v9082_v63 }
 0x177   : > { %7499 = vmatpush3.bf16.msra.mxu1 %v8703_v32  ;;  %7595 = vmatpush3.bf16.msra.mxu0 %v8703_v32  ;;  %v1317_v24 = vcvt.s32.f32 %v1301_v15  ;;  %v2006_v29 = vunpack.c.2.s8 %v9082_v63 }
 0x178   : > { %7501 = vmatprep.subr.bf16.mxu1 %v8778_v46  ;;  %7597 = vmatprep.subr.bf16.mxu0 %v8778_v46 }
 0x179   : > { %1139 = vmatprep.mubr.f32.mxu1 %v1039_v30  ;;  %1565 = vmatprep.mubr.f32.mxu0 %v1465_v31  ;;  %v1316_v30 = vcvt.s32.f32 %v1300_v21  ;;  %v1302_v31 = vunpack.c.1.s8 %v9025_v38  ;;  %v1581_v21 = vunpack.c.2.s8 %v9062_v51 }
 0x17a   : > { %1140 = vmatmul.mubr.f32.gmra.mrb[30].mxu1 %v1038_v35  ;;  %1566 = vmatmul.mubr.f32.gmra.mrb[62].mxu0 %v1464_v37  ;;  %v1319_v35 = vcvt.s32.f32 %v1303_v27  ;;  %v1305_v37 = vunpack.c.2.s8 %v9012_v8 }
 0x17b   : > { %7503 = vmatpush3.bf16.msra.mxu1 %v8707_v41  ;;  %7599 = vmatpush3.bf16.msra.mxu0 %v8707_v41 }
 0x17c   : > { %7537 = vmatprep.subr.bf16.mxu1 %v8711_v49  ;;  %7633 = vmatprep.subr.bf16.mxu0 %v8711_v49 }
 0x17d   : > { %1388 = vmatprep.mubr.f32.mxu1 %v1309_v43  ;;  %1814 = vmatprep.mubr.f32.mxu0 %v1735_v45  ;;  %v1318_v43 = vcvt.s32.f32 %v1302_v31  ;;  %v1304_v45 = vunpack.c.2.s8 %v9025_v38  ;;  %v1583_v31 = vunpack.c.3.s8 %v9062_v51 }
 0x17e   : > { %1389 = vmatmul.mubr.f32.vlgmr.msra.gmra.mrb[32].mxu1 %v1308_v48  ;;  %1815 = vmatmul.mubr.f32.vlgmr.msra.gmra.mrb[64].mxu0 %v1734_v50  ;;  %v1321_v48 = vcvt.s32.f32 %v1305_v37  ;;  %v1307_v50 = vunpack.c.3.s8 %v9012_v8 }
 0x17f   : > { %7539 = vmatpush3.bf16.msra.mxu1 %v8679_v54  ;;  %7635 = vmatpush3.bf16.msra.mxu0 %v8679_v54  ;;  %v1320_v55 = vcvt.s32.f32 %v1304_v45  ;;  %v1599_v42 = vcvt.s32.f32 %v1583_v31  ;;  %v9126_v45 = vld [vmem:[%s10946_s3 + $0xb0] sm:$0xff]  ;;  %v2190_v31 = vld [vmem:[%s10947_s4 + $0x198] sm:$0xff] }
 0x180   : > { %7541 = vmatprep.subr.bf16.mxu1 %v8719_v57  ;;  %7637 = vmatprep.subr.bf16.mxu0 %v8719_v57  ;;  %v1323_v2 = vcvt.s32.f32 %v1307_v50  ;;  %v1584_v50 = vunpack.c.0.s8 %v9126_v45 }
 0x181   : > { %1393 = vmatprep.mubr.f32.mxu1 %v1311_v53  ;;  %1819 = vmatprep.mubr.f32.mxu0 %v1737_v56  ;;  %v1733_v53 = vunpack.c.3.s8 %v9018_v13  ;;  %v1306_v56 = vunpack.c.3.s8 %v9025_v38  ;;  %v2005_v38 = vunpack.c.1.s8 %v9070_v60 }
 0x182   : > { %1394 = vmatmul.mubr.f32.gmra.mrb[34].mxu1 %v1310_v59  ;;  %1820 = vmatmul.mubr.f32.gmra.mrb[66].mxu0 %v1736_v62  ;;  %v1732_v59 = vunpack.c.3.s8 %v9030_v40  ;;  %v9077_v62 = vld [vmem:[%s10946_s3 + $0xa0] sm:$0xff]  ;;  %v2019_v40 = vcvt.s32.f32 %v2003_v5 }
 0x183   : > { %7543 = vmatpush3.bf16.msra.mxu1 %v8683_v61  ;;  %7639 = vmatpush3.bf16.msra.mxu0 %v8683_v61  ;;  %v1576_v7 = vunpack.c.0.s8 %v9077_v62  ;;  %v1578_v15 = vunpack.c.1.s8 %v9077_v62  ;;  %v1580_v27 = vunpack.c.2.s8 %v9077_v62  ;;  %v1582_v37 = vunpack.c.3.s8 %v9077_v62 }
 0x184   : > { %7545 = vmatprep.subr.bf16.mxu1 %v8727_v1  ;;  %7641 = vmatprep.subr.bf16.mxu0 %v8727_v1  ;;  %v1748_v8 = vcvt.s32.f32 %v1732_v59  ;;  %v1586_v59 = vunpack.c.1.s8 %v9126_v45 }
 0x185   : > { %1398 = vmatprep.mubr.f32.mxu1 %v1313_v0  ;;  %1824 = vmatprep.mubr.f32.mxu0 %v1739_v3  ;;  %v1577_v0 = vunpack.c.0.s8 %v9062_v51  ;;  %v1749_v3 = vcvt.s32.f32 %v1733_v53 }
 0x186   : > { %1399 = vmatmul.mubr.f32.gmra.mrb[36].mxu1 %v1312_v6  ;;  %1825 = vmatmul.mubr.f32.gmra.mrb[68].mxu0 %v1738_v10  ;;  %v1322_v6 = vcvt.s32.f32 %v1306_v56  ;;  %v2002_v10 = vunpack.c.0.s8 %v9082_v63 }
 0x187   : > { %7547 = vmatpush3.bf16.msra.mxu1 %v8687_v4  ;;  %7643 = vmatpush3.bf16.msra.mxu0 %v8687_v4  ;;  %v1593_v13 = vcvt.s32.f32 %v1577_v0 }
 0x188   : > { %7549 = vmatprep.subr.bf16.mxu1 %v8735_v9  ;;  %7645 = vmatprep.subr.bf16.mxu0 %v8735_v9 }
 0x189   : > { %1403 = vmatprep.mubr.f32.mxu1 %v1315_v14  ;;  %1829 = vmatprep.mubr.f32.mxu0 %v1741_v16  ;;  %v1592_v14 = vcvt.s32.f32 %v1576_v7  ;;  %v2018_v16 = vcvt.s32.f32 %v2002_v10 }
 0x18a   : > { %1404 = vmatmul.mubr.f32.gmra.mrb[38].mxu1 %v1314_v20  ;;  %1830 = vmatmul.mubr.f32.gmra.mrb[70].mxu0 %v1740_v22  ;;  %v1595_v20 = vcvt.s32.f32 %v1579_v12  ;;  %v2021_v22 = vcvt.s32.f32 %v2005_v38 }
 0x18b   : > { %7551 = vmatpush3.bf16.msra.mxu1 %v8691_v11  ;;  %7647 = vmatpush3.bf16.msra.mxu0 %v8691_v11 }
 0x18c   : > { %7553 = vmatprep.subr.bf16.mxu1 %v8743_v17  ;;  %7649 = vmatprep.subr.bf16.mxu0 %v8743_v17 }
 0x18d   : > { %1408 = vmatprep.mubr.f32.mxu1 %v1317_v24  ;;  %1834 = vmatprep.mubr.f32.mxu0 %v1743_v28  ;;  %v1594_v24 = vcvt.s32.f32 %v1578_v15  ;;  %v2020_v28 = vcvt.s32.f32 %v2004_v19  ;;  %v2187_v15 = vld [vmem:[%s10947_s4 + $0x180] sm:$0xff] }
 0x18e   : > { %1409 = vmatmul.mubr.f32.gmra.mrb[40].mxu1 %v1316_v30  ;;  %1835 = vmatmul.mubr.f32.gmra.mrb[72].mxu0 %v1742_v33  ;;  %v1597_v30 = vcvt.s32.f32 %v1581_v21  ;;  %v2023_v33 = vcvt.s32.f32 %v2007_v23  ;;  %v2155_v19 = vld [vmem:[%s10947_s4 + $0x80] sm:$0xff]  ;;  %v2172_v23 = vld [vmem:[%s10947_s4 + $0x108] sm:$0xff] }
 0x18f   : > { %7555 = vmatpush3.bf16.msra.mxu1 %v8695_v18  ;;  %7651 = vmatpush3.bf16.msra.mxu0 %v8695_v18 }
 0x190   : > { %7557 = vmatprep.subr.bf16.mxu1 %v8751_v26  ;;  %7653 = vmatprep.subr.bf16.mxu0 %v8751_v26 }
 0x191   : > { %1413 = vmatprep.mubr.f32.mxu1 %v1319_v35  ;;  %1839 = vmatprep.mubr.f32.mxu0 %v1745_v39  ;;  %v9117_v35 = vld [vmem:[%s10946_s3 + $0x118] sm:$0xff]  ;;  %v2008_v39 = vunpack.c.3.s8 %v9082_v63 }
 0x192   : > { %1414 = vmatmul.mubr.f32.gmra.mrb[42].mxu1 %v1318_v43  ;;  %1840 = vmatmul.mubr.f32.gmra.mrb[74].mxu0 %v1744_v47  ;;  %v9131_v47 = vld [vmem:[%s10946_s3 + $0x110] sm:$0xff]  ;;  %v2013_v56 = vunpack.c.1.s8 %v9117_v35  ;;  %v2015_v0 = vunpack.c.2.s8 %v9117_v35  ;;  %v2017_v10 = vunpack.c.3.s8 %v9117_v35 }
 0x193   : > { %7559 = vmatpush3.bf16.msra.mxu1 %v8699_v25  ;;  %7655 = vmatpush3.bf16.msra.mxu0 %v8699_v25  ;;  %v2024_v51 = vcvt.s32.f32 %v2008_v39  ;;  %v2012_v62 = vunpack.c.1.s8 %v9131_v47  ;;  %v2016_v38 = vunpack.c.3.s8 %v9131_v47 }
 0x194   : > { %7561 = vmatprep.subr.bf16.mxu1 %v8769_v36  ;;  %7657 = vmatprep.subr.bf16.mxu0 %v8769_v36 }
 0x195   : > { %1418 = vmatprep.mubr.f32.mxu1 %v1321_v48  ;;  %1844 = vmatprep.mubr.f32.mxu0 %v1747_v52  ;;  %v1598_v48 = vcvt.s32.f32 %v1582_v37  ;;  %v2010_v52 = vunpack.c.0.s8 %v9131_v47  ;;  %v2028_v5 = vcvt.s32.f32 %v2012_v62  ;;  %v2173_v37 = vld [vmem:[%s10947_s4 + $0x110] sm:$0xff] }
 0x196   : > { %1419 = vmatmul.mubr.f32.gmra.mrb[44].mxu1 %v1320_v55  ;;  %1845 = vmatmul.mubr.f32.gmra.mrb[76].mxu0 %v1746_v58  ;;  %v1600_v58 = vcvt.s32.f32 %v1584_v50  ;;  %v2141_v50 = vld [vmem:[%s10947_s4 + $0x10] sm:$0xff] }
 0x197   : > { %7563 = vmatpush3.bf16.msra.mxu1 %v8703_v32  ;;  %7659 = vmatpush3.bf16.msra.mxu0 %v8703_v32  ;;  %v2026_v60 = vcvt.s32.f32 %v2010_v52 }
 0x198   : > { %7565 = vmatprep.subr.bf16.mxu1 %v8778_v46  ;;  %7661 = vmatprep.subr.bf16.mxu0 %v8778_v46 }
 0x199   : > { %1423 = vmatprep.mubr.f32.mxu1 %v1323_v2  ;;  %1849 = vmatprep.mubr.f32.mxu0 %v1749_v3  ;;  %v1602_v2 = vcvt.s32.f32 %v1586_v59  ;;  %v1588_v3 = vunpack.c.2.s8 %v9126_v45 }
 0x19a   : > { %1424 = vmatmul.mubr.f32.gmra.mrb[46].mxu1 %v1322_v6  ;;  %1850 = vmatmul.mubr.f32.gmra.mrb[78].mxu0 %v1748_v8  ;;  %v2014_v6 = vunpack.c.2.s8 %v9131_v47  ;;  %v2031_v8 = vcvt.s32.f32 %v2015_v0  ;;  %v2194_v0 = vld [vmem:[%s10947_s4 + $0x1b8] sm:$0xff] }
 0x19b   : > { %7567 = vmatpush3.bf16.msra.mxu1 %v8707_v41  ;;  %7663 = vmatpush3.bf16.msra.mxu0 %v8707_v41  ;;  %v1604_v12 = vcvt.s32.f32 %v1588_v3  ;;  %v2143_v3 = vld [vmem:[%s10947_s4 + $0x20] sm:$0xff] }
 0x19c   : > { %7601 = vmatprep.subr.bf16.mxu1 %v8711_v49  ;;  %1672 = vmatprep.mubr.f32.mxu1 %v1593_v13  ;;  %v9111_v49 = vld [vmem:[%s10946_s3 + $0xb8] sm:$0xff]  ;;  %v1590_v13 = vunpack.c.3.s8 %v9126_v45 }
 0x19d   : > { %2098 = vmatprep.mubr.f32.mxu0 %v2019_v40  ;;  %v1585_v43 = vunpack.c.0.s8 %v9111_v49  ;;  %v1587_v55 = vunpack.c.1.s8 %v9111_v49  ;;  %v1589_v63 = vunpack.c.2.s8 %v9111_v49  ;;  %v1591_v7 = vunpack.c.3.s8 %v9111_v49 }
 0x19e   : > { %1673 = vmatmul.mubr.f32.vlgmr.msra.gmra.mrb[48].mxu1 %v1592_v14  ;;  %2099 = vmatmul.mubr.f32.vlgmr.msra.gmra.mrb[80].mxu0 %v2018_v16  ;;  %v9165_v14 = vld [vmem:[%s10946_s3 + $0xe0] sm:$0xff]  ;;  %v2188_v16 = vld [vmem:[%s10947_s4 + $0x188] sm:$0xff] }
 0x19f   : > { %7603 = vmatpush3.bf16.msra.mxu1 %v8679_v54  ;;  %1677 = vmatprep.mubr.f32.mxu1 %v1595_v20  ;;  %v1596_v54 = vcvt.s32.f32 %v1580_v27  ;;  %v1601_v53 = vcvt.s32.f32 %v1585_v43  ;;  %v2156_v20 = vld [vmem:[%s10947_s4 + $0x88] sm:$0xff]  ;;  %v7696_v21 = vpack.c.bf16 %v2188_v16, %v2187_v15  ;;  %v2032_v27 = vcvt.s32.f32 %v2016_v38  ;;  %v2195_v15 = vld [vmem:[%s10947_s4 + $0x1c0] sm:$0xff] }
 0x1a0   : > { %7605 = vmatprep.subr.bf16.mxu1 %v8719_v57  ;;  %2103 = vmatprep.mubr.f32.mxu0 %v2021_v22  ;;  %v2022_v57 = vcvt.s32.f32 %v2006_v29  ;;  %v2171_v22 = vld [vmem:[%s10947_s4 + $0x100] sm:$0xff]  ;;  %v7664_v49 = vpack.c.bf16 %v2156_v20, %v2155_v19  ;;  %v1864_v59 = vunpack.c.2.s8 %v9165_v14  ;;  %v2196_v16 = vld [vmem:[%s10947_s4 + $0x1c8] sm:$0xff]  ;;  %v2146_v19 = vld [vmem:[%s10947_s4 + $0x38] sm:$0xff] }
 0x1a1   : > { %7697 = vmatprep.subr.bf16.mxu0 %v7696_v21  ;;  %v2163_v20 = vld [vmem:[%s10947_s4 + $0xc0] sm:$0xff] }
 0x1a2   : > { %1678 = vmatmul.mubr.f32.gmra.mrb[50].mxu1 %v1594_v24  ;;  %2104 = vmatmul.mubr.f32.gmra.mrb[82].mxu0 %v2020_v28  ;;  %v1860_v24 = vunpack.c.0.s8 %v9165_v14 }
 0x1a3   : > { %7607 = vmatpush3.bf16.msra.mxu1 %v8683_v61  ;;  %1682 = vmatprep.mubr.f32.mxu1 %v1597_v30  ;;  %v2011_v61 = vunpack.c.0.s8 %v9117_v35  ;;  %v2189_v30 = vld [vmem:[%s10947_s4 + $0x190] sm:$0xff]  ;;  %v7698_v35 = vpack.c.bf16 %v2172_v23, %v2171_v22  ;;  %v2164_v22 = vld [vmem:[%s10947_s4 + $0xc8] sm:$0xff]  ;;  %v7712_v23 = vpack.c.bf16 %v2196_v16, %v2195_v15 }
 0x1a4   : > { %7609 = vmatprep.subr.bf16.mxu1 %v8727_v1  ;;  %2108 = vmatprep.mubr.f32.mxu0 %v2023_v33  ;;  %v2140_v33 = vld [vmem:[%s10947_s4 + $0x8] sm:$0xff]  ;;  %v1876_v39 = vcvt.s32.f32 %v1860_v24  ;;  %v2153_v16 = vld [vmem:[%s10947_s4 + $0x70] sm:$0xff] }
 0x1a5   : > { %v2027_v1 = vcvt.s32.f32 %v2011_v61  ;;  %v2192_v61 = vld [vmem:[%s10947_s4 + $0x1a8] sm:$0xff]  ;;  %7699 = vmatpush3.bf16.msra.mxu0 %v7698_v35 }
 0x1a6   : > { %1683 = vmatmul.mubr.f32.gmra.mrb[52].mxu1 %v1596_v54  ;;  %2109 = vmatmul.mubr.f32.gmra.mrb[84].mxu0 %v2022_v57  ;;  %v2158_v54 = vld [vmem:[%s10947_s4 + $0x98] sm:$0xff]  ;;  %v2180_v24 = vld [vmem:[%s10947_s4 + $0x148] sm:$0xff] }
 0x1a7   : > { %7611 = vmatpush3.bf16.msra.mxu1 %v8687_v4  ;;  %1687 = vmatprep.mubr.f32.mxu1 %v1599_v42  ;;  %v1603_v4 = vcvt.s32.f32 %v1587_v55  ;;  %v2174_v57 = vld [vmem:[%s10947_s4 + $0x118] sm:$0xff]  ;;  %v1862_v42 = vunpack.c.1.s8 %v9165_v14  ;;  %v2148_v35 = vld [vmem:[%s10947_s4 + $0x48] sm:$0xff] }
 0x1a8   : > { %7613 = vmatprep.subr.bf16.mxu1 %v8735_v9  ;;  %2113 = vmatprep.mubr.f32.mxu0 %v2025_v44  ;;  %v2029_v9 = vcvt.s32.f32 %v2013_v56  ;;  %v2191_v44 = vld [vmem:[%s10947_s4 + $0x1a0] sm:$0xff]  ;;  %v7702_v52 = vpack.c.bf16 %v2174_v57, %v2173_v37  ;;  %v2176_v56 = vld [vmem:[%s10947_s4 + $0x128] sm:$0xff]  ;;  %v2166_v37 = vld [vmem:[%s10947_s4 + $0xd8] sm:$0xff] }
 0x1a9   : > { %v7704_v55 = vpack.c.bf16 %v2192_v61, %v2191_v44 }
 0x1aa   : > { %1688 = vmatmul.mubr.f32.gmra.mrb[54].mxu1 %v1598_v48  ;;  %2114 = vmatmul.mubr.f32.gmra.mrb[86].mxu0 %v2024_v51  ;;  %v7668_v48 = vpack.c.bf16 %v2158_v54, %v2157_v34  ;;  %v2159_v51 = vld [vmem:[%s10947_s4 + $0xa0] sm:$0xff]  ;;  %v2165_v54 = vld [vmem:[%s10947_s4 + $0xd0] sm:$0xff] }
 0x1ab   : > { %7615 = vmatpush3.bf16.msra.mxu1 %v8691_v11  ;;  %1692 = vmatprep.mubr.f32.mxu1 %v1601_v53  ;;  %v1605_v11 = vcvt.s32.f32 %v1589_v63  ;;  %v2160_v53 = vld [vmem:[%s10947_s4 + $0xa8] sm:$0xff]  ;;  %v2147_v34 = vld [vmem:[%s10947_s4 + $0x40] sm:$0xff] }
 0x1ac   : > { %7617 = vmatprep.subr.bf16.mxu1 %v8743_v17  ;;  %2118 = vmatprep.mubr.f32.mxu0 %v2027_v1  ;;  %v9155_v17 = vld [vmem:[%s10946_s3 + $0xe8] sm:$0xff]  ;;  %v2175_v1 = vld [vmem:[%s10947_s4 + $0x120] sm:$0xff]  ;;  %v7682_v61 = vpack.c.bf16 %v2148_v35, %v2147_v34 }
 0x1ad   : > { %v1861_v40 = vunpack.c.0.s8 %v9155_v17  ;;  %v1863_v29 = vunpack.c.1.s8 %v9155_v17  ;;  %v1865_v45 = vunpack.c.2.s8 %v9155_v17  ;;  %v1867_v62 = vunpack.c.3.s8 %v9155_v17 }
 0x1ae   : > { %1693 = vmatmul.mubr.f32.gmra.mrb[56].mxu1 %v1600_v58  ;;  %2119 = vmatmul.mubr.f32.gmra.mrb[88].mxu0 %v2026_v60  ;;  %v1878_v58 = vcvt.s32.f32 %v1862_v42  ;;  %v2182_v42 = vld [vmem:[%s10947_s4 + $0x158] sm:$0xff] }
 0x1af   : > { %7619 = vmatpush3.bf16.msra.mxu1 %v8695_v18  ;;  %1697 = vmatprep.mubr.f32.mxu1 %v1603_v4  ;;  %v2030_v18 = vcvt.s32.f32 %v2014_v6  ;;  %v1877_v28 = vcvt.s32.f32 %v1861_v40  ;;  %v1879_v43 = vcvt.s32.f32 %v1863_v29  ;;  %v1881_v60 = vcvt.s32.f32 %v1865_v45  ;;  %v9246_v4 = vld [vmem:[%s10946_s3 + $0xf8] sm:$0xff]  ;;  %v2161_v6 = vld [vmem:[%s10947_s4 + $0xb0] sm:$0xff] }
 0x1b0   : > { %7621 = vmatprep.subr.bf16.mxu1 %v8751_v26  ;;  %2123 = vmatprep.mubr.f32.mxu0 %v2029_v9  ;;  %v1607_v26 = vcvt.s32.f32 %v1591_v7  ;;  %v2193_v9 = vld [vmem:[%s10947_s4 + $0x1b0] sm:$0xff]  ;;  %v2162_v7 = vld [vmem:[%s10947_s4 + $0xb8] sm:$0xff]  ;;  %v1869_v38 = vunpack.c.0.s8 %v9246_v4  ;;  %v1873_v44 = vunpack.c.2.s8 %v9246_v4 }
 0x1b1   : > { %v7708_v17 = vpack.c.bf16 %v2194_v0, %v2193_v9  ;;  %v1875_v9 = vunpack.c.3.s8 %v9246_v4 }
 0x1b2   : > { %1698 = vmatmul.mubr.f32.gmra.mrb[58].mxu1 %v1602_v2  ;;  %2124 = vmatmul.mubr.f32.gmra.mrb[90].mxu0 %v2028_v5  ;;  %v7672_v2 = vpack.c.bf16 %v2160_v53, %v2159_v51  ;;  %v2144_v5 = vld [vmem:[%s10947_s4 + $0x28] sm:$0xff]  ;;  %v1885_v29 = vcvt.s32.f32 %v1869_v38  ;;  %v2149_v51 = vld [vmem:[%s10947_s4 + $0x50] sm:$0xff]  ;;  %v2167_v53 = vld [vmem:[%s10947_s4 + $0xe0] sm:$0xff] }
 0x1b3   : > { %7623 = vmatpush3.bf16.msra.mxu1 %v8699_v25  ;;  %1702 = vmatprep.mubr.f32.mxu1 %v1605_v11  ;;  %v2033_v25 = vcvt.s32.f32 %v2017_v10  ;;  %v7706_v11 = vpack.c.bf16 %v2176_v56, %v2175_v1  ;;  %v2178_v10 = vld [vmem:[%s10947_s4 + $0x138] sm:$0xff]  ;;  %v7674_v40 = vpack.c.bf16 %v2144_v5, %v2143_v3  ;;  %v2168_v1 = vld [vmem:[%s10947_s4 + $0xe8] sm:$0xff]  ;;  %v1891_v38 = vcvt.s32.f32 %v1875_v9 }
 0x1b4   : > { %7625 = vmatprep.subr.bf16.mxu1 %v8769_v36  ;;  %2128 = vmatprep.mubr.f32.mxu0 %v2031_v8  ;;  %v1606_v36 = vcvt.s32.f32 %v1590_v13  ;;  %v2177_v8 = vld [vmem:[%s10947_s4 + $0x130] sm:$0xff]  ;;  %v1866_v13 = vunpack.c.3.s8 %v9165_v14  ;;  %v7676_v14 = vpack.c.bf16 %v2162_v7, %v2161_v6  ;;  %v2202_v3 = vld [vmem:[%s10947_s4 + $0x1f8] sm:$0xff]  ;;  %v7688_v5 = vpack.c.bf16 %v2168_v1, %v2167_v53  ;;  %v2151_v6 = vld [vmem:[%s10947_s4 + $0x60] sm:$0xff] }
 0x1b5   : > { %v7710_v21 = vpack.c.bf16 %v2178_v10, %v2177_v8  ;;  %v2185_v10 = vld [vmem:[%s10947_s4 + $0x170] sm:$0xff] }
 0x1b6   : > { %1703 = vmatmul.mubr.f32.gmra.mrb[60].mxu1 %v1604_v12  ;;  %2129 = vmatmul.mubr.f32.gmra.mrb[92].mxu0 %v2030_v18  ;;  %v1880_v12 = vcvt.s32.f32 %v1864_v59  ;;  %v1883_v18 = vcvt.s32.f32 %v1867_v62  ;;  %v2184_v59 = vld [vmem:[%s10947_s4 + $0x168] sm:$0xff] }
 0x1b7   : > { %7627 = vmatpush3.bf16.msra.mxu1 %v8703_v32  ;;  %1707 = vmatprep.mubr.f32.mxu1 %v1607_v26  ;;  %v2139_v32 = vld [vmem:[%s10947_s4] sm:$0xff]  ;;  %v9277_v26 = vld [vmem:[%s10946_s3 + $0xf0] sm:$0xff] }
 0x1b8   : > { %7629 = vmatprep.subr.bf16.mxu1 %v8778_v46  ;;  %2133 = vmatprep.mubr.f32.mxu0 %v2033_v25  ;;  %v7700_v46 = vpack.c.bf16 %v2190_v31, %v2189_v30  ;;  %v7666_v47 = vpack.c.bf16 %v2140_v33, %v2139_v32  ;;  %v2145_v25 = vld [vmem:[%s10947_s4 + $0x30] sm:$0xff]  ;;  %v1871_v30 = vunpack.c.1.s8 %v9246_v4  ;;  %v2198_v32 = vld [vmem:[%s10947_s4 + $0x1d8] sm:$0xff]  ;;  %v7680_v33 = vpack.c.bf16 %v2164_v22, %v2163_v20  ;;  %v2152_v4 = vld [vmem:[%s10947_s4 + $0x68] sm:$0xff] }
 0x1b9   : > { %v7678_v31 = vpack.c.bf16 %v2146_v19, %v2145_v25  ;;  %v1870_v45 = vunpack.c.1.s8 %v9277_v26  ;;  %v1872_v62 = vunpack.c.2.s8 %v9277_v26  ;;  %v2220_v19 = vld [vmem:[%s10947_s4 + $0x288] sm:$0xff] }
 0x1ba   : > { %1708 = vmatmul.mubr.f32.gmra.mrb[62].mxu1 %v1606_v36  ;;  %2134 = vmatmul.mubr.f32.gmra.mrb[94].mxu0 %v2032_v27  ;;  %v2179_v36 = vld [vmem:[%s10947_s4 + $0x140] sm:$0xff]  ;;  %v1882_v27 = vcvt.s32.f32 %v1866_v13 }
 0x1bb   : > { %7631 = vmatpush3.bf16.msra.mxu1 %v8707_v41  ;;  %1956 = vmatprep.mubr.f32.mxu1 %v1877_v28  ;;  %v2142_v41 = vld [vmem:[%s10947_s4 + $0x18] sm:$0xff]  ;;  %v1868_v28 = vunpack.c.0.s8 %v9277_v26  ;;  %v1888_v13 = vcvt.s32.f32 %v1872_v62 }
 0x1bc   : > { %7665 = vmatprep.subr.bf16.mxu1 %v7664_v49  ;;  %7701 = vmatprep.subr.bf16.mxu0 %v7700_v46  ;;  %v7670_v63 = vpack.c.bf16 %v2142_v41, %v2141_v50  ;;  %v2197_v49 = vld [vmem:[%s10947_s4 + $0x1d0] sm:$0xff]  ;;  %v7714_v46 = vpack.c.bf16 %v2180_v24, %v2179_v36  ;;  %v2200_v50 = vld [vmem:[%s10947_s4 + $0x1e8] sm:$0xff]  ;;  %v7684_v41 = vpack.c.bf16 %v2166_v37, %v2165_v54 }
 0x1bd   : > { %7703 = vmatpush3.bf16.msra.mxu0 %v7702_v52  ;;  %v7716_v57 = vpack.c.bf16 %v2198_v32, %v2197_v49  ;;  %v2150_v52 = vld [vmem:[%s10947_s4 + $0x58] sm:$0xff]  ;;  %v2252_v36 = vld [vmem:[%s10947_s4 + $0x388] sm:$0xff] }
 0x1be   : > { %1957 = vmatmul.mubr.f32.vlgmr.msra.gmra.mrb[64].mxu1 %v1876_v39  ;;  %7705 = vmatprep.subr.bf16.mxu0 %v7704_v55  ;;  %v2181_v39 = vld [vmem:[%s10947_s4 + $0x150] sm:$0xff]  ;;  %v7686_v0 = vpack.c.bf16 %v2150_v52, %v2149_v51 }
 0x1bf   : > { %1961 = vmatprep.mubr.f32.mxu1 %v1879_v43  ;;  %7667 = vmatpush3.bf16.msra.mxu1 %v7666_v47  ;;  %v1884_v43 = vcvt.s32.f32 %v1868_v28  ;;  %v1887_v47 = vcvt.s32.f32 %v1871_v30  ;;  %v7718_v55 = vpack.c.bf16 %v2182_v42, %v2181_v39 }
 0x1c0   : > { %7669 = vmatprep.subr.bf16.mxu1 %v7668_v48  ;;  %v2199_v48 = vld [vmem:[%s10947_s4 + $0x1e0] sm:$0xff] }
 0x1c1   : > { %7707 = vmatpush3.bf16.msra.mxu0 %v7706_v11  ;;  %v7720_v56 = vpack.c.bf16 %v2200_v50, %v2199_v48  ;;  %v2169_v11 = vld [vmem:[%s10947_s4 + $0xf0] sm:$0xff] }
 0x1c2   : > { %1962 = vmatmul.mubr.f32.gmra.mrb[66].mxu1 %v1878_v58  ;;  %7709 = vmatprep.subr.bf16.mxu0 %v7708_v17  ;;  %v2183_v58 = vld [vmem:[%s10947_s4 + $0x160] sm:$0xff]  ;;  %v2170_v17 = vld [vmem:[%s10947_s4 + $0xf8] sm:$0xff] }
 0x1c3   : > { %1966 = vmatprep.mubr.f32.mxu1 %v1881_v60  ;;  %7671 = vmatpush3.bf16.msra.mxu1 %v7670_v63  ;;  %v1886_v60 = vcvt.s32.f32 %v1870_v45  ;;  %v1889_v63 = vcvt.s32.f32 %v1873_v44  ;;  %v7722_v7 = vpack.c.bf16 %v2184_v59, %v2183_v58  ;;  %v7692_v15 = vpack.c.bf16 %v2170_v17, %v2169_v11 }
 0x1c4   : > { %7673 = vmatprep.subr.bf16.mxu1 %v7672_v2  ;;  %v2201_v2 = vld [vmem:[%s10947_s4 + $0x1f0] sm:$0xff] }
 0x1c5   : > { %7711 = vmatpush3.bf16.msra.mxu0 %v7710_v21  ;;  %v7724_v8 = vpack.c.bf16 %v2202_v3, %v2201_v2 }
 0x1c6   : > { %1967 = vmatmul.mubr.f32.gmra.mrb[68].mxu1 %v1880_v12  ;;  %7713 = vmatprep.subr.bf16.mxu0 %v7712_v23  ;;  %v2186_v12 = vld [vmem:[%s10947_s4 + $0x178] sm:$0xff]  ;;  %v2251_v23 = vld [vmem:[%s10947_s4 + $0x380] sm:$0xff] }
 0x1c7   : > { %1971 = vmatprep.mubr.f32.mxu1 %v1883_v18  ;;  %7675 = vmatpush3.bf16.msra.mxu1 %v7674_v40  ;;  %v1874_v18 = vunpack.c.3.s8 %v9277_v26  ;;  %v7690_v40 = vpack.c.bf16 %v2152_v4, %v2151_v6  ;;  %v7726_v25 = vpack.c.bf16 %v2186_v12, %v2185_v10  ;;  %v2219_v26 = vld [vmem:[%s10947_s4 + $0x280] sm:$0xff]  ;;  %v7760_v24 = vpack.c.bf16 %v2252_v36, %v2251_v23  ;;  %v2206_v23 = vld [vmem:[%s10947_s4 + $0x218] sm:$0xff] }
 0x1c8   : > { %7677 = vmatprep.subr.bf16.mxu1 %v7676_v14  ;;  %v2154_v14 = vld [vmem:[%s10947_s4 + $0x78] sm:$0xff]  ;;  %v7728_v22 = vpack.c.bf16 %v2220_v19, %v2219_v26 }
 0x1c9   : > { %7715 = vmatpush3.bf16.msra.mxu0 %v7714_v46  ;;  %v1890_v20 = vcvt.s32.f32 %v1874_v18  ;;  %v7694_v21 = vpack.c.bf16 %v2154_v14, %v2153_v16  ;;  %v2204_v18 = vld [vmem:[%s10947_s4 + $0x208] sm:$0xff]  ;;  %v2222_v16 = vld [vmem:[%s10947_s4 + $0x298] sm:$0xff] }
 0x1ca   : > { %1972 = vmatmul.mubr.f32.gmra.mrb[70].mxu1 %v1882_v27  ;;  %7717 = vmatprep.subr.bf16.mxu0 %v7716_v57 }
 0x1cb   : > { %1976 = vmatprep.mubr.f32.mxu1 %v1885_v29  ;;  %7679 = vmatpush3.bf16.msra.mxu1 %v7678_v31 }
 0x1cc   : > { %7681 = vmatprep.subr.bf16.mxu1 %v7680_v33 }
 0x1cd   : > { %7719 = vmatpush3.bf16.msra.mxu0 %v7718_v55 }
 0x1ce   : > { %1977 = vmatmul.mubr.f32.gmra.mrb[72].mxu1 %v1884_v43  ;;  %7721 = vmatprep.subr.bf16.mxu0 %v7720_v56 }
 0x1cf   : > { %1981 = vmatprep.mubr.f32.mxu1 %v1887_v47  ;;  %7683 = vmatpush3.bf16.msra.mxu1 %v7682_v61 }
 0x1d0   : > { %7685 = vmatprep.subr.bf16.mxu1 %v7684_v41 }
 0x1d1   : > { %7723 = vmatpush3.bf16.msra.mxu0 %v7722_v7 }
 0x1d2   : > { %1982 = vmatmul.mubr.f32.gmra.mrb[74].mxu1 %v1886_v60  ;;  %7725 = vmatprep.subr.bf16.mxu0 %v7724_v8 }
 0x1d3   : > { %1986 = vmatprep.mubr.f32.mxu1 %v1889_v63  ;;  %7687 = vmatpush3.bf16.msra.mxu1 %v7686_v0 }
 0x1d4   : > { %7689 = vmatprep.subr.bf16.mxu1 %v7688_v5 }
 0x1d5   : > { %7727 = vmatpush3.bf16.msra.mxu0 %v7726_v25 }
 0x1d6   : > { %1987 = vmatmul.mubr.f32.gmra.mrb[76].mxu1 %v1888_v13  ;;  %7761 = vmatprep.subr.bf16.mxu0 %v7760_v24  ;;  %v2203_v13 = vld [vmem:[%s10947_s4 + $0x200] sm:$0xff] }
 0x1d7   : > { %1991 = vmatprep.mubr.f32.mxu1 %v1891_v38  ;;  %7691 = vmatpush3.bf16.msra.mxu1 %v7690_v40 }
 0x1d8   : > { %7693 = vmatprep.subr.bf16.mxu1 %v7692_v15  ;;  %v2221_v15 = vld [vmem:[%s10947_s4 + $0x290] sm:$0xff] }
 0x1da   : > { %1992 = vmatmul.mubr.f32.gmra.mrb[78].mxu1 %v1890_v20  ;;  %v7730_v20 = vpack.c.bf16 %v2204_v18, %v2203_v13 }
 0x1db   : > { %7695 = vmatpush3.bf16.msra.mxu1 %v7694_v21  ;;  %v7732_v21 = vpack.c.bf16 %v2222_v16, %v2221_v15 }
 0x1dc   : > { %7729 = vmatprep.subr.bf16.mxu1 %v7728_v22  ;;  %v2205_v22 = vld [vmem:[%s10947_s4 + $0x210] sm:$0xff] }
 0x211   : > { %v5748_v27 = vpop.f32.mrb[0].mxu1  ;;  %v5860_v28 = vpop.f32.mrb[32].mxu0 }
 0x212   : > { %v5749_v29 = vpop.f32.mrb[1].mxu1  ;;  %v5861_v30 = vpop.f32.mrb[33].mxu0 }
 0x213   : > { %v9400_v31 = vadd.f32 %v5749_v29, %v5748_v27  ;;  %v9402_v49 = vadd.f32 %v5861_v30, %v5860_v28  ;;  %v2223_v27 = vld [vmem:[%s10947_s4 + $0x2a0] sm:$0xff]  ;;  %v2224_v28 = vld [vmem:[%s10947_s4 + $0x2a8] sm:$0xff] }
 0x215   : > { %v5751_v32 = vpop.f32.mrb[2].mxu1  ;;  %v5863_v33 = vpop.f32.mrb[34].mxu0 }
 0x216   : > { %v5752_v34 = vpop.f32.mrb[3].mxu1  ;;  %v5864_v35 = vpop.f32.mrb[35].mxu0 }
 0x217   : > { %v9404_v54 = vadd.f32 %v5752_v34, %v5751_v32  ;;  %v9406_v46 = vadd.f32 %v5864_v35, %v5863_v33  ;;  %v7734_v34 = vpack.c.bf16 %v2206_v23, %v2205_v22  ;;  %v7736_v35 = vpack.c.bf16 %v2224_v28, %v2223_v27 }
 0x219   : > { %v5754_v37 = vpop.f32.mrb[4].mxu1  ;;  %v5866_v57 = vpop.f32.mrb[36].mxu0 }
 0x21a   : > { %v5755_v39 = vpop.f32.mrb[5].mxu1  ;;  %v5867_v42 = vpop.f32.mrb[37].mxu0 }
 0x21b   : > { %v9408_v43 = vadd.f32 %v5755_v39, %v5754_v37  ;;  %v9410_v45 = vadd.f32 %v5867_v42, %v5866_v57  ;;  %v2207_v37 = vld [vmem:[%s10947_s4 + $0x220] sm:$0xff]  ;;  %v2208_v57 = vld [vmem:[%s10947_s4 + $0x228] sm:$0xff] }
 0x21d   : > { %v5757_v47 = vpop.f32.mrb[6].mxu1  ;;  %v5869_v44 = vpop.f32.mrb[38].mxu0 }
 0x21e   : > { %v5758_v61 = vpop.f32.mrb[7].mxu1  ;;  %v5870_v48 = vpop.f32.mrb[39].mxu0 }
 0x21f   : > { %v9412_v50 = vadd.f32 %v5758_v61, %v5757_v47  ;;  %v9414_v41 = vadd.f32 %v5870_v48, %v5869_v44  ;;  %v2226_v47 = vld [vmem:[%s10947_s4 + $0x2b8] sm:$0xff] }
 0x221   : > { %v5760_v51 = vpop.f32.mrb[8].mxu1  ;;  %v5872_v52 = vpop.f32.mrb[40].mxu0 }
 0x222   : > { %v5761_v53 = vpop.f32.mrb[9].mxu1  ;;  %v5873_v55 = vpop.f32.mrb[41].mxu0 }
 0x223   : > { %v9416_v1 = vadd.f32 %v5761_v53, %v5760_v51  ;;  %v9418_v56 = vadd.f32 %v5873_v55, %v5872_v52  ;;  %v7738_v52 = vpack.c.bf16 %v2208_v57, %v2207_v37  ;;  %v2209_v55 = vld [vmem:[%s10947_s4 + $0x230] sm:$0xff] }
 0x225   : > { %v5763_v58 = vpop.f32.mrb[10].mxu1  ;;  %v5875_v59 = vpop.f32.mrb[42].mxu0 }
 0x226   : > { %v5764_v60 = vpop.f32.mrb[11].mxu1  ;;  %v5876_v62 = vpop.f32.mrb[43].mxu0 }
 0x227   : > { %v9420_v63 = vadd.f32 %v5764_v60, %v5763_v58  ;;  %v9422_v9 = vadd.f32 %v5876_v62, %v5875_v59  ;;  %v2210_v58 = vld [vmem:[%s10947_s4 + $0x238] sm:$0xff]  ;;  %v2228_v62 = vld [vmem:[%s10947_s4 + $0x2c8] sm:$0xff] }
 0x229   : > { %v5766_v0 = vpop.f32.mrb[12].mxu1  ;;  %v5878_v2 = vpop.f32.mrb[44].mxu0 }
 0x22a   : > { %v5767_v3 = vpop.f32.mrb[13].mxu1  ;;  %v5879_v5 = vpop.f32.mrb[45].mxu0 }
 0x22b   : > { %v9424_v6 = vadd.f32 %v5767_v3, %v5766_v0  ;;  %v9426_v4 = vadd.f32 %v5879_v5, %v5878_v2 }
 0x22d   : > { %v5769_v11 = vpop.f32.mrb[14].mxu1  ;;  %v5881_v7 = vpop.f32.mrb[46].mxu0 }
 0x22e   : > { %v5770_v17 = vpop.f32.mrb[15].mxu1  ;;  %v5882_v8 = vpop.f32.mrb[47].mxu0 }
 0x22f   : > { %v9428_v10 = vadd.f32 %v5770_v17, %v5769_v11  ;;  %v9430_v12 = vadd.f32 %v5882_v8, %v5881_v7  ;;  %v7742_v11 = vpack.c.bf16 %v2210_v58, %v2209_v55  ;;  %v2211_v17 = vld [vmem:[%s10947_s4 + $0x240] sm:$0xff]  ;;  %v2212_v8 = vld [vmem:[%s10947_s4 + $0x248] sm:$0xff] }
 0x231   : > { %v5804_v38 = vpop.f32.mrb[16].mxu1  ;;  %v5972_v40 = vpop.f32.mrb[48].mxu0 }
 0x232   : > { %v5805_v14 = vpop.f32.mrb[17].mxu1  ;;  %v5973_v25 = vpop.f32.mrb[49].mxu0 }
 0x233   : > { %v5806_v26 = vadd.f32 %v5805_v14, %v5804_v38  ;;  %v9444_v19 = vadd.f32 %v5973_v25, %v5972_v40  ;;  %v2230_v38 = vld [vmem:[%s10947_s4 + $0x2d8] sm:$0xff]  ;;  %v7746_v25 = vpack.c.bf16 %v2212_v8, %v2211_v17  ;;  %v2253_v8 = vld [vmem:[%s10947_s4 + $0x390] sm:$0xff] }
 0x235   : > { %v5807_v36 = vpop.f32.mrb[18].mxu1  ;;  %2354 = vmatprep.mubr.f32.mxu1 %v5806_v26  ;;  %v5975_v24 = vpop.f32.mrb[50].mxu0 }
 0x236   : > { %v5808_v29 = vpop.f32.mrb[19].mxu1  ;;  %2355 = vmatmul.mubr.f32.vlgmr.msra.gmra.mrb[80].mxu1 %v9400_v31  ;;  %v5976_v30 = vpop.f32.mrb[51].mxu0  ;;  %v2225_v31 = vld [vmem:[%s10947_s4 + $0x2b0] sm:$0xff] }
 0x237   : > { %v5809_v32 = vadd.f32 %v5808_v29, %v5807_v36  ;;  %7731 = vmatpush3.bf16.msra.mxu1 %v7730_v20  ;;  %v9459_v33 = vadd.f32 %v5976_v30, %v5975_v24  ;;  %v7740_v53 = vpack.c.bf16 %v2226_v47, %v2225_v31  ;;  %v2213_v20 = vld [vmem:[%s10947_s4 + $0x250] sm:$0xff]  ;;  %v2232_v36 = vld [vmem:[%s10947_s4 + $0x2e8] sm:$0xff] }
 0x238   : > { %7733 = vmatprep.subr.bf16.mxu1 %v7732_v21  ;;  %v2214_v21 = vld [vmem:[%s10947_s4 + $0x258] sm:$0xff] }
 0x239   : > { %v5810_v39 = vpop.f32.mrb[20].mxu1  ;;  %2359 = vmatprep.mubr.f32.mxu1 %v5809_v32  ;;  %v5978_v42 = vpop.f32.mrb[52].mxu0  ;;  %v7750_v30 = vpack.c.bf16 %v2214_v21, %v2213_v20  ;;  %v2255_v21 = vld [vmem:[%s10947_s4 + $0x3a0] sm:$0xff] }
 0x23a   : > { %v5811_v44 = vpop.f32.mrb[21].mxu1  ;;  %2360 = vmatmul.mubr.f32.gmra.mrb[82].mxu1 %v9404_v54  ;;  %v5979_v61 = vpop.f32.mrb[53].mxu0  ;;  %v2227_v54 = vld [vmem:[%s10947_s4 + $0x2c0] sm:$0xff] }
 0x23b   : > { %v5812_v48 = vadd.f32 %v5811_v44, %v5810_v39  ;;  %7735 = vmatpush3.bf16.msra.mxu1 %v7734_v34  ;;  %v9474_v51 = vadd.f32 %v5979_v61, %v5978_v42  ;;  %v7744_v7 = vpack.c.bf16 %v2228_v62, %v2227_v54  ;;  %v2215_v34 = vld [vmem:[%s10947_s4 + $0x260] sm:$0xff]  ;;  %v2234_v39 = vld [vmem:[%s10947_s4 + $0x2f8] sm:$0xff] }
 0x23c   : > { %7737 = vmatprep.subr.bf16.mxu1 %v7736_v35  ;;  %v2216_v35 = vld [vmem:[%s10947_s4 + $0x268] sm:$0xff] }
 0x23d   : > { %v5813_v59 = vpop.f32.mrb[22].mxu1  ;;  %2364 = vmatprep.mubr.f32.mxu1 %v5812_v48  ;;  %v5981_v60 = vpop.f32.mrb[54].mxu0  ;;  %v7754_v61 = vpack.c.bf16 %v2216_v35, %v2215_v34 }
 0x23e   : > { %v5814_v0 = vpop.f32.mrb[23].mxu1  ;;  %2365 = vmatmul.mubr.f32.gmra.mrb[84].mxu1 %v9408_v43  ;;  %v5982_v2 = vpop.f32.mrb[55].mxu0  ;;  %v2229_v43 = vld [vmem:[%s10947_s4 + $0x2d0] sm:$0xff] }
 0x23f   : > { %v5815_v3 = vadd.f32 %v5814_v0, %v5813_v59  ;;  %7739 = vmatpush3.bf16.msra.mxu1 %v7738_v52  ;;  %v9489_v5 = vadd.f32 %v5982_v2, %v5981_v60  ;;  %v7748_v26 = vpack.c.bf16 %v2230_v38, %v2229_v43  ;;  %v2217_v52 = vld [vmem:[%s10947_s4 + $0x270] sm:$0xff]  ;;  %v2268_v59 = vld [vmem:[%s10947_s4 + $0x408] sm:$0xff] }
 0x240   : > { %7741 = vmatprep.subr.bf16.mxu1 %v7740_v53  ;;  %v2218_v53 = vld [vmem:[%s10947_s4 + $0x278] sm:$0xff] }
 0x241   : > { %v5816_v13 = vpop.f32.mrb[24].mxu1  ;;  %2369 = vmatprep.mubr.f32.mxu1 %v5815_v3  ;;  %v5984_v18 = vpop.f32.mrb[56].mxu0  ;;  %v7758_v2 = vpack.c.bf16 %v2218_v53, %v2217_v52  ;;  %v2235_v3 = vld [vmem:[%s10947_s4 + $0x300] sm:$0xff] }
 0x242   : > { %v5817_v40 = vpop.f32.mrb[25].mxu1  ;;  %2370 = vmatmul.mubr.f32.gmra.mrb[86].mxu1 %v9412_v50  ;;  %v5985_v15 = vpop.f32.mrb[57].mxu0  ;;  %v2231_v50 = vld [vmem:[%s10947_s4 + $0x2e0] sm:$0xff] }
 0x243   : > { %v5818_v16 = vadd.f32 %v5817_v40, %v5816_v13  ;;  %7743 = vmatpush3.bf16.msra.mxu1 %v7742_v11  ;;  %v9504_v14 = vadd.f32 %v5985_v15, %v5984_v18  ;;  %v7752_v32 = vpack.c.bf16 %v2232_v36, %v2231_v50  ;;  %v2236_v11 = vld [vmem:[%s10947_s4 + $0x308] sm:$0xff]  ;;  %v2254_v13 = vld [vmem:[%s10947_s4 + $0x398] sm:$0xff] }
 0x244   : > { %7745 = vmatprep.subr.bf16.mxu1 %v7744_v7  ;;  %v7762_v15 = vpack.c.bf16 %v2236_v11, %v2235_v3  ;;  %v2244_v3 = vld [vmem:[%s10947_s4 + $0x348] sm:$0xff] }
 0x245   : > { %v5819_v22 = vpop.f32.mrb[26].mxu1  ;;  %2374 = vmatprep.mubr.f32.mxu1 %v5818_v16  ;;  %v5987_v23 = vpop.f32.mrb[58].mxu0  ;;  %v7764_v16 = vpack.c.bf16 %v2254_v13, %v2253_v8 }
 0x246   : > { %v5820_v24 = vpop.f32.mrb[27].mxu1  ;;  %2375 = vmatmul.mubr.f32.gmra.mrb[88].mxu1 %v9416_v1  ;;  %v5988_v27 = vpop.f32.mrb[59].mxu0  ;;  %v2233_v1 = vld [vmem:[%s10947_s4 + $0x2f0] sm:$0xff] }
 0x247   : > { %v5821_v28 = vadd.f32 %v5820_v24, %v5819_v22  ;;  %7747 = vmatpush3.bf16.msra.mxu1 %v7746_v25  ;;  %v9519_v29 = vadd.f32 %v5988_v27, %v5987_v23  ;;  %v7756_v48 = vpack.c.bf16 %v2234_v39, %v2233_v1  ;;  %v2237_v25 = vld [vmem:[%s10947_s4 + $0x310] sm:$0xff]  ;;  %v2256_v22 = vld [vmem:[%s10947_s4 + $0x3a8] sm:$0xff] }
 0x248   : > { %7749 = vmatprep.subr.bf16.mxu1 %v7748_v26  ;;  %v2238_v26 = vld [vmem:[%s10947_s4 + $0x318] sm:$0xff] }
 0x249   : > { %v5822_v37 = vpop.f32.mrb[28].mxu1  ;;  %2379 = vmatprep.mubr.f32.mxu1 %v5821_v28  ;;  %v5990_v57 = vpop.f32.mrb[60].mxu0  ;;  %v7766_v27 = vpack.c.bf16 %v2238_v26, %v2237_v25  ;;  %v7768_v28 = vpack.c.bf16 %v2256_v22, %v2255_v21  ;;  %v2246_v25 = vld [vmem:[%s10947_s4 + $0x358] sm:$0xff] }
 0x24a   : > { %v5823_v42 = vpop.f32.mrb[29].mxu1  ;;  %2380 = vmatmul.mubr.f32.gmra.mrb[90].mxu1 %v9420_v63  ;;  %v5991_v31 = vpop.f32.mrb[61].mxu0  ;;  %v2267_v63 = vld [vmem:[%s10947_s4 + $0x400] sm:$0xff] }
 0x24b   : > { %v5824_v47 = vadd.f32 %v5823_v42, %v5822_v37  ;;  %7751 = vmatpush3.bf16.msra.mxu1 %v7750_v30  ;;  %v9534_v44 = vadd.f32 %v5991_v31, %v5990_v57  ;;  %v9557_v7 = vpack.c.bf16 %v2268_v59, %v2267_v63  ;;  %v2239_v30 = vld [vmem:[%s10947_s4 + $0x320] sm:$0xff]  ;;  %v2258_v37 = vld [vmem:[%s10947_s4 + $0x3b8] sm:$0xff] }
 0x24c   : > { %7753 = vmatprep.subr.bf16.mxu1 %v7752_v32  ;;  %v2240_v32 = vld [vmem:[%s10947_s4 + $0x328] sm:$0xff] }
 0x24d   : > { %v5825_v55 = vpop.f32.mrb[30].mxu1  ;;  %2384 = vmatprep.mubr.f32.mxu1 %v5824_v47  ;;  %v5993_v58 = vpop.f32.mrb[62].mxu0  ;;  %v7770_v31 = vpack.c.bf16 %v2240_v32, %v2239_v30  ;;  %v2248_v30 = vld [vmem:[%s10947_s4 + $0x368] sm:$0xff] }
 0x24e   : > { %v5826_v60 = vpop.f32.mrb[31].mxu1  ;;  %2385 = vmatmul.mubr.f32.gmra.mrb[92].mxu1 %v9424_v6  ;;  %v5994_v54 = vpop.f32.mrb[63].mxu0 }
 0x24f   : > { %v5827_v62 = vadd.f32 %v5826_v60, %v5825_v55  ;;  %7755 = vmatpush3.bf16.msra.mxu1 %v7754_v61  ;;  %v9549_v0 = vadd.f32 %v5994_v54, %v5993_v58  ;;  %v2241_v61 = vld [vmem:[%s10947_s4 + $0x330] sm:$0xff]  ;;  %v2260_v55 = vld [vmem:[%s10947_s4 + $0x3c8] sm:$0xff] }
 0x250   : > { %7757 = vmatprep.subr.bf16.mxu1 %v7756_v48  ;;  %v2242_v48 = vld [vmem:[%s10947_s4 + $0x338] sm:$0xff] }
 0x251   : > { %v5916_v17 = vpop.f32.mrb[32].mxu1  ;;  %2389 = vmatprep.mubr.f32.mxu1 %v5827_v62  ;;  %v6084_v6 = vpop.f32.mrb[64].mxu0  ;;  %v7774_v54 = vpack.c.bf16 %v2242_v48, %v2241_v61  ;;  %v2250_v61 = vld [vmem:[%s10947_s4 + $0x378] sm:$0xff] }
 0x252   : > { %v5917_v18 = vpop.f32.mrb[33].mxu1  ;;  %2390 = vmatmul.mubr.f32.gmra.mrb[94].mxu1 %v9428_v10  ;;  %v6085_v43 = vpop.f32.mrb[65].mxu0 }
 0x253   : > { %v5918_v38 = vadd.f32 %v5917_v18, %v5916_v17  ;;  %7759 = vmatpush3.bf16.msra.mxu1 %v7758_v2  ;;  %v9566_v40 = vadd.f32 %v6085_v43, %v6084_v6  ;;  %v2243_v2 = vld [vmem:[%s10947_s4 + $0x340] sm:$0xff]  ;;  %v2262_v6 = vld [vmem:[%s10947_s4 + $0x3d8] sm:$0xff] }
 0x254   : > { %7793 = vmatprep.subr.bf16.mxu1 %v9557_v7 }
 0x255   : > { %v5919_v20 = vpop.f32.mrb[34].mxu1  ;;  %2459 = vmatprep.mubr.f32.mxu0 %v5918_v38  ;;  %v6087_v10 = vpop.f32.mrb[66].mxu0  ;;  %v7778_v38 = vpack.c.bf16 %v2244_v3, %v2243_v2 }
 0x256   : > { %v5920_v23 = vpop.f32.mrb[35].mxu1  ;;  %2460 = vmatmul.mubr.f32.vlgmr.msra.gmra.mrb[96].mxu0 %v9402_v49  ;;  %v6088_v50 = vpop.f32.mrb[67].mxu0  ;;  %v2257_v49 = vld [vmem:[%s10947_s4 + $0x3b0] sm:$0xff] }
 0x257   : > { %v5921_v36 = vadd.f32 %v5920_v23, %v5919_v20  ;;  %7763 = vmatpush3.bf16.msra.mxu0 %v7762_v15  ;;  %v9582_v24 = vadd.f32 %v6088_v50, %v6087_v10  ;;  %v7772_v47 = vpack.c.bf16 %v2258_v37, %v2257_v49  ;;  %v2264_v10 = vld [vmem:[%s10947_s4 + $0x3e8] sm:$0xff] }
 0x258   : > { %7765 = vmatprep.subr.bf16.mxu0 %v7764_v16  ;;  %v2245_v16 = vld [vmem:[%s10947_s4 + $0x350] sm:$0xff] }
 0x259   : > { %v5922_v34 = vpop.f32.mrb[36].mxu1  ;;  %2464 = vmatprep.mubr.f32.mxu0 %v5921_v36  ;;  %v6090_v35 = vpop.f32.mrb[68].mxu0  ;;  %v7782_v36 = vpack.c.bf16 %v2246_v25, %v2245_v16 }
 0x25a   : > { %v5923_v57 = vpop.f32.mrb[37].mxu1  ;;  %2465 = vmatmul.mubr.f32.gmra.mrb[98].mxu0 %v9406_v46  ;;  %v6091_v1 = vpop.f32.mrb[69].mxu0  ;;  %v2259_v46 = vld [vmem:[%s10947_s4 + $0x3c0] sm:$0xff] }
 0x25b   : > { %v5924_v39 = vadd.f32 %v5923_v57, %v5922_v34  ;;  %7767 = vmatpush3.bf16.msra.mxu0 %v7766_v27  ;;  %v9597_v42 = vadd.f32 %v6091_v1, %v6090_v35  ;;  %v7776_v62 = vpack.c.bf16 %v2260_v55, %v2259_v46  ;;  %v2266_v35 = vld [vmem:[%s10947_s4 + $0x3f8] sm:$0xff] }
 0x25c   : > { %7769 = vmatprep.subr.bf16.mxu0 %v7768_v28  ;;  %v2247_v28 = vld [vmem:[%s10947_s4 + $0x360] sm:$0xff] }
 0x25d   : > { %v5925_v52 = vpop.f32.mrb[38].mxu1  ;;  %2469 = vmatprep.mubr.f32.mxu0 %v5924_v39  ;;  %v6093_v53 = vpop.f32.mrb[70].mxu0  ;;  %v7786_v39 = vpack.c.bf16 %v2248_v30, %v2247_v28 }
 0x25e   : > { %v5926_v58 = vpop.f32.mrb[39].mxu1  ;;  %2470 = vmatmul.mubr.f32.gmra.mrb[100].mxu0 %v9410_v45  ;;  %v6094_v63 = vpop.f32.mrb[71].mxu0  ;;  %v2261_v45 = vld [vmem:[%s10947_s4 + $0x3d0] sm:$0xff] }
 0x25f   : > { %v5927_v59 = vadd.f32 %v5926_v58, %v5925_v52  ;;  %7771 = vmatpush3.bf16.msra.mxu0 %v7770_v31  ;;  %v9612_v60 = vadd.f32 %v6094_v63, %v6093_v53  ;;  %v7780_v15 = vpack.c.bf16 %v2262_v6, %v2261_v45  ;;  %v2271_v6 = vld [vmem:[%s10947_s4 + $0x420] sm:$0xff] }
 0x260   : > { %7773 = vmatprep.subr.bf16.mxu0 %v7772_v47  ;;  %v2249_v47 = vld [vmem:[%s10947_s4 + $0x370] sm:$0xff] }
 0x261   : > { %v5928_v11 = vpop.f32.mrb[40].mxu1  ;;  %2474 = vmatprep.mubr.f32.mxu0 %v5927_v59  ;;  %v6096_v17 = vpop.f32.mrb[72].mxu0  ;;  %v7790_v58 = vpack.c.bf16 %v2250_v61, %v2249_v47  ;;  %v2269_v59 = vld [vmem:[%s10947_s4 + $0x410] sm:$0xff] }
 0x262   : > { %v5929_v8 = vpop.f32.mrb[41].mxu1  ;;  %2475 = vmatmul.mubr.f32.gmra.mrb[102].mxu0 %v9414_v41  ;;  %v6097_v13 = vpop.f32.mrb[73].mxu0  ;;  %v2263_v41 = vld [vmem:[%s10947_s4 + $0x3e0] sm:$0xff] }
 0x263   : > { %v5930_v18 = vadd.f32 %v5929_v8, %v5928_v11  ;;  %7775 = vmatpush3.bf16.msra.mxu0 %v7774_v54  ;;  %v9627_v43 = vadd.f32 %v6097_v13, %v6096_v17  ;;  %v7784_v27 = vpack.c.bf16 %v2264_v10, %v2263_v41  ;;  %v2270_v54 = vld [vmem:[%s10947_s4 + $0x418] sm:$0xff]  ;;  %v2272_v8 = vld [vmem:[%s10947_s4 + $0x428] sm:$0xff] }
 0x264   : > { %7777 = vmatprep.subr.bf16.mxu0 %v7776_v62  ;;  %v7796_v17 = vpack.c.bf16 %v2270_v54, %v2269_v59  ;;  %v7800_v16 = vpack.c.bf16 %v2272_v8, %v2271_v6 }
 0x265   : > { %v5931_v26 = vpop.f32.mrb[42].mxu1  ;;  %2479 = vmatprep.mubr.f32.mxu0 %v5930_v18  ;;  %v6099_v20 = vpop.f32.mrb[74].mxu0 }
 0x266   : > { %v5932_v21 = vpop.f32.mrb[43].mxu1  ;;  %2480 = vmatmul.mubr.f32.gmra.mrb[104].mxu0 %v9418_v56  ;;  %v6100_v22 = vpop.f32.mrb[75].mxu0  ;;  %v2265_v56 = vld [vmem:[%s10947_s4 + $0x3f0] sm:$0xff] }
 0x267   : > { %v5933_v23 = vadd.f32 %v5932_v21, %v5931_v26  ;;  %7779 = vmatpush3.bf16.msra.mxu0 %v7778_v38  ;;  %v9642_v50 = vadd.f32 %v6100_v22, %v6099_v20  ;;  %v7788_v31 = vpack.c.bf16 %v2266_v35, %v2265_v56  ;;  %v2273_v26 = vld [vmem:[%s10947_s4 + $0x430] sm:$0xff]  ;;  %v2274_v20 = vld [vmem:[%s10947_s4 + $0x438] sm:$0xff] }
 0x268   : > { %7781 = vmatprep.subr.bf16.mxu0 %v7780_v15  ;;  %v7804_v22 = vpack.c.bf16 %v2274_v20, %v2273_v26 }
 0x269   : > { %v5934_v32 = vpop.f32.mrb[44].mxu1  ;;  %2484 = vmatprep.mubr.f32.mxu0 %v5933_v23  ;;  %v6102_v34 = vpop.f32.mrb[76].mxu0 }
 0x26a   : > { %v5935_v49 = vpop.f32.mrb[45].mxu1  ;;  %2485 = vmatmul.mubr.f32.gmra.mrb[106].mxu0 %v9422_v9  ;;  %v6103_v37 = vpop.f32.mrb[77].mxu0 }
 0x26b   : > { %v5936_v57 = vadd.f32 %v5935_v49, %v5934_v32  ;;  %7783 = vmatpush3.bf16.msra.mxu0 %v7782_v36  ;;  %v9657_v1 = vadd.f32 %v6103_v37, %v6102_v34  ;;  %v2275_v36 = vld [vmem:[%s10947_s4 + $0x440] sm:$0xff]  ;;  %v2277_v49 = vld [vmem:[%s10947_s4 + $0x450] sm:$0xff]  ;;  %v2278_v37 = vld [vmem:[%s10947_s4 + $0x458] sm:$0xff] }
 0x26c   : > { %7785 = vmatprep.subr.bf16.mxu0 %v7784_v27  ;;  %v2276_v27 = vld [vmem:[%s10947_s4 + $0x448] sm:$0xff]  ;;  %v7812_v61 = vpack.c.bf16 %v2278_v37, %v2277_v49 }
 0x26d   : > { %v5937_v48 = vpop.f32.mrb[46].mxu1  ;;  %2489 = vmatprep.mubr.f32.mxu0 %v5936_v57  ;;  %v6105_v52 = vpop.f32.mrb[78].mxu0  ;;  %v7808_v56 = vpack.c.bf16 %v2276_v27, %v2275_v36 }
 0x26e   : > { %v5938_v9 = vpop.f32.mrb[47].mxu1  ;;  %2490 = vmatmul.mubr.f32.gmra.mrb[108].mxu0 %v9426_v4  ;;  %v6106_v53 = vpop.f32.mrb[79].mxu0 }
 0x26f   : > { %v5939_v46 = vadd.f32 %v5938_v9, %v5937_v48  ;;  %7787 = vmatpush3.bf16.msra.mxu0 %v7786_v39  ;;  %v9666_v55 = vadd.f32 %v6106_v53, %v6105_v52  ;;  %v2279_v52 = vld [vmem:[%s10947_s4 + $0x460] sm:$0xff]  ;;  %v2280_v9 = vld [vmem:[%s10947_s4 + $0x468] sm:$0xff] }
 0x270   : > { %7789 = vmatprep.subr.bf16.mxu0 %v7788_v31  ;;  %v7816_v59 = vpack.c.bf16 %v2280_v9, %v2279_v52 }
 0x271   : > { %v6028_v63 = vpop.f32.mrb[48].mxu1  ;;  %2494 = vmatprep.mubr.f32.mxu0 %v5939_v46  ;;  %v6196_v62 = vpop.f32.mrb[80].mxu0 }
 0x272   : > { %v6029_v2 = vpop.f32.mrb[49].mxu1  ;;  %2495 = vmatmul.mubr.f32.gmra.mrb[110].mxu0 %v9430_v12  ;;  %v6197_v4 = vpop.f32.mrb[81].mxu0 }
 0x273   : > { %v6030_v3 = vadd.f32 %v6029_v2, %v6028_v63  ;;  %7791 = vmatpush3.bf16.msra.mxu0 %v7790_v58  ;;  %v9675_v11 = vadd.f32 %v6197_v4, %v6196_v62  ;;  %v2281_v62 = vld [vmem:[%s10947_s4 + $0x470] sm:$0xff]  ;;  %v2282_v2 = vld [vmem:[%s10947_s4 + $0x478] sm:$0xff] }
 0x274   : > { %v7820_v6 = vpack.c.bf16 %v2282_v2, %v2281_v62 }
 0x275   : > { %v6031_v45 = vpop.f32.mrb[50].mxu1  ;;  %2564 = vmatprep.mubr.f32.mxu1 %v6030_v3  ;;  %v6199_v13 = vpop.f32.mrb[82].mxu0 }
 0x276   : > { %v6032_v18 = vpop.f32.mrb[51].mxu1  ;;  %2565 = vmatmul.mubr.f32.vlgmr.msra.gmra.mrb[96].mxu1 %v9444_v19  ;;  %v6200_v12 = vpop.f32.mrb[83].mxu0 }
 0x277   : > { %v6033_v38 = vadd.f32 %v6032_v18, %v6031_v45  ;;  %7795 = vmatpush3.bf16.msra.mxu1 %v9557_v7  ;;  %v9685_v15 = vadd.f32 %v6200_v12, %v6199_v13 }
 0x278   : > { %7797 = vmatprep.subr.bf16.mxu1 %v7796_v17 }
 0x279   : > { %v6034_v25 = vpop.f32.mrb[52].mxu1  ;;  %2569 = vmatprep.mubr.f32.mxu1 %v6033_v38  ;;  %v6202_v41 = vpop.f32.mrb[84].mxu0 }
 0x27a   : > { %v6035_v19 = vpop.f32.mrb[53].mxu1  ;;  %2570 = vmatmul.mubr.f32.gmra.mrb[98].mxu1 %v9459_v33  ;;  %v6203_v10 = vpop.f32.mrb[85].mxu0 }
 0x27b   : > { %v6036_v7 = vadd.f32 %v6035_v19, %v6034_v25  ;;  %7799 = vmatpush3.bf16.msra.mxu1 %v7796_v17  ;;  %v9694_v21 = vadd.f32 %v6203_v10, %v6202_v41 }
 0x27c   : > { %7801 = vmatprep.subr.bf16.mxu1 %v7800_v16 }
 0x27d   : > { %v6037_v23 = vpop.f32.mrb[54].mxu1  ;;  %2574 = vmatprep.mubr.f32.mxu1 %v6036_v7  ;;  %v6205_v28 = vpop.f32.mrb[86].mxu0 }
 0x27e   : > { %v6038_v30 = vpop.f32.mrb[55].mxu1  ;;  %2575 = vmatmul.mubr.f32.gmra.mrb[100].mxu1 %v9474_v51  ;;  %v6206_v33 = vpop.f32.mrb[87].mxu0 }
 0x27f   : > { %v6039_v32 = vadd.f32 %v6038_v30, %v6037_v23  ;;  %7803 = vmatpush3.bf16.msra.mxu1 %v7800_v16  ;;  %v9703_v34 = vadd.f32 %v6206_v33, %v6205_v28 }
 0x280   : > { %7805 = vmatprep.subr.bf16.mxu1 %v7804_v22 }
 0x281   : > { %v6040_v35 = vpop.f32.mrb[56].mxu1  ;;  %2579 = vmatprep.mubr.f32.mxu1 %v6039_v32  ;;  %v6208_v57 = vpop.f32.mrb[88].mxu0 }
 0x282   : > { %v6041_v39 = vpop.f32.mrb[57].mxu1  ;;  %2580 = vmatmul.mubr.f32.gmra.mrb[102].mxu1 %v9489_v5  ;;  %v6209_v51 = vpop.f32.mrb[89].mxu0 }
 0x283   : > { %v6042_v31 = vadd.f32 %v6041_v39, %v6040_v35  ;;  %7807 = vmatpush3.bf16.msra.mxu1 %v7804_v22  ;;  %v6210_v47 = vadd.f32 %v6209_v51, %v6208_v57 }
 0x284   : > { %7809 = vmatprep.subr.bf16.mxu1 %v7808_v56 }
 0x285   : > { %v6043_v48 = vpop.f32.mrb[58].mxu1  ;;  %2584 = vmatprep.mubr.f32.mxu1 %v6042_v31  ;;  %v6211_v53 = vpop.f32.mrb[90].mxu0 }
 0x286   : > { %v6044_v46 = vpop.f32.mrb[59].mxu1  ;;  %2585 = vmatmul.mubr.f32.gmra.mrb[104].mxu1 %v9504_v14  ;;  %v6212_v5 = vpop.f32.mrb[91].mxu0 }
 0x287   : > { %v6045_v58 = vadd.f32 %v6044_v46, %v6043_v48  ;;  %7811 = vmatpush3.bf16.msra.mxu1 %v7808_v56  ;;  %v6213_v63 = vadd.f32 %v6212_v5, %v6211_v53 }
 0x288   : > { %7813 = vmatprep.subr.bf16.mxu1 %v7812_v61 }
 0x289   : > { %v6046_v54 = vpop.f32.mrb[60].mxu1  ;;  %2589 = vmatprep.mubr.f32.mxu1 %v6045_v58  ;;  %v6214_v4 = vpop.f32.mrb[92].mxu0 }
 0x28a   : > { %v6047_v3 = vpop.f32.mrb[61].mxu1  ;;  %2590 = vmatmul.mubr.f32.gmra.mrb[106].mxu1 %v9519_v29  ;;  %v6215_v14 = vpop.f32.mrb[93].mxu0 }
 0x28b   : > { %v6048_v17 = vadd.f32 %v6047_v3, %v6046_v54  ;;  %7815 = vmatpush3.bf16.msra.mxu1 %v7812_v61  ;;  %v6216_v45 = vadd.f32 %v6215_v14, %v6214_v4  ;;  %v5586_v3 = vld [vmem:[%s10948_s5] ss:$0 sm:$0xff] }
 0x28c   : > { %7817 = vmatprep.subr.bf16.mxu1 %v7816_v59 }
 0x28d   : > { %v6049_v8 = vpop.f32.mrb[62].mxu1  ;;  %2594 = vmatprep.mubr.f32.mxu1 %v6048_v17  ;;  %v6217_v13 = vpop.f32.mrb[94].mxu0 }
 0x28e   : > { %v6050_v18 = vpop.f32.mrb[63].mxu1  ;;  %2595 = vmatmul.mubr.f32.gmra.mrb[108].mxu1 %v9534_v44  ;;  %v6218_v12 = vpop.f32.mrb[95].mxu0 }
 0x28f   : > { %v6051_v38 = vadd.f32 %v6050_v18, %v6049_v8  ;;  %7819 = vmatpush3.bf16.msra.mxu1 %v7816_v59  ;;  %v6219_v16 = vadd.f32 %v6218_v12, %v6217_v13 }
 0x290   : > { %7821 = vmatprep.subr.bf16.mxu1 %v7820_v6 }
 0x291   : > { %v6140_v25 = vpop.f32.mrb[64].mxu1  ;;  %2599 = vmatprep.mubr.f32.mxu1 %v6051_v38 }
 0x292   : > { %v6141_v29 = vpop.f32.mrb[65].mxu1  ;;  %2600 = vmatmul.mubr.f32.gmra.mrb[110].mxu1 %v9549_v0 }
 0x293   : > { %v6142_v26 = vadd.f32 %v6141_v29, %v6140_v25  ;;  %7823 = vmatpush3.bf16.msra.mxu1 %v7820_v6  ;;  %7017 = vmatprep.mubr.f32.mxu1 %v9675_v11 }
 0x295   : > { %v6143_v20 = vpop.f32.mrb[66].mxu1  ;;  %2669 = vmatprep.mubr.f32.mxu0 %v6142_v26 }
 0x296   : > { %v6144_v41 = vpop.f32.mrb[67].mxu1  ;;  %2670 = vmatmul.mubr.f32.vlgmr.msra.gmra.mrb[112].mxu0 %v9566_v40  ;;  %7018 = vmatmul.mubr.f32.vlgmr.msra.gmra.mrb[112].mxu1 %v9685_v15 }
 0x297   : > { %v6145_v44 = vadd.f32 %v6144_v41, %v6143_v20  ;;  %7020 = vmatprep.mubr.f32.mxu1 %v9694_v21 }
 0x299   : > { %v6146_v19 = vpop.f32.mrb[68].mxu1  ;;  %2674 = vmatprep.mubr.f32.mxu0 %v6145_v44 }
 0x29a   : > { %v6147_v10 = vpop.f32.mrb[69].mxu1  ;;  %2675 = vmatmul.mubr.f32.gmra.mrb[114].mxu0 %v9582_v24  ;;  %7021 = vmatmul.mubr.f32.gmra.mrb[114].mxu1 %v9703_v34 }
 0x29b   : > { %v6148_v0 = vadd.f32 %v6147_v10, %v6146_v19  ;;  %7023 = vmatprep.mubr.f32.mxu1 %v6210_v47 }
 0x29d   : > { %v6149_v11 = vpop.f32.mrb[70].mxu1  ;;  %2679 = vmatprep.mubr.f32.mxu0 %v6148_v0 }
 0x29e   : > { %v6150_v7 = vpop.f32.mrb[71].mxu1  ;;  %2680 = vmatmul.mubr.f32.gmra.mrb[116].mxu0 %v9597_v42  ;;  %7024 = vmatmul.mubr.f32.gmra.mrb[116].mxu1 %v6213_v63 }
 0x29f   : > { %v6151_v40 = vadd.f32 %v6150_v7, %v6149_v11  ;;  %7026 = vmatprep.mubr.f32.mxu1 %v6216_v45 }
 0x2a1   : > { %v6152_v15 = vpop.f32.mrb[72].mxu1  ;;  %2684 = vmatprep.mubr.f32.mxu0 %v6151_v40 }
 0x2a2   : > { %v6153_v21 = vpop.f32.mrb[73].mxu1  ;;  %2685 = vmatmul.mubr.f32.gmra.mrb[118].mxu0 %v9612_v60  ;;  %7027 = vmatmul.mubr.f32.gmra.mrb[118].mxu1 %v6219_v16 }
 0x2a3   : > { %v6154_v22 = vadd.f32 %v6153_v21, %v6152_v15 }
 0x2a5   : > { %v6155_v24 = vpop.f32.mrb[74].mxu1  ;;  %2689 = vmatprep.mubr.f32.mxu0 %v6154_v22 }
 0x2a6   : > { %v6156_v23 = vpop.f32.mrb[75].mxu1  ;;  %2690 = vmatmul.mubr.f32.gmra.mrb[120].mxu0 %v9627_v43 }
 0x2a7   : > { %v6157_v36 = vadd.f32 %v6156_v23, %v6155_v24 }
 0x2a9   : > { %v6158_v27 = vpop.f32.mrb[76].mxu1  ;;  %2694 = vmatprep.mubr.f32.mxu0 %v6157_v36 }
 0x2aa   : > { %v6159_v28 = vpop.f32.mrb[77].mxu1  ;;  %2695 = vmatmul.mubr.f32.gmra.mrb[122].mxu0 %v9642_v50  ;;  %v9743_v50 = vld [vmem:[%s10949_s6] sm:$0xff]  }
 0x2ab   : > { %v6160_v42 = vadd.f32 %v6159_v28, %v6158_v27  ;;  %v5646_v37 = vunpack.c.0.s8 %v9743_v50  ;;  %v5650_v57 = vunpack.c.2.s8 %v9743_v50 }
 0x2ad   : > { %v6161_v30 = vpop.f32.mrb[78].mxu1  ;;  %2699 = vmatprep.mubr.f32.mxu0 %v6160_v42  ;;  %v2827_v51 = vcvt.s32.f32 %v5646_v37  ;;  %v2916_v31 = vcvt.s32.f32 %v5650_v57 }
 0x2ae   : > { %v6162_v33 = vpop.f32.mrb[79].mxu1  ;;  %2700 = vmatmul.mubr.f32.gmra.mrb[124].mxu0 %v9657_v1 }
 0x2af   : > { %v6163_v60 = vadd.f32 %v6162_v33, %v6161_v30  ;;  %7064 = vmatprep.mubr.msk.f32.mxu1 %vm2829_vm1, %v2916_v31 }
 0x2b1   : > { %2704 = vmatprep.mubr.f32.mxu0 %v6163_v60 }
 0x2b2   : > { %2705 = vmatmul.mubr.f32.gmra.mrb[126].mxu0 %v9666_v55 }
 0x2b3   : > { %7045 = vmatprep.mubr.msk.f32.mxu0 %vm2829_vm1, %v2827_v51 }
 0x309   : > { %v6252_v32 = vpop.f32.mrb[80].mxu1 }
 0x30a   : > { %v6253_v34 = vpop.f32.mrb[81].mxu1 }
 0x30b   : > { %v6254_v56 = vadd.f32 %v6253_v34, %v6252_v32 }
 0x30d   : > { %v6255_v43 = vpop.f32.mrb[82].mxu1  ;;  %v2357_v45 = vadd.f32 %v6254_v56, %v5586_v3 }
 0x30e   : > { %v6256_v35 = vpop.f32.mrb[83].mxu1 }
 0x30f   : > { %v6257_v49 = vadd.f32 %v6256_v35, %v6255_v43 }
 0x311   : > { %v6258_v1 = vpop.f32.mrb[84].mxu1  ;;  %v2362_v12 = vadd.f32 %v6257_v49, %v5586_v3 }
 0x312   : > { %v6259_v39 = vpop.f32.mrb[85].mxu1 }
 0x313   : > { %v6260_v55 = vadd.f32 %v6259_v39, %v6258_v1 }
 0x315   : > { %v6261_v47 = vpop.f32.mrb[86].mxu1  ;;  %v2367_v26 = vadd.f32 %v6260_v55, %v5586_v3 }
 0x316   : > { %v6262_v61 = vpop.f32.mrb[87].mxu1 }
 0x317   : > { %v6263_v48 = vadd.f32 %v6262_v61, %v6261_v47 }
 0x319   : > { %v6264_v52 = vpop.f32.mrb[88].mxu1  ;;  %v2372_v10 = vadd.f32 %v6263_v48, %v5586_v3 }
 0x31a   : > { %v6265_v9 = vpop.f32.mrb[89].mxu1 }
 0x31b   : > { %v6266_v53 = vadd.f32 %v6265_v9, %v6264_v52 }
 0x31d   : > { %v6267_v46 = vpop.f32.mrb[90].mxu1  ;;  %v2377_v15 = vadd.f32 %v6266_v53, %v5586_v3 }
 0x31e   : > { %v6268_v5 = vpop.f32.mrb[91].mxu1 }
 0x31f   : > { %v6269_v58 = vadd.f32 %v6268_v5, %v6267_v46 }
 0x321   : > { %v6270_v63 = vpop.f32.mrb[92].mxu1  ;;  %v2382_v36 = vadd.f32 %v6269_v58, %v5586_v3 }
 0x322   : > { %v6271_v59 = vpop.f32.mrb[93].mxu1 }
 0x323   : > { %v6272_v54 = vadd.f32 %v6271_v59, %v6270_v63 }
 0x325   : > { %v6273_v62 = vpop.f32.mrb[94].mxu1  ;;  %v2387_v33 = vadd.f32 %v6272_v54, %v5586_v3 }
 0x326   : > { %v6274_v2 = vpop.f32.mrb[95].mxu1 }
 0x327   : > { %v6275_v4 = vadd.f32 %v6274_v2, %v6273_v62 }
 0x329   : > { %v6308_v14 = vpop.f32.mrb[96].mxu0  ;;  %v2392_v43 = vadd.f32 %v6275_v4, %v5586_v3 }
 0x32a   : > { %v6309_v17 = vpop.f32.mrb[97].mxu0 }
 0x32b   : > { %v6310_v6 = vadd.f32 %v6309_v17, %v6308_v14 }
 0x32d   : > { %v2462_v8 = vadd.f32 %v6310_v6, %v2357_v45  ;;  %v6311_v13 = vpop.f32.mrb[98].mxu0 }
 0x32e   : > { %v6312_v18 = vpop.f32.mrb[99].mxu0 }
 0x32f   : > { %v6313_v38 = vadd.f32 %v6312_v18, %v6311_v13 }
 0x331   : > { %v2467_v16 = vadd.f32 %v6313_v38, %v2362_v12  ;;  %v6314_v25 = vpop.f32.mrb[100].mxu0 }
 0x332   : > { %v6315_v29 = vpop.f32.mrb[101].mxu0 }
 0x333   : > { %v6316_v20 = vadd.f32 %v6315_v29, %v6314_v25 }
 0x335   : > { %v2472_v41 = vadd.f32 %v6316_v20, %v2367_v26  ;;  %v6317_v44 = vpop.f32.mrb[102].mxu0 }
 0x336   : > { %v6318_v19 = vpop.f32.mrb[103].mxu0 }
 0x337   : > { %v6319_v0 = vadd.f32 %v6318_v19, %v6317_v44 }
 0x339   : > { %v2477_v11 = vadd.f32 %v6319_v0, %v2372_v10  ;;  %v6320_v7 = vpop.f32.mrb[104].mxu0 }
 0x33a   : > { %v6321_v40 = vpop.f32.mrb[105].mxu0 }
 0x33b   : > { %v6322_v21 = vadd.f32 %v6321_v40, %v6320_v7 }
 0x33d   : > { %v2482_v22 = vadd.f32 %v6322_v21, %v2377_v15  ;;  %v6323_v24 = vpop.f32.mrb[106].mxu0 }
 0x33e   : > { %v6324_v23 = vpop.f32.mrb[107].mxu0 }
 0x33f   : > { %v6325_v27 = vadd.f32 %v6324_v23, %v6323_v24 }
 0x341   : > { %v2487_v28 = vadd.f32 %v6325_v27, %v2382_v36  ;;  %v6326_v42 = vpop.f32.mrb[108].mxu0 }
 0x342   : > { %v6327_v30 = vpop.f32.mrb[109].mxu0 }
 0x343   : > { %v6328_v60 = vadd.f32 %v6327_v30, %v6326_v42 }
 0x345   : > { %v2492_v32 = vadd.f32 %v6328_v60, %v2387_v33  ;;  %v6329_v34 = vpop.f32.mrb[110].mxu0 }
 0x346   : > { %v6330_v56 = vpop.f32.mrb[111].mxu0 }
 0x347   : > { %v6331_v35 = vadd.f32 %v6330_v56, %v6329_v34 }
 0x349   : > { %v2497_v49 = vadd.f32 %v6331_v35, %v2392_v43  ;;  %v6364_v37 = vpop.f32.mrb[96].mxu1 }
 0x34a   : > { %v6365_v57 = vpop.f32.mrb[97].mxu1 }
 0x34b   : > { %v6366_v1 = vadd.f32 %v6365_v57, %v6364_v37 }
 0x34d   : > { %v2567_v39 = vadd.f32 %v6366_v1, %v2462_v8  ;;  %v6367_v51 = vpop.f32.mrb[98].mxu1 }
 0x34e   : > { %v6368_v31 = vpop.f32.mrb[99].mxu1 }
 0x34f   : > { %v6369_v55 = vadd.f32 %v6368_v31, %v6367_v51 }
 0x351   : > { %v2572_v47 = vadd.f32 %v6369_v55, %v2467_v16  ;;  %v6370_v61 = vpop.f32.mrb[100].mxu1 }
 0x352   : > { %v6371_v48 = vpop.f32.mrb[101].mxu1 }
 0x353   : > { %v6372_v52 = vadd.f32 %v6371_v48, %v6370_v61 }
 0x355   : > { %v2577_v9 = vadd.f32 %v6372_v52, %v2472_v41  ;;  %v6373_v53 = vpop.f32.mrb[102].mxu1 }
 0x356   : > { %v6374_v46 = vpop.f32.mrb[103].mxu1 }
 0x357   : > { %v6375_v5 = vadd.f32 %v6374_v46, %v6373_v53 }
 0x359   : > { %v2582_v58 = vadd.f32 %v6375_v5, %v2477_v11  ;;  %v6376_v63 = vpop.f32.mrb[104].mxu1 }
 0x35a   : > { %v6377_v59 = vpop.f32.mrb[105].mxu1 }
 0x35b   : > { %v6378_v54 = vadd.f32 %v6377_v59, %v6376_v63 }
 0x35d   : > { %v2587_v62 = vadd.f32 %v6378_v54, %v2482_v22  ;;  %v6379_v2 = vpop.f32.mrb[106].mxu1 }
 0x35e   : > { %v6380_v4 = vpop.f32.mrb[107].mxu1 }
 0x35f   : > { %v6381_v3 = vadd.f32 %v6380_v4, %v6379_v2 }
 0x361   : > { %v2592_v14 = vadd.f32 %v6381_v3, %v2487_v28  ;;  %v6382_v17 = vpop.f32.mrb[108].mxu1 }
 0x362   : > { %v6383_v45 = vpop.f32.mrb[109].mxu1 }
 0x363   : > { %v6384_v6 = vadd.f32 %v6383_v45, %v6382_v17 }
 0x365   : > { %v9752_v8 = vadd.f32 %v6384_v6, %v2492_v32  ;;  %v6385_v13 = vpop.f32.mrb[110].mxu1 }
 0x366   : > { %v6386_v18 = vpop.f32.mrb[111].mxu1 }
 0x367   : > { %v6387_v12 = vadd.f32 %v6386_v18, %v6385_v13  ;;  %v5651_v18 = vunpack.c.3.s8 %v9743_v50 }
 0x369   : > { %v9754_v38 = vadd.f32 %v6387_v12, %v2497_v49  ;;  %v6420_v16 = vpop.f32.mrb[112].mxu0  ;;  %v7019_v25 = vpop.f32.mrb[112].mxu1  ;;  %v8332_v12 = vld [vmem:[%s10949_s6 + $0x8] sm:$0xff]  }
 0x36a   : > { %v6421_v29 = vpop.f32.mrb[113].mxu0  ;;  %v2776_v26 = vpop.f32.mrb[113].mxu1 }
 0x36b   : > { %v6422_v20 = vadd.f32 %v6421_v29, %v6420_v16  ;;  %v5654_v16 = vunpack.c.0.s8 %v8332_v12 }
 0x36d   : > { %v6423_v41 = vpop.f32.mrb[114].mxu0  ;;  %v2672_v44 = vadd.f32 %v6422_v20, %v2567_v39  ;;  %v7022_v19 = vpop.f32.mrb[114].mxu1 }
 0x36e   : > { %v6424_v10 = vpop.f32.mrb[115].mxu0  ;;  %v2786_v0 = vpop.f32.mrb[115].mxu1 }
 0x36f   : > { %v6425_v11 = vadd.f32 %v6424_v10, %v6423_v41  ;;  %v2777_v7 = vadd.f32 %v2776_v26, %v2672_v44  ;;  %v2917_v26 = vcvt.s32.f32 %v5651_v18  ;;  %v5655_v41 = vunpack.c.1.s8 %v8332_v12 }
 0x370   : > { %v5659_v44 = vunpack.c.3.s8 %v8332_v12 }
 0x371   : > { %v2677_v40 = vadd.f32 %v6425_v11, %v2572_v47  ;;  %v6426_v15 = vpop.f32.mrb[116].mxu0  ;;  %v7025_v21 = vpop.f32.mrb[116].mxu1  ;;  %v2815_v27 = vmax.f32 %v2777_v7, 0.0  ;;  %v3005_v11 = vcvt.s32.f32 %v5655_v41  ;;  %v3641_v41 = vld [vmem:[%s10950_s7 + $0xd0] sm:$0xff] }
 0x372   : > { %v6427_v22 = vpop.f32.mrb[117].mxu0  ;;  %v2796_v24 = vpop.f32.mrb[117].mxu1  ;;  %v3093_v7 = vcvt.s32.f32 %v5659_v44  ;;  %v3642_v44 = vld [vmem:[%s10950_s7 + $0xd8] sm:$0xff] }
 0x373   : > { %v2782_v23 = vadd.f32 %v7019_v25, %v2677_v40  ;;  %v6428_v36 = vadd.f32 %v6427_v22, %v6426_v15  ;;  %v5658_v25 = vunpack.c.2.s8 %v8332_v12  ;;  %v3623_v12 = vld [vmem:[%s10950_s7 + $0x40] sm:$0xff] }
 0x375   : > { %v2816_v28 = vmax.f32 %v2782_v23, 0.0  ;;  %v6429_v42 = vpop.f32.mrb[118].mxu0  ;;  %v2682_v30 = vadd.f32 %v6428_v36, %v2577_v9  ;;  %v7028_v33 = vpop.f32.mrb[118].mxu1  ;;  %v3092_v20 = vcvt.s32.f32 %v5658_v25  ;;  %v3648_v25 = vld [vmem:[%s10950_s7 + $0x108] sm:$0xff] }
 0x376   : > { %v6430_v60 = vpop.f32.mrb[119].mxu0  ;;  %v2806_v32 = vpop.f32.mrb[119].mxu1 }
 0x377   : > { %v9756_v34 = vpack.c.bf16 %v2816_v28, %v2815_v27  ;;  %v6431_v56 = vadd.f32 %v6430_v60, %v6429_v42  ;;  %v2787_v43 = vadd.f32 %v2786_v0, %v2682_v30  ;;  %v3631_v60 = vld [vmem:[%s10950_s7 + $0x80] sm:$0xff] }
 0x379   : > { %v2687_v35 = vadd.f32 %v6431_v56, %v2582_v58  ;;  %v6432_v49 = vpop.f32.mrb[120].mxu0  ;;  %7825 = vmatprep.subr.bf16.mxu0 %v9756_v34  ;;  %7841 = vmatprep.subr.bf16.mxu1 %v9756_v34  ;;  %v2817_v39 = vmax.f32 %v2787_v43, 0.0 }
 0x37a   : > { %v6433_v37 = vpop.f32.mrb[121].mxu0  ;;  %7827 = vmatpush3.bf16.msra.mxu0 %v9756_v34  ;;  %7843 = vmatpush3.bf16.msra.mxu1 %v9756_v34 }
 0x37b   : > { %v2792_v57 = vadd.f32 %v7022_v19, %v2687_v35  ;;  %v6434_v1 = vadd.f32 %v6433_v37, %v6432_v49  ;;  %v8334_v19 = vld [vmem:[%s10949_s6 + $0x10] sm:$0xff]   ;;  %v3615_v37 = vld [vmem:[%s10950_s7] sm:$0xff] }
 0x37c   : > { %v5662_v10 = vunpack.c.0.s8 %v8334_v19  ;;  %v5666_v0 = vunpack.c.2.s8 %v8334_v19  ;;  %v5667_v22 = vunpack.c.3.s8 %v8334_v19 }
 0x37d   : > { %v2818_v51 = vmax.f32 %v2792_v57, 0.0  ;;  %v6435_v31 = vpop.f32.mrb[122].mxu0  ;;  %v2692_v55 = vadd.f32 %v6434_v1, %v2587_v62  ;;  %v3616_v57 = vld [vmem:[%s10950_s7 + $0x8] sm:$0xff] }
 0x37e   : > { %v6436_v47 = vpop.f32.mrb[123].mxu0  ;;  %v3180_v40 = vcvt.s32.f32 %v5662_v10  ;;  %v3268_v15 = vcvt.s32.f32 %v5666_v0  ;;  %v3269_v28 = vcvt.s32.f32 %v5667_v22  ;;  %v3668_v22 = vld [vmem:[%s10950_s7 + $0x1a8] sm:$0xff] }
 0x37f   : > { %v9762_v61 = vpack.c.bf16 %v2818_v51, %v2817_v39  ;;  %v6437_v48 = vadd.f32 %v6436_v47, %v6435_v31  ;;  %v2797_v52 = vadd.f32 %v2796_v24, %v2692_v55  ;;  %v8336_v24 = vld [vmem:[%s10949_s6 + $0x18] sm:$0xff]   ;;  %v3633_v51 = vld [vmem:[%s10950_s7 + $0x90] sm:$0xff]  ;;  %v7970_v47 = vpack.c.bf16 %v3616_v57, %v3615_v37 }
 0x380   : > { %v5670_v23 = vunpack.c.0.s8 %v8336_v24  ;;  %v5674_v36 = vunpack.c.2.s8 %v8336_v24  ;;  %v5671_v56 = vunpack.c.1.s8 %v8336_v24  ;;  %v5675_v43 = vunpack.c.3.s8 %v8336_v24  ;;  %v3634_v31 = vld [vmem:[%s10950_s7 + $0x98] sm:$0xff]  ;;  %v3643_v24 = vld [vmem:[%s10950_s7 + $0xe0] sm:$0xff] }
 0x381   : > { %v2697_v9 = vadd.f32 %v6437_v48, %v2592_v14  ;;  %v6438_v53 = vpop.f32.mrb[124].mxu0  ;;  %7829 = vmatprep.subr.bf16.mxu0 %v9762_v61  ;;  %7845 = vmatprep.subr.bf16.mxu1 %v9762_v61  ;;  %v2819_v63 = vmax.f32 %v2797_v52, 0.0  ;;  %v7972_v48 = vpack.c.bf16 %v3634_v31, %v3633_v51  ;;  %v3617_v52 = vld [vmem:[%s10950_s7 + $0x10] sm:$0xff]  ;;  %v3630_v31 = vld [vmem:[%s10950_s7 + $0x78] sm:$0xff] }
 0x382   : > { %v6439_v46 = vpop.f32.mrb[125].mxu0  ;;  %7831 = vmatpush3.bf16.msra.mxu0 %v9762_v61  ;;  %7847 = vmatpush3.bf16.msra.mxu1 %v9762_v61  ;;  %v3356_v42 = vcvt.s32.f32 %v5670_v23  ;;  %v3444_v30 = vcvt.s32.f32 %v5674_v36  ;;  %v3357_v1 = vcvt.s32.f32 %v5671_v56  ;;  %v3445_v39 = vcvt.s32.f32 %v5675_v43  ;;  %v3644_v23 = vld [vmem:[%s10950_s7 + $0xe8] sm:$0xff]  ;;  %v3669_v56 = vld [vmem:[%s10950_s7 + $0x1b0] sm:$0xff]  ;;  %v3670_v43 = vld [vmem:[%s10950_s7 + $0x1b8] sm:$0xff] }
 0x383   : > { %v2802_v5 = vadd.f32 %v7025_v21, %v2697_v9  ;;  %v6440_v58 = vadd.f32 %v6439_v46, %v6438_v53  ;;  %v5663_v21 = vunpack.c.1.s8 %v8334_v19  ;;  %v3618_v9 = vld [vmem:[%s10950_s7 + $0x18] sm:$0xff]  ;;  %v3635_v53 = vld [vmem:[%s10950_s7 + $0xa0] sm:$0xff]  ;;  %v3636_v46 = vld [vmem:[%s10950_s7 + $0xa8] sm:$0xff] }
 0x384   : > { %v3629_v51 = vld [vmem:[%s10950_s7 + $0x70] sm:$0xff] }
 0x385   : > { %v2820_v59 = vmax.f32 %v2802_v5, 0.0  ;;  %v6441_v54 = vpop.f32.mrb[126].mxu0  ;;  %v2702_v62 = vadd.f32 %v6440_v58, %v9752_v8  ;;  %v5647_v8 = vunpack.c.1.s8 %v9743_v50  ;;  %v3004_v50 = vcvt.s32.f32 %v5654_v16  ;;  %v3647_v16 = vld [vmem:[%s10950_s7 + $0x100] sm:$0xff] }
 0x386   : > { %v6442_v2 = vpop.f32.mrb[127].mxu0  ;;  %v3181_v27 = vcvt.s32.f32 %v5663_v21  ;;  %v7974_v5 = vpack.c.bf16 %v3618_v9, %v3617_v52  ;;  %v7976_v58 = vpack.c.bf16 %v3636_v46, %v3635_v53  ;;  %v8002_v19 = vpack.c.bf16 %v3648_v25, %v3647_v16  ;;  %v3667_v21 = vld [vmem:[%s10950_s7 + $0x1a0] sm:$0xff]  ;;  %v3672_v53 = vld [vmem:[%s10950_s7 + $0x1c8] sm:$0xff]  ;;  %v3677_v16 = vld [vmem:[%s10950_s7 + $0x1f0] sm:$0xff] }
 0x387   : > { %v9769_v4 = vpack.c.bf16 %v2820_v59, %v2819_v63  ;;  %v6443_v3 = vadd.f32 %v6442_v2, %v6441_v54  ;;  %v2807_v14 = vadd.f32 %v2806_v32, %v2702_v62  ;;  %v2828_v29 = vcvt.s32.f32 %v5647_v8  ;;  %v3632_v32 = vld [vmem:[%s10950_s7 + $0x88] sm:$0xff]  ;;  %v3619_v63 = vld [vmem:[%s10950_s7 + $0x20] sm:$0xff]  ;;  %v3638_v54 = vld [vmem:[%s10950_s7 + $0xb8] sm:$0xff] }
 0x388   : > { %v7968_v49 = vpack.c.bf16 %v3632_v32, %v3631_v60  ;;  %v3620_v59 = vld [vmem:[%s10950_s7 + $0x28] sm:$0xff]  ;;  %v3621_v2 = vld [vmem:[%s10950_s7 + $0x30] sm:$0xff]  ;;  %v7992_v60 = vpack.c.bf16 %v3644_v23, %v3643_v24  ;;  %v3671_v9 = vld [vmem:[%s10950_s7 + $0x1c0] sm:$0xff] }
 0x389   : > { %v2707_v17 = vadd.f32 %v6443_v3, %v9754_v38  ;;  %7833 = vmatprep.subr.bf16.mxu0 %v9769_v4  ;;  %7849 = vmatprep.subr.bf16.mxu1 %v9769_v4  ;;  %v2821_v6 = vmax.f32 %v2807_v14, 0.0  ;;  %v7978_v62 = vpack.c.bf16 %v3620_v59, %v3619_v63  ;;  %v3622_v14 = vld [vmem:[%s10950_s7 + $0x38] sm:$0xff]  ;;  %v3628_v32 = vld [vmem:[%s10950_s7 + $0x68] sm:$0xff]  ;;  %v3695_v46 = vld [vmem:[%s10950_s7 + $0x280] sm:$0xff] }
 0x38a   : > { %7835 = vmatpush3.bf16.msra.mxu0 %v9769_v4  ;;  %7851 = vmatpush3.bf16.msra.mxu1 %v9769_v4  ;;  %v7982_v8 = vpack.c.bf16 %v3622_v14, %v3621_v2  ;;  %v3655_v63 = vld [vmem:[%s10950_s7 + $0x140] sm:$0xff]  ;;  %v3656_v59 = vld [vmem:[%s10950_s7 + $0x148] sm:$0xff]  ;;  %v3674_v2 = vld [vmem:[%s10950_s7 + $0x1d8] sm:$0xff] }
 0x38b   : > { %v2812_v45 = vadd.f32 %v7028_v33, %v2707_v17  ;;  %v9850_v33 = vld [vmem:[%s10949_s6 + $0x20] sm:$0xf]   ;;  %v3657_v14 = vld [vmem:[%s10950_s7 + $0x150] sm:$0xff]  ;;  %v3678_v25 = vld [vmem:[%s10950_s7 + $0x1f8] sm:$0xff] }
 0x38c   : > { %v5678_v35 = vunpack.c.0.s8 %v9850_v33  ;;  %v3663_v17 = vld [vmem:[%s10950_s7 + $0x180] sm:$0xff]  ;;  %v3681_v24 = vld [vmem:[%s10950_s7 + $0x210] sm:$0xff]  ;;  %v3682_v23 = vld [vmem:[%s10950_s7 + $0x218] sm:$0xff] }
 0x38d   : > { %v2822_v13 = vmax.f32 %v2812_v45, 0.0  ;;  %v5679_v45 = vunpack.c.1.s8 %v9850_v33  ;;  %v3652_v33 = vld [vmem:[%s10950_s7 + $0x128] sm:$0xff] }
 0x38e   : > { %v3532_v55 = vcvt.s32.f32 %v5678_v35  ;;  %v3645_v35 = vld [vmem:[%s10950_s7 + $0xf0] sm:$0xff] }
 0x38f   : > { %v9781_v38 = vpack.c.bf16 %v2822_v13, %v2821_v6  ;;  %v3639_v6 = vld [vmem:[%s10950_s7 + $0xc0] sm:$0xff]  ;;  %v3640_v13 = vld [vmem:[%s10950_s7 + $0xc8] sm:$0xff] }
 0x391   : > { %7837 = vmatprep.subr.bf16.mxu0 %v9781_v38  ;;  %7853 = vmatprep.subr.bf16.mxu1 %v9781_v38 }
 0x392   : > { %7839 = vmatpush3.bf16.msra.mxu0 %v9781_v38  ;;  %7855 = vmatpush3.bf16.msra.mxu1 %v9781_v38 }
 0x393   : > { %7857 = vmatprep.subr.bf16.mxu0 %v9756_v34  ;;  %7873 = vmatprep.subr.bf16.mxu1 %v9756_v34 }
 0x395   : > { %7046 = vmatmul.mubr.msk.f32.vlgmr.msra.gmra.mrb[128].mxu0 %vm2829_vm1, %v2828_v29  ;;  %7065 = vmatmul.mubr.msk.f32.vlgmr.msra.gmra.mrb[120].mxu1 %vm2829_vm1, %v2917_v26  ;;  %v7984_v29 = vpack.c.bf16 %v3640_v13, %v3639_v6  ;;  %v3665_v26 = vld [vmem:[%s10950_s7 + $0x190] sm:$0xff]  ;;  %v3676_v6 = vld [vmem:[%s10950_s7 + $0x1e8] sm:$0xff] }
 0x396   : > { %7859 = vmatpush3.bf16.msra.mxu0 %v9756_v34  ;;  %7875 = vmatpush3.bf16.msra.mxu1 %v9756_v34 }
 0x397   : > { %7861 = vmatprep.subr.bf16.mxu0 %v9762_v61  ;;  %7877 = vmatprep.subr.bf16.mxu1 %v9762_v61 }
 0x398   : > { %7083 = vmatprep.mubr.msk.f32.mxu0 %vm2829_vm1, %v3004_v50  ;;  %7102 = vmatprep.mubr.msk.f32.mxu1 %vm2829_vm1, %v3092_v20  ;;  %v3666_v50 = vld [vmem:[%s10950_s7 + $0x198] sm:$0xff]  ;;  %v3533_v20 = vcvt.s32.f32 %v5679_v45  ;;  %v3675_v45 = vld [vmem:[%s10950_s7 + $0x1e0] sm:$0xff] }
 0x399   : > { %v8004_v0 = vpack.c.bf16 %v3666_v50, %v3665_v26  ;;  %v8024_v13 = vpack.c.bf16 %v3676_v6, %v3675_v45  ;;  %v3662_v26 = vld [vmem:[%s10950_s7 + $0x178] sm:$0xff]  ;;  %v3708_v45 = vld [vmem:[%s10950_s7 + $0x2e8] sm:$0xff]  ;;  %v3731_v6 = vld [vmem:[%s10950_s7 + $0x3a0] sm:$0xff] }
 0x39a   : > { %7863 = vmatpush3.bf16.msra.mxu0 %v9762_v61  ;;  %7879 = vmatpush3.bf16.msra.mxu1 %v9762_v61 }
 0x39b   : > { %7865 = vmatprep.subr.bf16.mxu0 %v9769_v4  ;;  %7881 = vmatprep.subr.bf16.mxu1 %v9769_v4 }
 0x39e   : > { %7867 = vmatpush3.bf16.msra.mxu0 %v9769_v4  ;;  %7883 = vmatpush3.bf16.msra.mxu1 %v9769_v4 }
 0x39f   : > { %7869 = vmatprep.subr.bf16.mxu0 %v9781_v38  ;;  %7885 = vmatprep.subr.bf16.mxu1 %v9781_v38 }
 0x3a2   : > { %7871 = vmatpush3.bf16.msra.mxu0 %v9781_v38  ;;  %7887 = vmatpush3.bf16.msra.mxu1 %v9781_v38 }
 0x3a3   : > { %7889 = vmatprep.subr.bf16.mxu0 %v9756_v34  ;;  %7905 = vmatprep.subr.bf16.mxu1 %v9756_v34 }
 0x3a5   : > { %7084 = vmatmul.mubr.msk.f32.vlgmr.msra.gmra.mrb[130].mxu0 %vm2829_vm1, %v3005_v11  ;;  %7103 = vmatmul.mubr.msk.f32.vlgmr.msra.gmra.mrb[122].mxu1 %vm2829_vm1, %v3093_v7  ;;  %v3625_v11 = vld [vmem:[%s10950_s7 + $0x50] sm:$0xff] }
 0x3a6   : > { %7891 = vmatpush3.bf16.msra.mxu0 %v9756_v34  ;;  %7907 = vmatpush3.bf16.msra.mxu1 %v9756_v34  ;;  %v3649_v7 = vld [vmem:[%s10950_s7 + $0x110] sm:$0xff] }
 0x3a7   : > { %7893 = vmatprep.subr.bf16.mxu0 %v9762_v61  ;;  %7909 = vmatprep.subr.bf16.mxu1 %v9762_v61 }
 0x3a8   : > { %7121 = vmatprep.mubr.msk.f32.mxu0 %vm2829_vm1, %v3180_v40  ;;  %7140 = vmatprep.mubr.msk.f32.mxu1 %vm2829_vm1, %v3268_v15  ;;  %v3650_v40 = vld [vmem:[%s10950_s7 + $0x118] sm:$0xff]  ;;  %v7988_v15 = vpack.c.bf16 %v3642_v44, %v3641_v41  ;;  %v3728_v41 = vld [vmem:[%s10950_s7 + $0x388] sm:$0xff] }
 0x3a9   : > { %v8006_v36 = vpack.c.bf16 %v3650_v40, %v3649_v7 }
 0x3aa   : > { %7895 = vmatpush3.bf16.msra.mxu0 %v9762_v61  ;;  %7911 = vmatpush3.bf16.msra.mxu1 %v9762_v61 }
 0x3ab   : > { %7897 = vmatprep.subr.bf16.mxu0 %v9769_v4  ;;  %7913 = vmatprep.subr.bf16.mxu1 %v9769_v4 }
 0x3ae   : > { %7899 = vmatpush3.bf16.msra.mxu0 %v9769_v4  ;;  %7915 = vmatpush3.bf16.msra.mxu1 %v9769_v4 }
 0x3af   : > { %7901 = vmatprep.subr.bf16.mxu0 %v9781_v38  ;;  %7917 = vmatprep.subr.bf16.mxu1 %v9781_v38 }
 0x3b2   : > { %7903 = vmatpush3.bf16.msra.mxu0 %v9781_v38  ;;  %7919 = vmatpush3.bf16.msra.mxu1 %v9781_v38 }
 0x3b3   : > { %7921 = vmatprep.subr.bf16.mxu0 %v9756_v34  ;;  %7937 = vmatprep.subr.bf16.mxu1 %v9756_v34 }
 0x3b5   : > { %7122 = vmatmul.mubr.msk.f32.vlgmr.msra.gmra.mrb[132].mxu0 %vm2829_vm1, %v3181_v27  ;;  %7141 = vmatmul.mubr.msk.f32.vlgmr.msra.gmra.mrb[124].mxu1 %vm2829_vm1, %v3269_v28  ;;  %v8008_v28 = vpack.c.bf16 %v3668_v22, %v3667_v21 }
 0x3b6   : > { %7923 = vmatpush3.bf16.msra.mxu0 %v9756_v34  ;;  %7939 = vmatpush3.bf16.msra.mxu1 %v9756_v34 }
 0x3b7   : > { %7925 = vmatprep.subr.bf16.mxu0 %v9762_v61  ;;  %7941 = vmatprep.subr.bf16.mxu1 %v9762_v61 }
 0x3b8   : > { %7159 = vmatprep.mubr.msk.f32.mxu0 %vm2829_vm1, %v3356_v42  ;;  %7178 = vmatprep.mubr.msk.f32.mxu1 %vm2829_vm1, %v3444_v30  ;;  %v3627_v42 = vld [vmem:[%s10950_s7 + $0x60] sm:$0xff] }
 0x3b9   : > { %v3651_v30 = vld [vmem:[%s10950_s7 + $0x120] sm:$0xff]  ;;  %v7994_v57 = vpack.c.bf16 %v3628_v32, %v3627_v42  ;;  %v3702_v32 = vld [vmem:[%s10950_s7 + $0x2b8] sm:$0xff] }
 0x3ba   : > { %7927 = vmatpush3.bf16.msra.mxu0 %v9762_v61  ;;  %7943 = vmatpush3.bf16.msra.mxu1 %v9762_v61  ;;  %v8010_v37 = vpack.c.bf16 %v3652_v33, %v3651_v30  ;;  %v3683_v30 = vld [vmem:[%s10950_s7 + $0x220] sm:$0xff]  ;;  %v3684_v33 = vld [vmem:[%s10950_s7 + $0x228] sm:$0xff] }
 0x3bb   : > { %7929 = vmatprep.subr.bf16.mxu0 %v9769_v4  ;;  %7945 = vmatprep.subr.bf16.mxu1 %v9769_v4 }
 0x3be   : > { %7931 = vmatpush3.bf16.msra.mxu0 %v9769_v4  ;;  %7947 = vmatpush3.bf16.msra.mxu1 %v9769_v4 }
 0x3bf   : > { %7933 = vmatprep.subr.bf16.mxu0 %v9781_v38  ;;  %7949 = vmatprep.subr.bf16.mxu1 %v9781_v38 }
 0x3c2   : > { %7935 = vmatpush3.bf16.msra.mxu0 %v9781_v38  ;;  %7951 = vmatpush3.bf16.msra.mxu1 %v9781_v38 }
 0x3c3   : > { %7953 = vmatprep.subr.bf16.mxu0 %v9756_v34  ;;  %7969 = vmatprep.subr.bf16.mxu1 %v7968_v49  ;;  %v3646_v49 = vld [vmem:[%s10950_s7 + $0xf8] sm:$0xff] }
 0x3c5   : > { %7160 = vmatmul.mubr.msk.f32.vlgmr.msra.gmra.mrb[134].mxu0 %vm2829_vm1, %v3357_v1  ;;  %7179 = vmatmul.mubr.msk.f32.vlgmr.msra.gmra.mrb[126].mxu1 %vm2829_vm1, %v3445_v39  ;;  %v8012_v1 = vpack.c.bf16 %v3670_v43, %v3669_v56  ;;  %v7996_v39 = vpack.c.bf16 %v3646_v49, %v3645_v35  ;;  %v8042_v56 = vpack.c.bf16 %v3684_v33, %v3683_v30  ;;  %v3685_v35 = vld [vmem:[%s10950_s7 + $0x230] sm:$0xff]  ;;  %v3686_v49 = vld [vmem:[%s10950_s7 + $0x238] sm:$0xff]  ;;  %v3720_v33 = vld [vmem:[%s10950_s7 + $0x348] sm:$0xff] }
 0x3c6   : > { %7955 = vmatpush3.bf16.msra.mxu0 %v9756_v34  ;;  %7197 = vmatprep.mubr.msk.f32.mxu0 %vm2829_vm1, %v3532_v55  ;;  %v3637_v34 = vld [vmem:[%s10950_s7 + $0xb0] sm:$0xff] }
 0x3c7   : > { %7957 = vmatprep.subr.bf16.mxu0 %v9762_v61  ;;  %7971 = vmatpush3.bf16.msra.mxu1 %v7970_v47  ;;  %v7980_v3 = vpack.c.bf16 %v3638_v54, %v3637_v34  ;;  %v3653_v55 = vld [vmem:[%s10950_s7 + $0x130] sm:$0xff]  ;;  %v7998_v47 = vpack.c.bf16 %v3630_v31, %v3629_v51  ;;  %v8018_v54 = vpack.c.bf16 %v3656_v59, %v3655_v63  ;;  %v3687_v51 = vld [vmem:[%s10950_s7 + $0x240] sm:$0xff]  ;;  %v3688_v31 = vld [vmem:[%s10950_s7 + $0x248] sm:$0xff] }
 0x3c8   : > { %7973 = vmatprep.subr.bf16.mxu1 %v7972_v48  ;;  %v3654_v48 = vld [vmem:[%s10950_s7 + $0x138] sm:$0xff] }
 0x3c9   : > { %v8014_v52 = vpack.c.bf16 %v3654_v48, %v3653_v55  ;;  %v3711_v55 = vld [vmem:[%s10950_s7 + $0x300] sm:$0xff]  ;;  %v3705_v48 = vld [vmem:[%s10950_s7 + $0x2d0] sm:$0xff] }
 0x3ca   : > { %7959 = vmatpush3.bf16.msra.mxu0 %v9762_v61  ;;  %v3664_v61 = vld [vmem:[%s10950_s7 + $0x188] sm:$0xff] }
 0x3cb   : > { %7961 = vmatprep.subr.bf16.mxu0 %v9769_v4  ;;  %7975 = vmatpush3.bf16.msra.mxu1 %v7974_v5  ;;  %v8000_v18 = vpack.c.bf16 %v3664_v61, %v3663_v17  ;;  %v8016_v5 = vpack.c.bf16 %v3672_v53, %v3671_v9  ;;  %v3658_v17 = vld [vmem:[%s10950_s7 + $0x158] sm:$0xff]  ;;  %v3729_v9 = vld [vmem:[%s10950_s7 + $0x390] sm:$0xff] }
 0x3cc   : > { %7977 = vmatprep.subr.bf16.mxu1 %v7976_v58  ;;  %v3696_v58 = vld [vmem:[%s10950_s7 + $0x288] sm:$0xff]  ;;  %v8022_v61 = vpack.c.bf16 %v3658_v17, %v3657_v14  ;;  %v3730_v53 = vld [vmem:[%s10950_s7 + $0x398] sm:$0xff] }
 0x3cd   : > { %v8032_v34 = vpack.c.bf16 %v3696_v58, %v3695_v46  ;;  %v8050_v58 = vpack.c.bf16 %v3688_v31, %v3687_v51  ;;  %v8068_v14 = vpack.c.bf16 %v3730_v53, %v3729_v9  ;;  %v3714_v17 = vld [vmem:[%s10950_s7 + $0x318] sm:$0xff]  ;;  %v3721_v51 = vld [vmem:[%s10950_s7 + $0x350] sm:$0xff]  ;;  %v3740_v9 = vld [vmem:[%s10950_s7 + $0x3e8] sm:$0xff] }
 0x3ce   : > { %7963 = vmatpush3.bf16.msra.mxu0 %v9769_v4  ;;  %v3624_v4 = vld [vmem:[%s10950_s7 + $0x48] sm:$0xff] }
 0x3cf   : > { %7965 = vmatprep.subr.bf16.mxu0 %v9781_v38  ;;  %7979 = vmatpush3.bf16.msra.mxu1 %v7978_v62  ;;  %v7986_v10 = vpack.c.bf16 %v3624_v4, %v3623_v12  ;;  %v3673_v62 = vld [vmem:[%s10950_s7 + $0x1d0] sm:$0xff] }
 0x3d0   : > { %7981 = vmatprep.subr.bf16.mxu1 %v7980_v3  ;;  %v8020_v3 = vpack.c.bf16 %v3674_v2, %v3673_v62  ;;  %v3661_v4 = vld [vmem:[%s10950_s7 + $0x170] sm:$0xff]  ;;  %v3690_v2 = vld [vmem:[%s10950_s7 + $0x258] sm:$0xff] }
 0x3d1   : > { %v8030_v50 = vpack.c.bf16 %v3662_v26, %v3661_v4  ;;  %v3689_v62 = vld [vmem:[%s10950_s7 + $0x250] sm:$0xff]  ;;  %v3716_v26 = vld [vmem:[%s10950_s7 + $0x328] sm:$0xff] }
 0x3d2   : > { %7967 = vmatpush3.bf16.msra.mxu0 %v9781_v38  ;;  %v3626_v38 = vld [vmem:[%s10950_s7 + $0x58] sm:$0xff] }
 0x3d3   : > { %7983 = vmatpush3.bf16.msra.mxu1 %v7982_v8  ;;  %8001 = vmatprep.subr.bf16.mxu0 %v8000_v18  ;;  %v7990_v27 = vpack.c.bf16 %v3626_v38, %v3625_v11  ;;  %v3659_v8 = vld [vmem:[%s10950_s7 + $0x160] sm:$0xff]  ;;  %v3660_v18 = vld [vmem:[%s10950_s7 + $0x168] sm:$0xff]  ;;  %v3698_v11 = vld [vmem:[%s10950_s7 + $0x298] sm:$0xff] }
 0x3d4   : > { %7985 = vmatprep.subr.bf16.mxu1 %v7984_v29  ;;  %v8026_v12 = vpack.c.bf16 %v3660_v18, %v3659_v8  ;;  %v8028_v29 = vpack.c.bf16 %v3678_v25, %v3677_v16  ;;  %v8054_v8 = vpack.c.bf16 %v3690_v2, %v3689_v62  ;;  %v3691_v16 = vld [vmem:[%s10950_s7 + $0x260] sm:$0xff]  ;;  %v3692_v25 = vld [vmem:[%s10950_s7 + $0x268] sm:$0xff]  ;;  %v3742_v62 = vld [vmem:[%s10950_s7 + $0x3f8] sm:$0xff] }
 0x3d5   : > { %7198 = vmatmul.mubr.msk.f32.vlgmr.msra.gmra.mrb[136].mxu0 %vm2829_vm1, %v3533_v20  ;;  %v3727_v20 = vld [vmem:[%s10950_s7 + $0x380] sm:$0xff] }
 0x3d6   : > { %8003 = vmatpush3.bf16.msra.mxu0 %v8002_v19  ;;  %v8064_v44 = vpack.c.bf16 %v3728_v41, %v3727_v20  ;;  %v3679_v19 = vld [vmem:[%s10950_s7 + $0x200] sm:$0xff]  ;;  %v3710_v20 = vld [vmem:[%s10950_s7 + $0x2f8] sm:$0xff]  ;;  %v3733_v41 = vld [vmem:[%s10950_s7 + $0x3b0] sm:$0xff] }
 0x3d7   : > { %7987 = vmatpush3.bf16.msra.mxu1 %v7986_v10  ;;  %8005 = vmatprep.subr.bf16.mxu0 %v8004_v0  ;;  %v3680_v10 = vld [vmem:[%s10950_s7 + $0x208] sm:$0xff]  ;;  %v3697_v0 = vld [vmem:[%s10950_s7 + $0x290] sm:$0xff] }
 0x3d8   : > { %7989 = vmatprep.subr.bf16.mxu1 %v7988_v15  ;;  %v8034_v15 = vpack.c.bf16 %v3680_v10, %v3679_v19  ;;  %v8036_v22 = vpack.c.bf16 %v3698_v11, %v3697_v0  ;;  %v8058_v19 = vpack.c.bf16 %v3692_v25, %v3691_v16  ;;  %v3693_v11 = vld [vmem:[%s10950_s7 + $0x270] sm:$0xff] }
 0x3da   : > { %8007 = vmatpush3.bf16.msra.mxu0 %v8006_v36  ;;  %v3699_v36 = vld [vmem:[%s10950_s7 + $0x2a0] sm:$0xff] }
 0x3db   : > { %7991 = vmatpush3.bf16.msra.mxu1 %v7990_v27  ;;  %8009 = vmatprep.subr.bf16.mxu0 %v8008_v28  ;;  %v3700_v27 = vld [vmem:[%s10950_s7 + $0x2a8] sm:$0xff]  ;;  %v8038_v28 = vpack.c.bf16 %v3682_v23, %v3681_v24  ;;  %v3735_v24 = vld [vmem:[%s10950_s7 + $0x3c0] sm:$0xff] }
 0x3dc   : > { %7993 = vmatprep.subr.bf16.mxu1 %v7992_v60  ;;  %v8040_v42 = vpack.c.bf16 %v3700_v27, %v3699_v36  ;;  %v3701_v60 = vld [vmem:[%s10950_s7 + $0x2b0] sm:$0xff]  ;;  %v3736_v23 = vld [vmem:[%s10950_s7 + $0x3c8] sm:$0xff] }
 0x3dd   : > { %v8044_v43 = vpack.c.bf16 %v3702_v32, %v3701_v60  ;;  %v8080_v30 = vpack.c.bf16 %v3736_v23, %v3735_v24  ;;  %v3745_v60 = vld [vmem:[%s10950_s7 + $0x410] sm:$0xff]  ;;  %v3746_v32 = vld [vmem:[%s10950_s7 + $0x418] sm:$0xff] }
 0x3de   : > { %8011 = vmatpush3.bf16.msra.mxu0 %v8010_v37  ;;  %v3703_v37 = vld [vmem:[%s10950_s7 + $0x2c0] sm:$0xff] }
 0x3df   : > { %7995 = vmatpush3.bf16.msra.mxu1 %v7994_v57  ;;  %8013 = vmatprep.subr.bf16.mxu0 %v8012_v1  ;;  %v3704_v57 = vld [vmem:[%s10950_s7 + $0x2c8] sm:$0xff]  ;;  %v8046_v1 = vpack.c.bf16 %v3686_v49, %v3685_v35 }
 0x3e0   : > { %7997 = vmatprep.subr.bf16.mxu1 %v7996_v39  ;;  %v8048_v39 = vpack.c.bf16 %v3704_v57, %v3703_v37 }
 0x3e2   : > { %8015 = vmatpush3.bf16.msra.mxu0 %v8014_v52  ;;  %v3706_v52 = vld [vmem:[%s10950_s7 + $0x2d8] sm:$0xff] }
 0x3e3   : > { %7999 = vmatpush3.bf16.msra.mxu1 %v7998_v47  ;;  %8017 = vmatprep.subr.bf16.mxu0 %v8016_v5  ;;  %v3712_v47 = vld [vmem:[%s10950_s7 + $0x308] sm:$0xff] }
 0x3e4   : > { %8033 = vmatprep.subr.bf16.mxu1 %v8032_v34  ;;  %v8066_v34 = vpack.c.bf16 %v3712_v47, %v3711_v55  ;;  %v3722_v55 = vld [vmem:[%s10950_s7 + $0x358] sm:$0xff]  ;;  %v3747_v47 = vld [vmem:[%s10950_s7 + $0x420] sm:$0xff] }
 0x3e5   : > { %v8086_v53 = vpack.c.bf16 %v3722_v55, %v3721_v51 }
 0x3e6   : > { %8019 = vmatpush3.bf16.msra.mxu0 %v8018_v54  ;;  %v8052_v54 = vpack.c.bf16 %v3706_v52, %v3705_v48  ;;  %v3748_v48 = vld [vmem:[%s10950_s7 + $0x428] sm:$0xff]  ;;  %v3739_v52 = vld [vmem:[%s10950_s7 + $0x3e0] sm:$0xff] }
 0x3e7   : > { %8021 = vmatprep.subr.bf16.mxu0 %v8020_v3  ;;  %v3713_v3 = vld [vmem:[%s10950_s7 + $0x310] sm:$0xff] }
 0x3e8   : > { %v8070_v18 = vpack.c.bf16 %v3714_v17, %v3713_v3 }
 0x3ea   : > { %8023 = vmatpush3.bf16.msra.mxu0 %v8022_v61  ;;  %v3707_v61 = vld [vmem:[%s10950_s7 + $0x2e0] sm:$0xff] }
 0x3eb   : > { %8025 = vmatprep.subr.bf16.mxu0 %v8024_v13  ;;  %v3732_v13 = vld [vmem:[%s10950_s7 + $0x3a8] sm:$0xff] }
 0x3ec   : > { %v8072_v4 = vpack.c.bf16 %v3732_v13, %v3731_v6  ;;  %v3752_v6 = vld [vmem:[%s10950_s7 + $0x448] sm:$0xff] }
 0x3ee   : > { %8027 = vmatpush3.bf16.msra.mxu0 %v8026_v12  ;;  %v8056_v12 = vpack.c.bf16 %v3708_v45, %v3707_v61  ;;  %v3726_v61 = vld [vmem:[%s10950_s7 + $0x378] sm:$0xff]  ;;  %v3751_v45 = vld [vmem:[%s10950_s7 + $0x440] sm:$0xff] }
 0x3ef   : > { %8029 = vmatprep.subr.bf16.mxu0 %v8028_v29  ;;  %v3715_v29 = vld [vmem:[%s10950_s7 + $0x320] sm:$0xff] }
 0x3f0   : > { %v8074_v10 = vpack.c.bf16 %v3716_v26, %v3715_v29 }
 0x3f2   : > { %8031 = vmatpush3.bf16.msra.mxu0 %v8030_v50  ;;  %v3709_v50 = vld [vmem:[%s10950_s7 + $0x2f0] sm:$0xff] }
 0x3f3   : > { %8065 = vmatprep.subr.bf16.mxu0 %v8064_v44  ;;  %v3734_v44 = vld [vmem:[%s10950_s7 + $0x3b8] sm:$0xff]  ;;  %v8060_v0 = vpack.c.bf16 %v3710_v20, %v3709_v50  ;;  %v3755_v50 = vld [vmem:[%s10950_s7 + $0x460] sm:$0xff]  ;;  %v3756_v20 = vld [vmem:[%s10950_s7 + $0x468] sm:$0xff] }
 0x468   : > { %v7047_v7 = vpop.f32.mrb[128].mxu0  ;;  %v7066_v40 = vpop.f32.mrb[120].mxu1 }
 0x469   : > { %v2902_v38 = vpop.f32.mrb[129].mxu0  ;;  %v2990_v21 = vpop.f32.mrb[121].mxu1 }
 0x46a   : > { %3830 = vmatprep.mubr.f32.mxu1 %v2990_v21  ;;  %v3743_v21 = vld [vmem:[%s10950_s7 + $0x400] sm:$0xff] }
 0x46b   : > { %3831 = vmatmul.mubr.f32.vlgmr.msra.gmra.mrb[128].mxu1 %v2902_v38  ;;  %v3718_v38 = vld [vmem:[%s10950_s7 + $0x338] sm:$0xff] }
 0x46c   : > { %3835 = vmatprep.mubr.f32.mxu1 %v7066_v40  ;;  %8035 = vmatpush3.bf16.msra.mxu1 %v8034_v15  ;;  %v3717_v40 = vld [vmem:[%s10950_s7 + $0x330] sm:$0xff]  ;;  %v8076_v15 = vpack.c.bf16 %v3734_v44, %v3733_v41  ;;  %v8120_v41 = vpack.c.bf16 %v3756_v20, %v3755_v50  ;;  %v4868_v50 = vld [vmem:[%s10953_s10 + $0x100] sm:$0xff]  ;;  %v4869_v20 = vld [vmem:[%s10953_s10 + $0x108] sm:$0xff] }
 0x46d   : > { %8037 = vmatprep.subr.bf16.mxu1 %v8036_v22  ;;  %v3744_v22 = vld [vmem:[%s10950_s7 + $0x408] sm:$0xff]  ;;  %v8078_v27 = vpack.c.bf16 %v3718_v38, %v3717_v40  ;;  %v3757_v44 = vld [vmem:[%s10950_s7 + $0x470] sm:$0xff]  ;;  %v8451_v40 = vmov 0.0  }
 0x46f   : > { %3836 = vmatmul.mubr.f32.gmra.mrb[130].mxu1 %v7047_v7  ;;  %v3694_v7 = vld [vmem:[%s10950_s7 + $0x278] sm:$0xff] }
 0x470   : > { %8039 = vmatpush3.bf16.msra.mxu1 %v8038_v28  ;;  %v8062_v36 = vpack.c.bf16 %v3694_v7, %v3693_v11  ;;  %v8096_v28 = vpack.c.bf16 %v3744_v22, %v3743_v21  ;;  %v8449_v7 = vmov 0.0|0.0  }
 0x471   : > { %8041 = vmatprep.subr.bf16.mxu1 %v8040_v42  ;;  %v3719_v42 = vld [vmem:[%s10950_s7 + $0x340] sm:$0xff] }
 0x474   : > { %8043 = vmatpush3.bf16.msra.mxu1 %v8042_v56  ;;  %v3737_v56 = vld [vmem:[%s10950_s7 + $0x3d0] sm:$0xff] }
 0x475   : > { %8045 = vmatprep.subr.bf16.mxu1 %v8044_v43  ;;  %v3738_v43 = vld [vmem:[%s10950_s7 + $0x3d8] sm:$0xff] }
 0x476   : > { %v8084_v31 = vpack.c.bf16 %v3738_v43, %v3737_v56 }
 0x478   : > { %v7085_v46 = vpop.f32.mrb[130].mxu0  ;;  %v7104_v5 = vpop.f32.mrb[122].mxu1  ;;  %8047 = vmatpush3.bf16.msra.mxu1 %v8046_v1  ;;  %v8082_v1 = vpack.c.bf16 %v3720_v33, %v3719_v42 }
 0x479   : > { %v3078_v63 = vpop.f32.mrb[131].mxu0  ;;  %v3166_v59 = vpop.f32.mrb[123].mxu1  ;;  %8049 = vmatprep.subr.bf16.mxu1 %v8048_v39  ;;  %v8100_v39 = vpack.c.bf16 %v3746_v32, %v3745_v60 }
 0x47a   : > { %3905 = vmatprep.mubr.f32.mxu0 %v3166_v59  ;;  %v3749_v59 = vld [vmem:[%s10950_s7 + $0x430] sm:$0xff] }
 0x47b   : > { %3906 = vmatmul.mubr.f32.vlgmr.msra.gmra.mrb[138].mxu0 %v3078_v63  ;;  %v3724_v63 = vld [vmem:[%s10950_s7 + $0x368] sm:$0xff] }
 0x47c   : > { %3910 = vmatprep.mubr.f32.mxu0 %v7104_v5  ;;  %8051 = vmatpush3.bf16.msra.mxu1 %v8050_v58  ;;  %v3723_v5 = vld [vmem:[%s10950_s7 + $0x360] sm:$0xff]  ;;  %v8088_v58 = vpack.c.bf16 %v3740_v9, %v3739_v52 }
 0x47d   : > { %8067 = vmatpush3.bf16.msra.mxu0 %v8066_v34  ;;  %8053 = vmatprep.subr.bf16.mxu1 %v8052_v54  ;;  %v3750_v34 = vld [vmem:[%s10950_s7 + $0x438] sm:$0xff]  ;;  %v3741_v54 = vld [vmem:[%s10950_s7 + $0x3f0] sm:$0xff]  ;;  %v8090_v2 = vpack.c.bf16 %v3724_v63, %v3723_v5 }
 0x47e   : > { %8069 = vmatprep.subr.bf16.mxu0 %v8068_v14  ;;  %v8108_v3 = vpack.c.bf16 %v3750_v34, %v3749_v59  ;;  %v3725_v14 = vld [vmem:[%s10950_s7 + $0x370] sm:$0xff]  ;;  %v8092_v17 = vpack.c.bf16 %v3742_v62, %v3741_v54  ;;  %v4143_v59 = vld [vmem:[%s10952_s9] sm:$0x1]  ;;  %v5633_v34 = vld [vmem:[%s10952_s9 + $0x6] sm:$0x1] }
 0x47f   : > { %3911 = vmatmul.mubr.f32.gmra.mrb[140].mxu0 %v7085_v46  ;;  %v8104_v46 = vpack.c.bf16 %v3748_v48, %v3747_v47  ;;  %v8094_v13 = vpack.c.bf16 %v3726_v61, %v3725_v14  ;;  %v4144_v14 = vunpack.c.0.s8 %v4143_v59 }
 0x480   : > { %8055 = vmatpush3.bf16.msra.mxu1 %v8054_v8  ;;  %v8112_v8 = vpack.c.bf16 %v3752_v6, %v3751_v45  ;;  %v5623_v45 = vld [vmem:[%s10952_s9 + $0x1] sm:$0x1]  ;;  %v5637_v6 = vld [vmem:[%s10952_s9 + $0x8] sm:$0x1] }
 0x481   : > { %8071 = vmatpush3.bf16.msra.mxu0 %v8070_v18  ;;  %8057 = vmatprep.subr.bf16.mxu1 %v8056_v12  ;;  %v3753_v18 = vld [vmem:[%s10950_s7 + $0x450] sm:$0xff]  ;;  %v3754_v12 = vld [vmem:[%s10950_s7 + $0x458] sm:$0xff] }
 0x482   : > { %8073 = vmatprep.subr.bf16.mxu0 %v8072_v4  ;;  %v8116_v26 = vpack.c.bf16 %v3754_v12, %v3753_v18  ;;  %v4222_v12 = vunpack.c.0.s8 %v5623_v45 }
 0x484   : > { %8059 = vmatpush3.bf16.msra.mxu1 %v8058_v19  ;;  %v3758_v19 = vld [vmem:[%s10950_s7 + $0x478] sm:$0xff] }
 0x485   : > { %8075 = vmatpush3.bf16.msra.mxu0 %v8074_v10  ;;  %8061 = vmatprep.subr.bf16.mxu1 %v8060_v0  ;;  %v8124_v10 = vpack.c.bf16 %v3758_v19, %v3757_v44 }
 0x486   : > { %8077 = vmatprep.subr.bf16.mxu0 %v8076_v15 }
 0x488   : > { %v7123_v35 = vpop.f32.mrb[132].mxu0  ;;  %v7142_v49 = vpop.f32.mrb[124].mxu1  ;;  %8063 = vmatpush3.bf16.msra.mxu1 %v8062_v36  ;;  %v5621_v36 = vld [vmem:[%s10951_s8] ss:$0 sm:$0xff] }
 0x489   : > { %8079 = vmatpush3.bf16.msra.mxu0 %v8078_v27  ;;  %v3254_v37 = vpop.f32.mrb[133].mxu0  ;;  %v3342_v57 = vpop.f32.mrb[125].mxu1  ;;  %8097 = vmatprep.subr.bf16.mxu1 %v8096_v28 }
 0x48a   : > { %3980 = vmatprep.mubr.f32.mxu1 %v3342_v57  ;;  %8081 = vmatprep.subr.bf16.mxu0 %v8080_v30 }
 0x48b   : > { %3981 = vmatmul.mubr.f32.vlgmr.msra.gmra.mrb[132].mxu1 %v3254_v37 }
 0x48c   : > { %3985 = vmatprep.mubr.f32.mxu1 %v7142_v49  ;;  %8099 = vmatpush3.bf16.msra.mxu1 %v8096_v28 }
 0x48d   : > { %8083 = vmatpush3.bf16.msra.mxu0 %v8082_v1  ;;  %8101 = vmatprep.subr.bf16.mxu1 %v8100_v39 }
 0x48e   : > { %8085 = vmatprep.subr.bf16.mxu0 %v8084_v31 }
 0x48f   : > { %3986 = vmatmul.mubr.f32.gmra.mrb[134].mxu1 %v7123_v35 }
 0x490   : > { %8103 = vmatpush3.bf16.msra.mxu1 %v8100_v39 }
 0x491   : > { %8087 = vmatpush3.bf16.msra.mxu0 %v8086_v53  ;;  %8105 = vmatprep.subr.bf16.mxu1 %v8104_v46 }
 0x492   : > { %8089 = vmatprep.subr.bf16.mxu0 %v8088_v58 }
 0x494   : > { %8107 = vmatpush3.bf16.msra.mxu1 %v8104_v46 }
 0x495   : > { %8091 = vmatpush3.bf16.msra.mxu0 %v8090_v2  ;;  %8109 = vmatprep.subr.bf16.mxu1 %v8108_v3 }
 0x496   : > { %8093 = vmatprep.subr.bf16.mxu0 %v8092_v17  ;;  %v4607_v17 = vunpack.c.0.s8 %v5633_v34  ;;  %v4894_v34 = vld [vmem:[%s10953_s10 + $0x1d0] sm:$0xff] }
 0x498   : > { %v7161_v16 = vpop.f32.mrb[134].mxu0  ;;  %v7180_v25 = vpop.f32.mrb[126].mxu1  ;;  %8111 = vmatpush3.bf16.msra.mxu1 %v8108_v3  ;;  %v4608_v18 = vcvt.s32.f32 %v4607_v17  ;;  %v4854_v17 = vld [vmem:[%s10953_s10 + $0x90] sm:$0xff] }
 0x499   : > { %8095 = vmatpush3.bf16.msra.mxu0 %v8094_v13  ;;  %v3430_v29 = vpop.f32.mrb[135].mxu0  ;;  %v3518_v4 = vpop.f32.mrb[127].mxu1  ;;  %8113 = vmatprep.subr.bf16.mxu1 %v8112_v8 }
 0x49a   : > { %4055 = vmatprep.mubr.f32.mxu0 %v3518_v4  ;;  %8128 = vmatprep.subr.bf16.mxu0 %v8449_v7  ;;  %v5625_v4 = vld [vmem:[%s10952_s9 + $0x2] sm:$0x1] }
 0x49b   : > { %v4299_v44 = vunpack.c.0.s8 %v5625_v4 }
 0x49c   : > { %4056 = vmatmul.mubr.f32.vlgmr.msra.gmra.mrb[142].mxu0 %v3430_v29  ;;  %8115 = vmatpush3.bf16.msra.mxu1 %v8112_v8  ;;  %v4145_v8 = vcvt.s32.f32 %v4144_v14  ;;  %v4885_v29 = vld [vmem:[%s10953_s10 + $0x188] sm:$0xff] }
 0x49d   : > { %4060 = vmatprep.mubr.f32.mxu0 %v7180_v25  ;;  %8117 = vmatprep.subr.bf16.mxu1 %v8116_v26  ;;  %v4884_v25 = vld [vmem:[%s10953_s10 + $0x180] sm:$0xff] }
 0x4a0   : > { %4061 = vmatmul.mubr.f32.gmra.mrb[144].mxu0 %v7161_v16  ;;  %8119 = vmatpush3.bf16.msra.mxu1 %v8116_v26  ;;  %v4761_v16 = vunpack.c.0.s8 %v5637_v6  ;;  %v8187_v26 = vpack.c.bf16 %v4885_v29, %v4884_v25  ;;  %v4856_v25 = vld [vmem:[%s10953_s10 + $0xa0] sm:$0xff] }
 0x4a1   : > { %8121 = vmatprep.subr.bf16.mxu1 %v8120_v41  ;;  %7239 = vmatprep.mubr.msk.f32.mxu0 %vm8450_vm2, %v8451_v40 }
 0x4a2   : > { %v4762_v19 = vcvt.s32.f32 %v4761_v16  ;;  %v4839_v16 = vld [vmem:[%s10953_s10 + $0x18] sm:$0xff] }
 0x4a4   : > { %8123 = vmatpush3.bf16.msra.mxu1 %v8120_v41  ;;  %v4223_v41 = vcvt.s32.f32 %v4222_v12  ;;  %v4838_v12 = vld [vmem:[%s10953_s10 + $0x10] sm:$0xff] }
 0x4a5   : > { %8125 = vmatprep.subr.bf16.mxu1 %v8124_v10  ;;  %v8161_v29 = vpack.c.bf16 %v4839_v16, %v4838_v12  ;;  %v4901_v12 = vld [vmem:[%s10953_s10 + $0x208] sm:$0xff] }
 0x4a8   : > { %v7199_v0 = vpop.f32.mrb[136].mxu0  ;;  %8127 = vmatpush3.bf16.msra.mxu1 %v8124_v10  ;;  %v4886_v10 = vld [vmem:[%s10953_s10 + $0x190] sm:$0xff] }
 0x4a9   : > { %v3606_v11 = vpop.f32.mrb[137].mxu0  ;;  %8146 = vmatprep.subr.bf16.mxu1 %v8449_v7 }
 0x4aa   : > { %7232 = vmatprep.mubr.f32.mxu1 %v3606_v11  ;;  %v5627_v11 = vld [vmem:[%s10952_s9 + $0x3] sm:$0x1] }
 0x4ab   : > { %7233 = vmatmul.mubr.f32.vlgmr.msra.gmra.mrb[136].mxu1 %v7199_v0  ;;  %v4887_v0 = vld [vmem:[%s10953_s10 + $0x198] sm:$0xff] }
 0x4ac   : > { %7281 = vmatprep.mubr.msk.f32.mxu1 %vm8450_vm2, %v8451_v40 }
 0x53e   : > { %v6590_v15 = vpop.f32.mrb[128].mxu1 }
 0x53f   : > { %v6591_v38 = vpop.f32.mrb[129].mxu1 }
 0x540   : > { %v6592_v21 = vadd.f32 %v6591_v38, %v6590_v15  ;;  %v8189_v15 = vpack.c.bf16 %v4869_v20, %v4868_v50  ;;  %v8191_v38 = vpack.c.bf16 %v4887_v0, %v4886_v10  ;;  %v4841_v50 = vld [vmem:[%s10953_s10 + $0x28] sm:$0xff]  ;;  %v4858_v20 = vld [vmem:[%s10953_s10 + $0xb0] sm:$0xff]  ;;  %v4843_v0 = vld [vmem:[%s10953_s10 + $0x38] sm:$0xff] }
 0x541   : > { %v4842_v10 = vld [vmem:[%s10953_s10 + $0x30] sm:$0xff] }
 0x542   : > { %v6593_v22 = vpop.f32.mrb[130].mxu1  ;;  %v3833_v42 = vadd.f32 %v6592_v21, %v5621_v36  ;;  %v4870_v21 = vld [vmem:[%s10953_s10 + $0x110] sm:$0xff] }
 0x543   : > { %v6594_v24 = vpop.f32.mrb[131].mxu1 }
 0x544   : > { %v6595_v23 = vadd.f32 %v6594_v24, %v6593_v22  ;;  %v4871_v22 = vld [vmem:[%s10953_s10 + $0x118] sm:$0xff]  ;;  %v4300_v24 = vcvt.s32.f32 %v4299_v44 }
 0x546   : > { %v3838_v56 = vadd.f32 %v6595_v23, %v5621_v36  ;;  %v4376_v23 = vunpack.c.0.s8 %v5627_v11  ;;  %v4888_v36 = vld [vmem:[%s10953_s10 + $0x1a0] sm:$0xff] }
 0x547   : > { %v4860_v11 = vld [vmem:[%s10953_s10 + $0xc0] sm:$0xff] }
 0x54e   : > { %v6628_v27 = vpop.f32.mrb[138].mxu0 }
 0x54f   : > { %v6629_v28 = vpop.f32.mrb[139].mxu0 }
 0x550   : > { %v6630_v30 = vadd.f32 %v6629_v28, %v6628_v27  ;;  %v4889_v27 = vld [vmem:[%s10953_s10 + $0x1a8] sm:$0xff]  ;;  %v5629_v28 = vld [vmem:[%s10952_s9 + $0x4] sm:$0x1] }
 0x552   : > { %v3908_v33 = vadd.f32 %v6630_v30, %v3833_v42  ;;  %v6631_v60 = vpop.f32.mrb[140].mxu0  ;;  %v8193_v42 = vpack.c.bf16 %v4871_v22, %v4870_v21  ;;  %v8195_v30 = vpack.c.bf16 %v4889_v27, %v4888_v36  ;;  %v4844_v22 = vld [vmem:[%s10953_s10 + $0x40] sm:$0xff]  ;;  %v4863_v36 = vld [vmem:[%s10953_s10 + $0xd8] sm:$0xff] }
 0x553   : > { %v6632_v32 = vpop.f32.mrb[141].mxu0 }
 0x554   : > { %v6633_v43 = vadd.f32 %v6632_v32, %v6631_v60  ;;  %v4873_v60 = vld [vmem:[%s10953_s10 + $0x128] sm:$0xff]  ;;  %v4377_v32 = vcvt.s32.f32 %v4376_v23  ;;  %v4862_v23 = vld [vmem:[%s10953_s10 + $0xd0] sm:$0xff] }
 0x556   : > { %v3913_v35 = vadd.f32 %v6633_v43, %v3838_v56  ;;  %v4453_v56 = vunpack.c.0.s8 %v5629_v28  ;;  %v4890_v43 = vld [vmem:[%s10953_s10 + $0x1b0] sm:$0xff]  ;;  %v8175_v28 = vpack.c.bf16 %v4863_v36, %v4862_v23  ;;  %v4932_v36 = vld [vmem:[%s10953_s10 + $0x300] sm:$0xff] }
 0x55e   : > { %v6666_v49 = vpop.f32.mrb[132].mxu1 }
 0x55f   : > { %v6667_v37 = vpop.f32.mrb[133].mxu1 }
 0x560   : > { %v6668_v57 = vadd.f32 %v6667_v37, %v6666_v49  ;;  %v5631_v49 = vld [vmem:[%s10952_s9 + $0x5] sm:$0x1] }
 0x562   : > { %v3983_v1 = vadd.f32 %v6668_v57, %v3908_v33  ;;  %v6669_v39 = vpop.f32.mrb[134].mxu1  ;;  %v4872_v33 = vld [vmem:[%s10953_s10 + $0x120] sm:$0xff] }
 0x563   : > { %v6670_v51 = vpop.f32.mrb[135].mxu1  ;;  %v8197_v37 = vpack.c.bf16 %v4873_v60, %v4872_v33  ;;  %v4864_v33 = vld [vmem:[%s10953_s10 + $0xe0] sm:$0xff]  ;;  %v4865_v60 = vld [vmem:[%s10953_s10 + $0xe8] sm:$0xff] }
 0x564   : > { %v6671_v31 = vadd.f32 %v6670_v51, %v6669_v39  ;;  %v4875_v39 = vld [vmem:[%s10953_s10 + $0x138] sm:$0xff]  ;;  %v4454_v51 = vcvt.s32.f32 %v4453_v56  ;;  %v8179_v56 = vpack.c.bf16 %v4865_v60, %v4864_v33  ;;  %v4950_v33 = vld [vmem:[%s10953_s10 + $0x390] sm:$0xff] }
 0x565   : > { %v4951_v60 = vld [vmem:[%s10953_s10 + $0x398] sm:$0xff] }
 0x566   : > { %v3988_v55 = vadd.f32 %v6671_v31, %v3913_v35  ;;  %v4891_v35 = vld [vmem:[%s10953_s10 + $0x1b8] sm:$0xff]  ;;  %v4530_v31 = vunpack.c.0.s8 %v5631_v49  ;;  %v4866_v49 = vld [vmem:[%s10953_s10 + $0xf0] sm:$0xff] }
 0x567   : > { %v8199_v57 = vpack.c.bf16 %v4891_v35, %v4890_v43  ;;  %v4848_v43 = vld [vmem:[%s10953_s10 + $0x60] sm:$0xff]  ;;  %v4849_v35 = vld [vmem:[%s10953_s10 + $0x68] sm:$0xff] }
 0x56f   : > { %v6704_v47 = vpop.f32.mrb[142].mxu0 }
 0x570   : > { %v6705_v48 = vpop.f32.mrb[143].mxu0 }
 0x571   : > { %v6706_v52 = vadd.f32 %v6705_v48, %v6704_v47  ;;  %v4893_v47 = vld [vmem:[%s10953_s10 + $0x1c8] sm:$0xff]  ;;  %v5635_v48 = vld [vmem:[%s10952_s9 + $0x7] sm:$0x1] }
 0x572   : > { %v4684_v59 = vunpack.c.0.s8 %v5635_v48 }
 0x573   : > { %v6707_v9 = vpop.f32.mrb[144].mxu0  ;;  %v4058_v53 = vadd.f32 %v6706_v52, %v3983_v1  ;;  %v4874_v1 = vld [vmem:[%s10953_s10 + $0x130] sm:$0xff]  ;;  %v4852_v52 = vld [vmem:[%s10953_s10 + $0x80] sm:$0xff] }
 0x574   : > { %v6708_v46 = vpop.f32.mrb[145].mxu0  ;;  %v4685_v6 = vcvt.s32.f32 %v4684_v59 }
 0x575   : > { %v6709_v5 = vadd.f32 %v6708_v46, %v6707_v9  ;;  %v8201_v9 = vpack.c.bf16 %v4875_v39, %v4874_v1  ;;  %v4850_v39 = vld [vmem:[%s10953_s10 + $0x70] sm:$0xff] }
 0x577   : > { %v4063_v58 = vadd.f32 %v6709_v5, %v3988_v55  ;;  %v4892_v55 = vld [vmem:[%s10953_s10 + $0x1c0] sm:$0xff] }
 0x578   : > { %v8203_v46 = vpack.c.bf16 %v4893_v47, %v4892_v55  ;;  %v4876_v5 = vld [vmem:[%s10953_s10 + $0x140] sm:$0xff]  ;;  %v4879_v47 = vld [vmem:[%s10953_s10 + $0x158] sm:$0xff] }
 0x57e   : > { %v7234_v63 = vpop.f32.mrb[136].mxu1 }
 0x57f   : > { %v4138_v54 = vadd.f32 %v7234_v63, %v4063_v58  ;;  %v4132_v62 = vpop.f32.mrb[137].mxu1  ;;  %v4877_v58 = vld [vmem:[%s10953_s10 + $0x148] sm:$0xff]  ;;  %v4531_v63 = vcvt.s32.f32 %v4530_v31  ;;  %v4878_v31 = vld [vmem:[%s10953_s10 + $0x150] sm:$0xff] }
 0x580   : > { %v4133_v2 = vadd.f32 %v4132_v62, %v4058_v53  ;;  %v4853_v53 = vld [vmem:[%s10953_s10 + $0x88] sm:$0xff]  ;;  %v8205_v14 = vpack.c.bf16 %v4877_v58, %v4876_v5  ;;  %v8209_v48 = vpack.c.bf16 %v4879_v47, %v4878_v31  ;;  %v4880_v58 = vld [vmem:[%s10953_s10 + $0x160] sm:$0xff] }
 0x581   : > { %v4142_v3 = vmax.f32 %v4138_v54, 0.0  ;;  %v4895_v54 = vld [vmem:[%s10953_s10 + $0x1d8] sm:$0xff]  ;;  %v8155_v62 = vpack.c.bf16 %v4853_v53, %v4852_v52  ;;  %v4896_v52 = vld [vmem:[%s10953_s10 + $0x1e0] sm:$0xff]  ;;  %v4917_v5 = vld [vmem:[%s10953_s10 + $0x288] sm:$0xff] }
 0x582   : > { %v4141_v61 = vmax.f32 %v4133_v2, 0.0  ;;  %v4836_v2 = vld [vmem:[%s10953_s10] sm:$0xff]  ;;  %v8207_v45 = vpack.c.bf16 %v4895_v54, %v4894_v34  ;;  %v4898_v54 = vld [vmem:[%s10953_s10 + $0x1f0] sm:$0xff]  ;;  %v4925_v31 = vld [vmem:[%s10953_s10 + $0x2c8] sm:$0xff] }
 0x583   : > { %v4916_v53 = vld [vmem:[%s10953_s10 + $0x280] sm:$0xff]  ;;  %v4953_v47 = vld [vmem:[%s10953_s10 + $0x3a8] sm:$0xff] }
 0x584   : > { %v10325_v13 = vpack.c.bf16 %v4142_v3, %v4141_v61  ;;  %v4837_v3 = vld [vmem:[%s10953_s10 + $0x8] sm:$0xff]  ;;  %v4855_v61 = vld [vmem:[%s10953_s10 + $0x98] sm:$0xff]  ;;  %v8219_v59 = vpack.c.bf16 %v4917_v5, %v4916_v53  ;;  %v4908_v53 = vld [vmem:[%s10953_s10 + $0x240] sm:$0xff] }
 0x586   : > { %8130 = vmatpush3.bf16.msra.mxu0 %v10325_v13  ;;  %8148 = vmatpush3.bf16.msra.mxu1 %v10325_v13 }
 0x587   : > { %8131 = vmatprep.subr.bf16.mxu0 %v8449_v7  ;;  %8152 = vmatprep.subr.bf16.mxu1 %v8449_v7 }
 0x589   : > { %7240 = vmatmul.mubr.msk.f32.vlgmr.msra.gmra.mrb[146].mxu0 %vm4146_vm3, %v4145_v8  ;;  %7282 = vmatmul.mubr.msk.f32.vlgmr.msra.gmra.mrb[138].mxu1 %vm4146_vm3, %v4608_v18  ;;  %v8157_v8 = vpack.c.bf16 %v4837_v3, %v4836_v2  ;;  %v8159_v18 = vpack.c.bf16 %v4855_v61, %v4854_v17  ;;  %v4882_v3 = vld [vmem:[%s10953_s10 + $0x170] sm:$0xff]  ;;  %v4948_v61 = vld [vmem:[%s10953_s10 + $0x380] sm:$0xff] }
 0x58a   : > { %8133 = vmatpush3.bf16.msra.mxu0 %v10325_v13  ;;  %8154 = vmatpush3.bf16.msra.mxu1 %v10325_v13 }
 0x58b   : > { %7246 = vmatprep.mubr.msk.f32.mxu0 %vm8450_vm2, %v8451_v40  ;;  %8134 = vmatprep.subr.bf16.mxu0 %v8449_v7 }
 0x58c   : > { %7295 = vmatprep.mubr.msk.f32.mxu1 %vm8450_vm2, %v8451_v40  ;;  %8188 = vmatprep.subr.bf16.mxu1 %v8187_v26  ;;  %v4840_v26 = vld [vmem:[%s10953_s10 + $0x20] sm:$0xff] }
 0x58d   : > { %7247 = vmatmul.mubr.msk.f32.vlgmr.msra.gmra.mrb[148].mxu0 %vm4146_vm3, %v4223_v41  ;;  %7296 = vmatmul.mubr.msk.f32.vlgmr.msra.gmra.mrb[140].mxu1 %vm4146_vm3, %v4762_v19  ;;  %v4859_v41 = vld [vmem:[%s10953_s10 + $0xb8] sm:$0xff]  ;;  %v8165_v44 = vpack.c.bf16 %v4841_v50, %v4840_v26 }
 0x58e   : > { %8136 = vmatpush3.bf16.msra.mxu0 %v10325_v13  ;;  %7253 = vmatprep.mubr.msk.f32.mxu0 %vm8450_vm2, %v8451_v40  ;;  %v8167_v19 = vpack.c.bf16 %v4859_v41, %v4858_v20  ;;  %v4902_v41 = vld [vmem:[%s10953_s10 + $0x210] sm:$0xff] }
 0x58f   : > { %8137 = vmatprep.subr.bf16.mxu0 %v8449_v7  ;;  %8190 = vmatpush3.bf16.msra.mxu1 %v8189_v15  ;;  %v4861_v15 = vld [vmem:[%s10953_s10 + $0xc8] sm:$0xff] }
 0x590   : > { %8192 = vmatprep.subr.bf16.mxu1 %v8191_v38  ;;  %v8169_v38 = vpack.c.bf16 %v4843_v0, %v4842_v10  ;;  %v8171_v21 = vpack.c.bf16 %v4861_v15, %v4860_v11  ;;  %v4920_v0 = vld [vmem:[%s10953_s10 + $0x2a0] sm:$0xff]  ;;  %v4921_v11 = vld [vmem:[%s10953_s10 + $0x2a8] sm:$0xff] }
 0x591   : > { %7254 = vmatmul.mubr.msk.f32.vlgmr.msra.gmra.mrb[150].mxu0 %vm4146_vm3, %v4300_v24  ;;  %v4845_v24 = vld [vmem:[%s10953_s10 + $0x48] sm:$0xff]  ;;  %v8227_v23 = vpack.c.bf16 %v4921_v11, %v4920_v0 }
 0x592   : > { %8139 = vmatpush3.bf16.msra.mxu0 %v10325_v13  ;;  %7260 = vmatprep.mubr.msk.f32.mxu0 %vm8450_vm2, %v8451_v40  ;;  %v8173_v27 = vpack.c.bf16 %v4845_v24, %v4844_v22  ;;  %v4905_v22 = vld [vmem:[%s10953_s10 + $0x228] sm:$0xff] }
 0x593   : > { %8140 = vmatprep.subr.bf16.mxu0 %v8449_v7  ;;  %8194 = vmatpush3.bf16.msra.mxu1 %v8193_v42  ;;  %v4846_v42 = vld [vmem:[%s10953_s10 + $0x50] sm:$0xff]  ;;  %v4913_v0 = vld [vmem:[%s10953_s10 + $0x268] sm:$0xff] }
 0x594   : > { %8196 = vmatprep.subr.bf16.mxu1 %v8195_v30  ;;  %v4847_v30 = vld [vmem:[%s10953_s10 + $0x58] sm:$0xff] }
 0x595   : > { %7261 = vmatmul.mubr.msk.f32.vlgmr.msra.gmra.mrb[152].mxu0 %vm4146_vm3, %v4377_v32  ;;  %v8177_v32 = vpack.c.bf16 %v4847_v30, %v4846_v42  ;;  %v4923_v30 = vld [vmem:[%s10953_s10 + $0x2b8] sm:$0xff] }
 0x596   : > { %8142 = vmatpush3.bf16.msra.mxu0 %v10325_v13  ;;  %7267 = vmatprep.mubr.msk.f32.mxu0 %vm8450_vm2, %v8451_v40 }
 0x597   : > { %8143 = vmatprep.subr.bf16.mxu0 %v8449_v7  ;;  %8198 = vmatpush3.bf16.msra.mxu1 %v8197_v37  ;;  %v4867_v37 = vld [vmem:[%s10953_s10 + $0xf8] sm:$0xff] }
 0x598   : > { %8200 = vmatprep.subr.bf16.mxu1 %v8199_v57  ;;  %v8181_v57 = vpack.c.bf16 %v4849_v35, %v4848_v43  ;;  %v8183_v1 = vpack.c.bf16 %v4867_v37, %v4866_v49  ;;  %v4906_v43 = vld [vmem:[%s10953_s10 + $0x230] sm:$0xff]  ;;  %v4907_v35 = vld [vmem:[%s10953_s10 + $0x238] sm:$0xff] }
 0x599   : > { %7268 = vmatmul.mubr.msk.f32.vlgmr.msra.gmra.mrb[154].mxu0 %vm4146_vm3, %v4454_v51  ;;  %v4851_v51 = vld [vmem:[%s10953_s10 + $0x78] sm:$0xff] }
 0x59a   : > { %8145 = vmatpush3.bf16.msra.mxu0 %v10325_v13  ;;  %7274 = vmatprep.mubr.msk.f32.mxu0 %vm8450_vm2, %v8451_v40  ;;  %v8185_v55 = vpack.c.bf16 %v4851_v51, %v4850_v39  ;;  %v4935_v39 = vld [vmem:[%s10953_s10 + $0x318] sm:$0xff]  ;;  %v4924_v51 = vld [vmem:[%s10953_s10 + $0x2c0] sm:$0xff] }
 0x59b   : > { %8149 = vmatprep.subr.bf16.mxu0 %v8449_v7  ;;  %8202 = vmatpush3.bf16.msra.mxu1 %v8201_v9  ;;  %v4897_v9 = vld [vmem:[%s10953_s10 + $0x1e8] sm:$0xff]  ;;  %v8235_v5 = vpack.c.bf16 %v4925_v31, %v4924_v51 }
 0x59c   : > { %8204 = vmatprep.subr.bf16.mxu1 %v8203_v46  ;;  %v8211_v46 = vpack.c.bf16 %v4897_v9, %v4896_v52  ;;  %v8233_v52 = vpack.c.bf16 %v4907_v35, %v4906_v43  ;;  %v4942_v43 = vld [vmem:[%s10953_s10 + $0x350] sm:$0xff]  ;;  %v4943_v35 = vld [vmem:[%s10953_s10 + $0x358] sm:$0xff]  ;;  %v4945_v31 = vld [vmem:[%s10953_s10 + $0x368] sm:$0xff] }
 0x59d   : > { %7275 = vmatmul.mubr.msk.f32.vlgmr.msra.gmra.mrb[156].mxu0 %vm4146_vm3, %v4531_v63  ;;  %v4881_v63 = vld [vmem:[%s10953_s10 + $0x168] sm:$0xff] }
 0x59e   : > { %8151 = vmatpush3.bf16.msra.mxu0 %v10325_v13  ;;  %7288 = vmatprep.mubr.msk.f32.mxu0 %vm8450_vm2, %v8451_v40  ;;  %v4857_v13 = vld [vmem:[%s10953_s10 + $0xa8] sm:$0xff]  ;;  %v8213_v34 = vpack.c.bf16 %v4881_v63, %v4880_v58  ;;  %v4936_v63 = vld [vmem:[%s10953_s10 + $0x320] sm:$0xff] }
 0x59f   : > { %8156 = vmatprep.subr.bf16.mxu0 %v8155_v62  ;;  %8206 = vmatpush3.bf16.msra.mxu1 %v8205_v14  ;;  %v8163_v4 = vpack.c.bf16 %v4857_v13, %v4856_v25  ;;  %v4899_v62 = vld [vmem:[%s10953_s10 + $0x1f8] sm:$0xff]  ;;  %v4918_v13 = vld [vmem:[%s10953_s10 + $0x290] sm:$0xff] }
 0x5a0   : > { %8208 = vmatprep.subr.bf16.mxu1 %v8207_v45  ;;  %v8215_v2 = vpack.c.bf16 %v4899_v62, %v4898_v54  ;;  %v4883_v14 = vld [vmem:[%s10953_s10 + $0x178] sm:$0xff]  ;;  %v4949_v45 = vld [vmem:[%s10953_s10 + $0x388] sm:$0xff] }
 0x5a1   : > { %7289 = vmatmul.mubr.msk.f32.vlgmr.msra.gmra.mrb[158].mxu0 %vm4146_vm3, %v4685_v6  ;;  %v8217_v17 = vpack.c.bf16 %v4883_v14, %v4882_v3  ;;  %v8251_v6 = vpack.c.bf16 %v4949_v45, %v4948_v61  ;;  %v4927_v62 = vld [vmem:[%s10953_s10 + $0x2d8] sm:$0xff]  ;;  %v4910_v45 = vld [vmem:[%s10953_s10 + $0x250] sm:$0xff] }
 0x5a2   : > { %8158 = vmatpush3.bf16.msra.mxu0 %v8157_v8  ;;  %v4955_v3 = vld [vmem:[%s10953_s10 + $0x3b8] sm:$0xff] }
 0x5a3   : > { %8160 = vmatprep.subr.bf16.mxu0 %v8159_v18  ;;  %8210 = vmatpush3.bf16.msra.mxu1 %v8209_v48  ;;  %v4900_v18 = vld [vmem:[%s10953_s10 + $0x200] sm:$0xff] }
 0x5a4   : > { %8212 = vmatprep.subr.bf16.mxu1 %v8211_v46  ;;  %v8221_v26 = vpack.c.bf16 %v4901_v12, %v4900_v18  ;;  %v4909_v46 = vld [vmem:[%s10953_s10 + $0x248] sm:$0xff]  ;;  %v4938_v12 = vld [vmem:[%s10953_s10 + $0x330] sm:$0xff] }
 0x5a6   : > { %8162 = vmatpush3.bf16.msra.mxu0 %v8161_v29  ;;  %v4919_v29 = vld [vmem:[%s10953_s10 + $0x298] sm:$0xff] }
 0x5a7   : > { %8164 = vmatprep.subr.bf16.mxu0 %v8163_v4  ;;  %8214 = vmatpush3.bf16.msra.mxu1 %v8213_v34  ;;  %v8223_v20 = vpack.c.bf16 %v4919_v29, %v4918_v13  ;;  %v4926_v34 = vld [vmem:[%s10953_s10 + $0x2d0] sm:$0xff]  ;;  %v4928_v13 = vld [vmem:[%s10953_s10 + $0x2e0] sm:$0xff] }
 0x5a8   : > { %8216 = vmatprep.subr.bf16.mxu1 %v8215_v2  ;;  %v4954_v2 = vld [vmem:[%s10953_s10 + $0x3b0] sm:$0xff] }
 0x5a9   : > { %v8263_v18 = vpack.c.bf16 %v4955_v3, %v4954_v2  ;;  %v4968_v2 = vld [vmem:[%s10953_s10 + $0x420] sm:$0xff]  ;;  %v4969_v3 = vld [vmem:[%s10953_s10 + $0x428] sm:$0xff] }
 0x5aa   : > { %8166 = vmatpush3.bf16.msra.mxu0 %v8165_v44  ;;  %v4903_v44 = vld [vmem:[%s10953_s10 + $0x218] sm:$0xff] }
 0x5ab   : > { %8168 = vmatprep.subr.bf16.mxu0 %v8167_v19  ;;  %8218 = vmatpush3.bf16.msra.mxu1 %v8217_v17  ;;  %v8237_v17 = vpack.c.bf16 %v4909_v46, %v4908_v53  ;;  %v4946_v46 = vld [vmem:[%s10953_s10 + $0x370] sm:$0xff] }
 0x5ac   : > { %8252 = vmatprep.subr.bf16.mxu1 %v8251_v6  ;;  %v4911_v6 = vld [vmem:[%s10953_s10 + $0x258] sm:$0xff] }
 0x5ae   : > { %8170 = vmatpush3.bf16.msra.mxu0 %v8169_v38  ;;  %v8225_v38 = vpack.c.bf16 %v4903_v44, %v4902_v41  ;;  %v8241_v41 = vpack.c.bf16 %v4911_v6, %v4910_v45  ;;  %v4972_v45 = vld [vmem:[%s10953_s10 + $0x440] sm:$0xff]  ;;  %v4973_v6 = vld [vmem:[%s10953_s10 + $0x448] sm:$0xff] }
 0x5af   : > { %8172 = vmatprep.subr.bf16.mxu0 %v8171_v21  ;;  %v4904_v21 = vld [vmem:[%s10953_s10 + $0x220] sm:$0xff] }
 0x5b2   : > { %8174 = vmatpush3.bf16.msra.mxu0 %v8173_v27  ;;  %v4933_v27 = vld [vmem:[%s10953_s10 + $0x308] sm:$0xff] }
 0x5b3   : > { %8176 = vmatprep.subr.bf16.mxu0 %v8175_v28  ;;  %v4922_v28 = vld [vmem:[%s10953_s10 + $0x2b0] sm:$0xff] }
 0x5b4   : > { %v8231_v37 = vpack.c.bf16 %v4923_v30, %v4922_v28 }
 0x5b6   : > { %8178 = vmatpush3.bf16.msra.mxu0 %v8177_v32  ;;  %v8229_v32 = vpack.c.bf16 %v4905_v22, %v4904_v21  ;;  %v4941_v21 = vld [vmem:[%s10953_s10 + $0x348] sm:$0xff]  ;;  %v4930_v22 = vld [vmem:[%s10953_s10 + $0x2f0] sm:$0xff] }
 0x5b7   : > { %8180 = vmatprep.subr.bf16.mxu0 %v8179_v56  ;;  %v8253_v56 = vpack.c.bf16 %v4933_v27, %v4932_v36  ;;  %v4958_v36 = vld [vmem:[%s10953_s10 + $0x3d0] sm:$0xff]  ;;  %v4959_v27 = vld [vmem:[%s10953_s10 + $0x3d8] sm:$0xff] }
 0x5ba   : > { %8182 = vmatpush3.bf16.msra.mxu0 %v8181_v57  ;;  %v8255_v57 = vpack.c.bf16 %v4951_v60, %v4950_v33  ;;  %v4914_v33 = vld [vmem:[%s10953_s10 + $0x270] sm:$0xff] }
 0x5bb   : > { %8184 = vmatprep.subr.bf16.mxu0 %v8183_v1  ;;  %v4934_v1 = vld [vmem:[%s10953_s10 + $0x310] sm:$0xff] }
 0x5bc   : > { %v8257_v9 = vpack.c.bf16 %v4935_v39, %v4934_v1  ;;  %v8273_v1 = vpack.c.bf16 %v4943_v35, %v4942_v43  ;;  %v4944_v39 = vld [vmem:[%s10953_s10 + $0x360] sm:$0xff] }
 0x5be   : > { %8186 = vmatpush3.bf16.msra.mxu0 %v8185_v55  ;;  %v4952_v55 = vld [vmem:[%s10953_s10 + $0x3a0] sm:$0xff] }
 0x5bf   : > { %8220 = vmatprep.subr.bf16.mxu0 %v8219_v59  ;;  %v8259_v58 = vpack.c.bf16 %v4953_v47, %v4952_v55  ;;  %v4937_v59 = vld [vmem:[%s10953_s10 + $0x328] sm:$0xff]  ;;  %v4964_v55 = vld [vmem:[%s10953_s10 + $0x400] sm:$0xff] }
 0x5c0   : > { %v8261_v61 = vpack.c.bf16 %v4937_v59, %v4936_v63  ;;  %v4965_v47 = vld [vmem:[%s10953_s10 + $0x408] sm:$0xff]  ;;  %v4966_v63 = vld [vmem:[%s10953_s10 + $0x410] sm:$0xff]  ;;  %v4967_v59 = vld [vmem:[%s10953_s10 + $0x418] sm:$0xff] }
 0x5c1   : > { %v8284_v53 = vpack.c.bf16 %v4965_v47, %v4964_v55 }
 0x65c   : > { %v4216_v8 = vpop.f32.mrb[146].mxu0  ;;  %v10591_v16 = vpop.f32.mrb[138].mxu1 }
 0x65d   : > { %v7241_v25 = vpop.f32.mrb[147].mxu0  ;;  %v7283_v4 = vpop.f32.mrb[139].mxu1 }
 0x65e   : > { %v4939_v25 = vld [vmem:[%s10953_s10 + $0x338] sm:$0xff]  ;;  %v4929_v4 = vld [vmem:[%s10953_s10 + $0x2e8] sm:$0xff] }
 0x65f   : > { %v8265_v44 = vpack.c.bf16 %v4939_v25, %v4938_v12  ;;  %v8243_v11 = vpack.c.bf16 %v4929_v4, %v4928_v13  ;;  %v4976_v12 = vld [vmem:[%s10953_s10 + $0x460] sm:$0xff]  ;;  %v4977_v25 = vld [vmem:[%s10953_s10 + $0x468] sm:$0xff]  ;;  %v4979_v4 = vld [vmem:[%s10953_s10 + $0x478] sm:$0xff] }
 0x660   : > { %v4293_v50 = vpop.f32.mrb[148].mxu0  ;;  %v10605_v19 = vpop.f32.mrb[140].mxu1  ;;  %v8302_v13 = vpack.c.bf16 %v4977_v25, %v4976_v12 }
 0x661   : > { %5051 = vmatprep.mubr.f32.mxu0 %v4293_v50  ;;  %v7248_v10 = vpop.f32.mrb[149].mxu0  ;;  %v7297_v15 = vpop.f32.mrb[141].mxu1  ;;  %v4957_v50 = vld [vmem:[%s10953_s10 + $0x3c8] sm:$0xff] }
 0x662   : > { %5052 = vmatmul.mubr.f32.vlgmr.msra.gmra.mrb[160].mxu0 %v4216_v8  ;;  %v8239_v8 = vpack.c.bf16 %v4927_v62, %v4926_v34  ;;  %v4912_v10 = vld [vmem:[%s10953_s10 + $0x260] sm:$0xff]  ;;  %v8287_v62 = vpack.c.bf16 %v4967_v59, %v4966_v63 }
 0x663   : > { %8222 = vmatpush3.bf16.msra.mxu0 %v8221_v26  ;;  %v4956_v26 = vld [vmem:[%s10953_s10 + $0x3c0] sm:$0xff] }
 0x664   : > { %8224 = vmatprep.subr.bf16.mxu0 %v8223_v20  ;;  %v4370_v24 = vpop.f32.mrb[150].mxu0  ;;  %v8267_v15 = vpack.c.bf16 %v4957_v50, %v4956_v26  ;;  %v5347_v50 = vld [vmem:[%s10955_s12] sm:$0xff] }
 0x665   : > { %v7255_v42 = vpop.f32.mrb[151].mxu0 }
 0x666   : > { %v8245_v42 = vpack.c.bf16 %v4913_v0, %v4912_v10  ;;  %v5350_v10 = vld [vmem:[%s10955_s12 + $0x18] sm:$0xff] }
 0x667   : > { %8226 = vmatpush3.bf16.msra.mxu0 %v8225_v38  ;;  %v4940_v38 = vld [vmem:[%s10953_s10 + $0x340] sm:$0xff] }
 0x668   : > { %v4447_v49 = vpop.f32.mrb[152].mxu0  ;;  %8228 = vmatprep.subr.bf16.mxu0 %v8227_v23  ;;  %v4931_v23 = vld [vmem:[%s10953_s10 + $0x2f8] sm:$0xff]  ;;  %v8269_v30 = vpack.c.bf16 %v4941_v21, %v4940_v38  ;;  %v5353_v38 = vld [vmem:[%s10955_s12 + $0x30] sm:$0xff] }
 0x669   : > { %5121 = vmatprep.mubr.f32.mxu1 %v4447_v49  ;;  %v7262_v48 = vpop.f32.mrb[153].mxu0  ;;  %v8247_v60 = vpack.c.bf16 %v4931_v23, %v4930_v22  ;;  %v4960_v49 = vld [vmem:[%s10953_s10 + $0x3e0] sm:$0xff]  ;;  %v5354_v21 = vld [vmem:[%s10955_s12 + $0x38] sm:$0xff]  ;;  %v5356_v23 = vld [vmem:[%s10955_s12 + $0x48] sm:$0xff] }
 0x66a   : > { %5122 = vmatmul.mubr.f32.vlgmr.msra.gmra.mrb[142].mxu1 %v4370_v24  ;;  %v4962_v48 = vld [vmem:[%s10953_s10 + $0x3f0] sm:$0xff]  ;;  %v8317_v22 = vpack.c.bf16 %v5354_v21, %v5353_v38 }
 0x66b   : > { %8230 = vmatpush3.bf16.msra.mxu0 %v8229_v32  ;;  %8254 = vmatpush3.bf16.msra.mxu1 %v8253_v56  ;;  %v8271_v32 = vpack.c.bf16 %v4959_v27, %v4958_v36  ;;  %v4915_v56 = vld [vmem:[%s10953_s10 + $0x278] sm:$0xff]  ;;  %v5357_v27 = vld [vmem:[%s10955_s12 + $0x50] sm:$0xff] }
 0x66c   : > { %8232 = vmatprep.subr.bf16.mxu0 %v8231_v37  ;;  %8256 = vmatprep.subr.bf16.mxu1 %v8255_v57  ;;  %v10676_v54 = vpop.f32.mrb[154].mxu0  ;;  %v4961_v37 = vld [vmem:[%s10953_s10 + $0x3e8] sm:$0xff]  ;;  %v8249_v57 = vpack.c.bf16 %v4915_v56, %v4914_v33  ;;  %v5362_v56 = vld [vmem:[%s10955_s12 + $0x78] sm:$0xff] }
 0x66d   : > { %v7269_v14 = vpop.f32.mrb[155].mxu0  ;;  %v8275_v51 = vpack.c.bf16 %v4961_v37, %v4960_v49  ;;  %v5360_v33 = vld [vmem:[%s10955_s12 + $0x68] sm:$0xff] }
 0x66e   : > { %v4970_v14 = vld [vmem:[%s10953_s10 + $0x430] sm:$0xff] }
 0x66f   : > { %8234 = vmatpush3.bf16.msra.mxu0 %v8233_v52  ;;  %8258 = vmatpush3.bf16.msra.mxu1 %v8257_v9  ;;  %v4963_v52 = vld [vmem:[%s10953_s10 + $0x3f8] sm:$0xff]  ;;  %v8277_v9 = vpack.c.bf16 %v4945_v31, %v4944_v39 }
 0x670   : > { %8236 = vmatprep.subr.bf16.mxu0 %v8235_v5  ;;  %8260 = vmatprep.subr.bf16.mxu1 %v8259_v58  ;;  %v4601_v29 = vpop.f32.mrb[156].mxu0  ;;  %v8279_v5 = vpack.c.bf16 %v4963_v52, %v4962_v48  ;;  %v4947_v58 = vld [vmem:[%s10953_s10 + $0x378] sm:$0xff] }
 0x671   : > { %5191 = vmatprep.mubr.f32.mxu0 %v4601_v29  ;;  %v7276_v20 = vpop.f32.mrb[157].mxu0  ;;  %v8281_v34 = vpack.c.bf16 %v4947_v58, %v4946_v46  ;;  %v4978_v29 = vld [vmem:[%s10953_s10 + $0x470] sm:$0xff] }
 0x672   : > { %v8305_v26 = vpack.c.bf16 %v4979_v4, %v4978_v29  ;;  %v5348_v20 = vld [vmem:[%s10955_s12 + $0x8] sm:$0xff] }
 0x673   : > { %8238 = vmatpush3.bf16.msra.mxu0 %v8237_v17  ;;  %8262 = vmatpush3.bf16.msra.mxu1 %v8261_v61  ;;  %v4971_v17 = vld [vmem:[%s10953_s10 + $0x438] sm:$0xff] }
 0x674   : > { %8240 = vmatprep.subr.bf16.mxu0 %v8239_v8  ;;  %8264 = vmatprep.subr.bf16.mxu1 %v8263_v18  ;;  %v4755_v24 = vpop.f32.mrb[158].mxu0  ;;  %v8293_v61 = vpack.c.bf16 %v4971_v17, %v4970_v14  ;;  %v8296_v8 = vpack.c.bf16 %v4973_v6, %v4972_v45  ;;  %v5363_v6 = vld [vmem:[%s10956_s13] sm:$0x1] }
 0x675   : > { %5261 = vmatprep.mubr.f32.mxu1 %v4755_v24  ;;  %v7290_v28 = vpop.f32.mrb[159].mxu0  ;;  %v5355_v24 = vld [vmem:[%s10955_s12 + $0x40] sm:$0xff] }
 0x676   : > { %v8320_v36 = vpack.c.bf16 %v5356_v23, %v5355_v24  ;;  %v5358_v28 = vld [vmem:[%s10955_s12 + $0x58] sm:$0xff] }
 0x677   : > { %8242 = vmatpush3.bf16.msra.mxu0 %v8241_v41  ;;  %8266 = vmatpush3.bf16.msra.mxu1 %v8265_v44  ;;  %v5349_v41 = vld [vmem:[%s10955_s12 + $0x10] sm:$0xff]  ;;  %v8308_v44 = vpack.c.bf16 %v5348_v20, %v5347_v50 }
 0x678   : > { %8244 = vmatprep.subr.bf16.mxu0 %v8243_v11  ;;  %8268 = vmatprep.subr.bf16.mxu1 %v8267_v15  ;;  %v8311_v0 = vpack.c.bf16 %v5350_v10, %v5349_v41  ;;  %v5352_v11 = vld [vmem:[%s10955_s12 + $0x28] sm:$0xff] }
 0x67b   : > { %8246 = vmatpush3.bf16.msra.mxu0 %v8245_v42  ;;  %8270 = vmatpush3.bf16.msra.mxu1 %v8269_v30  ;;  %v8323_v42 = vpack.c.bf16 %v5358_v28, %v5357_v27  ;;  %v5359_v30 = vld [vmem:[%s10955_s12 + $0x60] sm:$0xff] }
 0x67c   : > { %8248 = vmatprep.subr.bf16.mxu0 %v8247_v60  ;;  %8272 = vmatprep.subr.bf16.mxu1 %v8271_v32  ;;  %v8326_v60 = vpack.c.bf16 %v5360_v33, %v5359_v30  ;;  %v5361_v32 = vld [vmem:[%s10955_s12 + $0x70] sm:$0xff] }
 0x67d   : > { %v8329_v43 = vpack.c.bf16 %v5362_v56, %v5361_v32 }
 0x67f   : > { %8250 = vmatpush3.bf16.msra.mxu0 %v8249_v57  ;;  %8274 = vmatpush3.bf16.msra.mxu1 %v8273_v1  ;;  %v5639_v57 = vld [vmem:[%s10954_s11] ss:$0 sm:$0xff] }
 0x680   : > { %8276 = vmatprep.subr.bf16.mxu1 %v8275_v51  ;;  %8283 = vmatprep.subr.bf16.mxu0 %v8449_v7 }
 0x682   : > { %5192 = vmatmul.mubr.f32.vlgmr.msra.gmra.mrb[162].mxu0 %v10676_v54  ;;  %v8290_v54 = vpack.c.bf16 %v4969_v3, %v4968_v2 }
 0x683   : > { %8278 = vmatpush3.bf16.msra.mxu1 %v8277_v9  ;;  %8285 = vmatpush3.bf16.msra.mxu0 %v8284_v53 }
 0x684   : > { %8280 = vmatprep.subr.bf16.mxu1 %v8279_v5  ;;  %8286 = vmatprep.subr.bf16.mxu0 %v8449_v7 }
 0x685   : > { %7330 = vmatprep.mubr.msk.f32.mxu0 %vm8450_vm2, %v8451_v40 }
 0x687   : > { %8282 = vmatpush3.bf16.msra.mxu1 %v8281_v34  ;;  %8288 = vmatpush3.bf16.msra.mxu0 %v8287_v62 }
 0x688   : > { %8289 = vmatprep.subr.bf16.mxu0 %v8449_v7  ;;  %8307 = vmatprep.subr.bf16.mxu1 %v8449_v7 }
 0x68a   : > { %5262 = vmatmul.mubr.f32.vlgmr.msra.gmra.mrb[144].mxu1 %v10591_v16  ;;  %v4974_v16 = vld [vmem:[%s10953_s10 + $0x450] sm:$0xff] }
 0x68b   : > { %8291 = vmatpush3.bf16.msra.mxu0 %v8290_v54  ;;  %7365 = vmatprep.mubr.msk.f32.mxu1 %vm8450_vm2, %v8451_v40  ;;  %v4975_v40 = vld [vmem:[%s10953_s10 + $0x458] sm:$0xff] }
 0x68c   : > { %8292 = vmatprep.subr.bf16.mxu0 %v8449_v7  ;;  %v8299_v18 = vpack.c.bf16 %v4975_v40, %v4974_v16  ;;  %8309 = vmatpush3.bf16.msra.mxu1 %v8308_v44 }
 0x68d   : > { %8310 = vmatprep.subr.bf16.mxu1 %v8449_v7 }
 0x68f   : > { %8294 = vmatpush3.bf16.msra.mxu0 %v8293_v61 }
 0x690   : > { %8295 = vmatprep.subr.bf16.mxu0 %v8449_v7  ;;  %8312 = vmatpush3.bf16.msra.mxu1 %v8311_v0 }
 0x691   : > { %8313 = vmatprep.subr.bf16.mxu1 %v8449_v7 }
 0x693   : > { %8297 = vmatpush3.bf16.msra.mxu0 %v8296_v8 }
 0x694   : > { %8298 = vmatprep.subr.bf16.mxu0 %v8449_v7 }
 0x697   : > { %8300 = vmatpush3.bf16.msra.mxu0 %v8299_v18 }
 0x698   : > { %8301 = vmatprep.subr.bf16.mxu0 %v8449_v7 }
 0x69b   : > { %8303 = vmatpush3.bf16.msra.mxu0 %v8302_v13 }
 0x69c   : > { %8304 = vmatprep.subr.bf16.mxu0 %v8449_v7 }
 0x69f   : > { %8306 = vmatpush3.bf16.msra.mxu0 %v8305_v26 }
 0x6a2   : > { %7331 = vmatmul.mubr.f32.vlgmr.msra.gmra.mrb[164].mxu0 %v10605_v19  ;;  %v5351_v19 = vld [vmem:[%s10955_s12 + $0x20] sm:$0xff] }
 0x6a3   : > { %v8314_v15 = vpack.c.bf16 %v5352_v11, %v5351_v19 }
 0x6a5   : > { %8315 = vmatpush3.bf16.msra.mxu1 %v8314_v15 }
 0x6a6   : > { %8316 = vmatprep.subr.bf16.mxu1 %v8449_v7 }
 0x6a9   : > { %8318 = vmatpush3.bf16.msra.mxu1 %v8317_v22 }
 0x6aa   : > { %8319 = vmatprep.subr.bf16.mxu1 %v8449_v7 }
 0x6ad   : > { %8321 = vmatpush3.bf16.msra.mxu1 %v8320_v36 }
 0x6ae   : > { %8322 = vmatprep.subr.bf16.mxu1 %v8449_v7 }
 0x6b1   : > { %8324 = vmatpush3.bf16.msra.mxu1 %v8323_v42 }
 0x6b2   : > { %8325 = vmatprep.subr.bf16.mxu1 %v8449_v7 }
 0x6b5   : > { %8327 = vmatpush3.bf16.msra.mxu1 %v8326_v60 }
 0x6b6   : > { %8328 = vmatprep.subr.bf16.mxu1 %v8449_v7 }
 0x6b9   : > { %8330 = vmatpush3.bf16.msra.mxu1 %v8329_v43 }
 0x735   : > { %v6787_v35 = vpop.f32.mrb[160].mxu0 }
 0x736   : > { %v6788_v49 = vpop.f32.mrb[161].mxu0 }
 0x737   : > { %v6789_v37 = vadd.f32 %v6788_v49, %v6787_v35 }
 0x739   : > { %v5054_v7 = vadd.f32 %v6789_v37, %v5639_v57 }
 0x73d   : > { %v6822_v1 = vpop.f32.mrb[142].mxu1 }
 0x73e   : > { %v6823_v39 = vpop.f32.mrb[143].mxu1 }
 0x73f   : > { %v6824_v51 = vadd.f32 %v6823_v39, %v6822_v1 }
 0x741   : > { %v5124_v31 = vadd.f32 %v6824_v51, %v5054_v7 }
 0x755   : > { %v6857_v55 = vpop.f32.mrb[162].mxu0 }
 0x756   : > { %v6858_v47 = vpop.f32.mrb[163].mxu0 }
 0x757   : > { %v6859_v48 = vadd.f32 %v6858_v47, %v6857_v55 }
 0x759   : > { %v5194_v52 = vadd.f32 %v6859_v48, %v5124_v31 }
 0x75d   : > { %v6892_v9 = vpop.f32.mrb[144].mxu1 }
 0x75e   : > { %v6893_v53 = vpop.f32.mrb[145].mxu1 }
 0x75f   : > { %v6894_v46 = vadd.f32 %v6893_v53, %v6892_v9 }
 0x761   : > { %v5264_v5 = vadd.f32 %v6894_v46, %v5194_v52 }
 0x775   : > { %v5333_v58 = vpop.f32.mrb[164].mxu0 }
 0x776   : > { %v5334_v63 = vadd.f32 %v5333_v58, %v5264_v5  ;;  %v7332_v59 = vpop.f32.mrb[165].mxu0 }
 0x778   : > { %v5337_v34 = vmax.f32 %v5334_v63, 0.0 }
 0x77a   : > { %v5339_v62 = vsel %vm5338_vm4, %v5337_v34, 0.0 }
 0x77b   : > { %v5340_v2 = vrot.slane %v5339_v62, 4 }
 0x77d   : > { %v5341_v3 = vadd.f32 %v5340_v2, %v5339_v62 }
 0x77f   : > { %v5342_v54 = vrot.slane %v5341_v3, 2 }
 0x781   : > { %v5343_v14 = vadd.f32 %v5342_v54, %v5341_v3 }
 0x783   : > { %v5344_v17 = vrot.slane %v5343_v14, 1 }
 0x785   : > { %v5345_v61 = vadd.f32 %v5344_v17, %v5343_v14 }
 0x787   : > { %v5346_v45 = vmul.f32 0.25, %v5345_v61 }
 0x789   : > { %7366 = vmatmul.mubr.f32.vlgmr.msra.gmra.mrb[146].mxu1 %v5346_v45 }
 0x85c   : > { %v5430_v8 = vpop.f32.mrb[146].mxu1 }
 0x85d   : > { %v5431_v16 = vadd.f32 %v5430_v8, %v5363_v6  ;;  %v7367_v40 = vpop.f32.mrb[147].mxu1 }
 0x85f   : > { %v5435_v18 = vsel %vm5434_vm5, %v5431_v16, -inf }
 0x860   : > { %5436 = vmax.xlane.f32.xlu0 %v5435_v18 }
 0x8ed   : > { %v5437_v12 = vpop.xlane.xlu0 %5436 }
 0x8ee   : > { %v5438_v25 = vsub.f32 %v5431_v16, %v5437_v12 }
 0x8f0   : > { %v5439_v13 = vmul.f32 1.442695, %v5438_v25 }
 0x8f2   : > { %8381 = vpow2.f32 %v5439_v13 }
 0x8fc   : > { %v8382_v29 = vpop.eup %8381 }
 0x8fd   : > { %v5441_v4 = vsel %vm5434_vm5, %v8382_v29, 0.0 }
 0x8fe   : > { %5442 = vadd.xlane.f32.xlu0 %v5441_v4 }
 0x98b   : > { %v5443_v26 = vpop.xlane.xlu0 %5442 }
 0x98c   : > { %8383 = vrcp.f32 %v5443_v26 }
 0x996   : > { %v8384_v50 = vpop.eup %8383 }
 0x997   : > { %v5445_v20 = vmul.f32 %v8384_v50, %v8382_v29 }
 0x999   : > { %5446 = vst [vmem:[%s459_s28] sm:$0x1] %v5445_v20 }
 0x99a   : > { %8398 = shalt.err (!%p8395_p3)
}
 0x99b   : > { %s8399_s26 = scalar_lea.hbm %s10901_s20, 16  ;;  %s8403_s28 = scalar_lea.hbm %s10957_s14, 32 }
 0x99c   : > { %p8400_p4 = scmp.ne.s32.totalorder %s10901_s20, %s8399_s26  ;;  %p8404_p9 = scmp.lt.u32.totalorder %s10901_s20, %s10957_s14 }
 0x99d   : > { %p8405_p10 = scmp.lt.u32.totalorder %s8403_s28, %s8399_s26  ;;  %p8407_p12 = scmp.lt.u32.totalorder %s8399_s26, %s10901_s20 }
 0x99e   : > { %p8401_p7 = pnand %p8400_p4, %p8566_p5 }
 0x99f   : > { %p8406_p11 = por %p8405_p10, %p8404_p9 }
 0x9a0   : > { %p8402_p8 = pneg %p8401_p7 }
 0x9a1   : > { %p8408_p13 = por %p8407_p12, %p8406_p11 }
 0x9a3   : > { %p8409_p0 = pnand %p8408_p13, %p8402_p8 }
 0x9a5   : > { %8412 = shalt.err (!%p8409_p0)
}
 0x9a6   : > { %8339 = dma.vmem_to_hbm [thread:$0]  (%p8566_p5), %s10903_s15, 16, %s10901_s20, %s5448_s21  }
 0x9a7 PF: > { %p8345_p1 = scmp.ge.s32.totalorder %s8447_s16, 2  ;;  %s5472_s25 = sand.u32 1, %s8435_s29  }
 0x9a8   : > { %s5473_s17 = scalar_lea.sflag [#allocation3], %s5472_s25 }
 0x9a9   : > { %p8342_p2 = pnand %p8345_p1, %p8570_p6 }
 0x9ab   : > { %8430 = dma.done.wait (!%p8342_p2), %s5473_s17, 16  }
 0x9ac   : > { %8432 = vsyncadd (!%p8342_p2), %s5473_s17, 4294967280  ;;  %s10969_s1 = sld [smem:[#allocation5_spill]]  ;;  %s10970_s15 = sld [smem:[#allocation6_spill]] }
 0x9ad   : > { %p24_p3 = scmp.ge.s32.totalorder %s8553_s19, 4   ;;  %s10971_s29 = smov %s8439_s30 }
 0x9ae   : > { %s10973_s16 = smov %s8553_s19 }
 0x9af   :  { %26 = sbr.rel (!%p24_p3) target bundleno = 7 (0x7), region = 135 }
 0x9b2   : > { %s10972_s30 = smov %s10969_s1 }
 0x9b6   :  { %5477 = vsyncpa [#allocation3], 1 }
 0x9b7   :  { %5479 = vsyncpa [#allocation3 + $0x1], 1 }

</bundles_post_ra>
